<compile_context>
chip_gen: v7x
topology: tpu7x:2x2x1
jax: 0.10.0
libtpu: 0.0.40
codegen_flags: <defaults>
</compile_context>

<pallas_src>
import functools

import jax
import jax.numpy as jnp
from jax.experimental import pallas as pl
from jax.experimental.pallas import tpu as pltpu

EPS = 1e-5                      # nn.BatchNorm2d default eps
VMEM_LIMIT = 32 * 1024 * 1024   # explicit scoped-VMEM limit (safe on v5e/v6e/v7x)


def _round_up(x, m):
    return (x + m - 1) // m * m


def _compiler_params():
    return pltpu.CompilerParams(dimension_semantics=("parallel",),
                                vmem_limit_bytes=VMEM_LIMIT)


# ----------------------------------------------------------------------------
# Kernel 1: per-batch per-channel sum / sum-of-squares (for BN0 batch stats)
# ----------------------------------------------------------------------------
def _stats_kernel(x_ref, ps_ref, pq_ref):
    x = x_ref[0].astype(jnp.float32)                  # (HW, Cp)
    ps_ref[0] = jnp.sum(x, axis=0, keepdims=True)
    pq_ref[0] = jnp.sum(x * x, axis=0, keepdims=True)


def batch_channel_stats(x3d):
    N, HW, Cp = x3d.shape
    return pl.pallas_call(
        _stats_kernel,
        out_shape=(jax.ShapeDtypeStruct((N, 1, Cp), jnp.float32),
                   jax.ShapeDtypeStruct((N, 1, Cp), jnp.float32)),
        grid=(N,),
        in_specs=[pl.BlockSpec((1, HW, Cp), lambda n: (n, 0, 0))],
        out_specs=(pl.BlockSpec((1, 1, Cp), lambda n: (n, 0, 0)),
                   pl.BlockSpec((1, 1, Cp), lambda n: (n, 0, 0))),
        compiler_params=_compiler_params(),
    )(x3d)


# ----------------------------------------------------------------------------
# Kernel 2: fused [BN affine (+PReLU)] -> 3x3 conv (9 shifted-window matmuls)
#           -> partial BN stats of the conv output
# ----------------------------------------------------------------------------
def _conv_bn_kernel(x_ref, s_ref, b_ref, w_ref, a_ref,
                    out_ref, ps_ref, pq_ref,
                    pad_ref, acc_ref, *, H, W, apply_prelu):
    Cp = x_ref.shape[-1]
    x = x_ref[0].astype(jnp.float32)                  # (H*W, Cin_p)
    act = x * s_ref[0] + b_ref[0]                     # fused BN affine (f32)
    if apply_prelu:
        al = a_ref[0, 0]
        act = jnp.where(act >= 0, act, al * act)      # fused PReLU (shared alpha)

    # Zero-padded activation staged in VMEM: halo = the conv's zero padding.
    pad_ref[...] = jnp.zeros_like(pad_ref)
    pad_ref[1:1 + H, 1:1 + W, :] = act.reshape(H, W, Cp)

    # 3x3 conv = 9 shifted-window matmuls on the MXU (bf16 x bf16 -> f32 acc).
    acc_ref[...] = jnp.zeros_like(acc_ref)
    for kh in range(3):
        for kw in range(3):
            win = pad_ref[kh:kh + H, kw:kw + W, :].astype(jnp.bfloat16)
            acc_ref[...] += jnp.dot(win.reshape(H * W, Cp),
                                    w_ref[kh * 3 + kw],
                                    preferred_element_type=jnp.float32)
    acc = acc_ref[...]

    # Fused per-channel partial statistics for the *next* BatchNorm.
    ps_ref[0] = jnp.sum(acc, axis=0, keepdims=True)
    pq_ref[0] = jnp.sum(acc * acc, axis=0, keepdims=True)
    out_ref[0] = acc.astype(out_ref.dtype)


def conv_bn(x3d, scale, bias, w_taps, alpha, *, H, W, apply_prelu, out_dtype):
    N, HW, Cp = x3d.shape
    Cout = w_taps.shape[-1]
    kern = functools.partial(_conv_bn_kernel, H=H, W=W, apply_prelu=apply_prelu)
    return pl.pallas_call(
        kern,
        out_shape=(jax.ShapeDtypeStruct((N, HW, Cout), out_dtype),
                   jax.ShapeDtypeStruct((N, 1, Cout), jnp.float32),
                   jax.ShapeDtypeStruct((N, 1, Cout), jnp.float32)),
        grid=(N,),
        in_specs=[
            pl.BlockSpec((1, HW, Cp), lambda n: (n, 0, 0)),
            pl.BlockSpec((1, 1, Cp), lambda n: (0, 0, 0)),
            pl.BlockSpec((1, 1, Cp), lambda n: (0, 0, 0)),
            pl.BlockSpec((9, Cp, Cout), lambda n: (0, 0, 0)),
            pl.BlockSpec(memory_space=pltpu.SMEM),
        ],
        out_specs=(
            pl.BlockSpec((1, HW, Cout), lambda n: (n, 0, 0)),
            pl.BlockSpec((1, 1, Cout), lambda n: (n, 0, 0)),
            pl.BlockSpec((1, 1, Cout), lambda n: (n, 0, 0)),
        ),
        scratch_shapes=[pltpu.VMEM((H + 2, W + 2, Cp), jnp.float32),
                        pltpu.VMEM((H * W, Cout), jnp.float32)],
        compiler_params=_compiler_params(),
    )(x3d, scale, bias, w_taps, alpha)


# ----------------------------------------------------------------------------
# Kernel 3: fused BN2 affine + SE + residual add + final PReLU
# ----------------------------------------------------------------------------
def _bn_se_res_kernel(x_ref, r_ref, s_ref, b_ref, w1_ref, b1_ref, w2_ref, bf2_ref,
                      ase_ref, am_ref, o_ref):
    x = x_ref[0].astype(jnp.float32) * s_ref[0] + b_ref[0]    # fused BN2, (HW, Cp)
    hw = x.shape[0]

    # SE squeeze: adaptive avg pool + adaptive max pool over spatial positions.
    y = jnp.sum(x, axis=0, keepdims=True) * (1.0 / hw) + \
        jnp.max(x, axis=0, keepdims=True)                     # (1, Cp)

    # SE fc1 -> PReLU -> fc2 -> sigmoid (tiny matmuls on the MXU).
    h = jnp.dot(y, w1_ref[...], preferred_element_type=jnp.float32) + b1_ref[...]
    a_se = ase_ref[0, 0]
    h = jnp.where(h >= 0, h, a_se * h)
    g = jnp.dot(h, w2_ref[...], preferred_element_type=jnp.float32) + bf2_ref[...]
    g = jax.nn.sigmoid(g)                                     # (1, Cp)

    out = x * g + r_ref[0].astype(jnp.float32)                # excite + residual
    a = am_ref[0, 0]
    o_ref[0] = jnp.where(out >= 0, out, a * out)              # final PReLU


def bn_se_res(x3d, r3d, s2, b2, w1, b1, w2, bf2, a_se, a_main):
    N, HW, Cp = x3d.shape
    Crp = w1.shape[1]
    return pl.pallas_call(
        _bn_se_res_kernel,
        out_shape=jax.ShapeDtypeStruct((N, HW, Cp), jnp.float32),
        grid=(N,),
        in_specs=[
            pl.BlockSpec((1, HW, Cp), lambda n: (n, 0, 0)),
            pl.BlockSpec((1, HW, Cp), lambda n: (n, 0, 0)),
            pl.BlockSpec((1, 1, Cp), lambda n: (0, 0, 0)),
            pl.BlockSpec((1, 1, Cp), lambda n: (0, 0, 0)),
            pl.BlockSpec((Cp, Crp), lambda n: (0, 0)),
            pl.BlockSpec((1, Crp), lambda n: (0, 0)),
            pl.BlockSpec((Crp, Cp), lambda n: (0, 0)),
            pl.BlockSpec((1, Cp), lambda n: (0, 0)),
            pl.BlockSpec(memory_space=pltpu.SMEM),
            pl.BlockSpec(memory_space=pltpu.SMEM),
        ],
        out_specs=pl.BlockSpec((1, HW, Cp), lambda n: (n, 0, 0)),
        compiler_params=_compiler_params(),
    )(x3d, r3d, s2, b2, w1, b1, w2, bf2, a_se, a_main)


# ----------------------------------------------------------------------------
# BN finalize (tiny per-channel scalar math, plain JAX)
# ----------------------------------------------------------------------------
def _bn_finalize(psum, psumsq, gamma_p, beta_p, count):
    s = jnp.sum(psum, axis=0)[0]                  # (Cp,)
    q = jnp.sum(psumsq, axis=0)[0]
    mean = s / count
    var = jnp.maximum(q / count - mean * mean, 0.0)   # biased var (PyTorch training BN)
    scale = gamma_p / jnp.sqrt(var + EPS)
    bias = beta_p - mean * scale
    return scale.reshape(1, 1, -1), bias.reshape(1, 1, -1)


# ----------------------------------------------------------------------------
# IRBlock forward
# ----------------------------------------------------------------------------
def irblock_forward(x_nchw, params, stride=1):
    # TODO(synk): stride > 1 / downsample branch not implemented (demo: stride=1, downsample=None).
    assert stride == 1
    x = jnp.transpose(x_nchw, (0, 2, 3, 1)).astype(jnp.float32)     # NCHW -> NHWC
    N, H, W, C = x.shape
    planes = params["bn2_g"].shape[0]
    assert planes == C, "residual path requires planes == inplanes (downsample=None)"
    Cr = params["se_b1"].shape[0]
    Cp = _round_up(C, 128)          # lane-dense channel padding
    Crp = _round_up(Cr, 128)
    M = N * H * W

    # Channel-pad + flatten spatial -> (N, H*W, Cp). Padded channels stay zero end-to-end.
    xp = jnp.pad(x, ((0, 0), (0, 0), (0, 0), (0, Cp - C))).reshape(N, H * W, Cp)

    def cpad(v, n):
        return jnp.pad(v, (0, n - v.shape[0]))

    g0, be0 = cpad(params["bn0_g"], Cp), cpad(params["bn0_b"], Cp)
    g1, be1 = cpad(params["bn1_g"], Cp), cpad(params["bn1_b"], Cp)
    g2, be2 = cpad(params["bn2_g"], Cp), cpad(params["bn2_b"], Cp)

    # Conv weights (Cout, Cin, 3, 3) -> per-tap matrices (9, Cp, Cp), bf16 for the MXU.
    def taps(w):
        cout, cin = w.shape[0], w.shape[1]
        t = jnp.transpose(w, (2, 3, 1, 0)).reshape(9, cin, cout)
        t = jnp.pad(t, ((0, 0), (0, Cp - cin), (0, Cp - cout)))
        return t.astype(jnp.bfloat16)

    w1_taps = taps(params["conv1_w"])
    w2_taps = taps(params["conv2_w"])

    se_w1 = jnp.pad(params["se_w1"], ((0, Cp - C), (0, Crp - Cr))).astype(jnp.float32)
    se_b1 = cpad(params["se_b1"], Crp).reshape(1, Crp).astype(jnp.float32)
    se_w2 = jnp.pad(params["se_w2"], ((0, Crp - Cr), (0, Cp - C))).astype(jnp.float32)
    se_b2 = cpad(params["se_b2"], Cp).reshape(1, Cp).astype(jnp.float32)

    alpha = params["prelu_a"].reshape(1, 1).astype(jnp.float32)       # shared nn.PReLU()
    alpha_se = params["se_prelu_a"].reshape(1, 1).astype(jnp.float32)  # SE-internal PReLU

    # ---- BN0 batch statistics (Pallas reduction) ----
    ps0, pq0 = batch_channel_stats(xp)
    s0, b0 = _bn_finalize(ps0, pq0, g0, be0, M)

    # ---- fused: BN0 apply + conv1 (3x3) + BN1 partial stats ----
    c1, ps1, pq1 = conv_bn(xp, s0, b0, w1_taps, alpha, H=H, W=W,
                           apply_prelu=False, out_dtype=jnp.bfloat16)
    s1, b1 = _bn_finalize(ps1, pq1, g1, be1, M)

    # ---- fused: BN1 apply + PReLU + conv2 (3x3, stride 1) + BN2 partial stats ----
    c2, ps2, pq2 = conv_bn(c1, s1, b1, w2_taps, alpha, H=H, W=W,
                           apply_prelu=True, out_dtype=jnp.float32)
    s2, b2 = _bn_finalize(ps2, pq2, g2, be2, M)

    # ---- fused: BN2 apply + SE + residual + final PReLU ----
    out = bn_se_res(c2, xp, s2, b2, se_w1, se_b1, se_w2, se_b2, alpha_se, alpha)

    out = out.reshape(N, H, W, Cp)[..., :C]                  # crop channel padding
    return jnp.transpose(out, (0, 3, 1, 2))                  # back to NCHW


# ----------------------------------------------------------------------------
# Deterministic parameter initialization (synthetic, PyTorch-layout shapes)
# ----------------------------------------------------------------------------
def init_params(key, inplanes, planes, reduction=16):
    ks = jax.random.split(key, 4)
    Cr = planes // reduction
    return dict(
        bn0_g=jnp.ones((inplanes,), jnp.float32), bn0_b=jnp.zeros((inplanes,), jnp.float32),
        bn1_g=jnp.ones((inplanes,), jnp.float32), bn1_b=jnp.zeros((inplanes,), jnp.float32),
        bn2_g=jnp.ones((planes,), jnp.float32), bn2_b=jnp.zeros((planes,), jnp.float32),
        prelu_a=jnp.full((1,), 0.25, jnp.float32),            # shared nn.PReLU()
        conv1_w=jax.random.normal(ks[0], (inplanes, inplanes, 3, 3), jnp.float32) * 0.1,
        conv2_w=jax.random.normal(ks[1], (planes, inplanes, 3, 3), jnp.float32) * 0.1,
        se_w1=jax.random.normal(ks[2], (planes, Cr), jnp.float32) * 0.1,
        se_b1=jnp.zeros((Cr,), jnp.float32),
        se_w2=jax.random.normal(ks[3], (Cr, planes), jnp.float32) * 0.1,
        se_b2=jnp.zeros((planes,), jnp.float32),
        se_prelu_a=jnp.full((1,), 0.25, jnp.float32),          # PReLU inside SE fc
    )


if __name__ == "__main__":
    key = jax.random.PRNGKey(0)
    kx, kp = jax.random.split(key)
    N, C, H, W = 2, 32, 16, 16                # batch=2, inplanes=planes=32, spatial=16
    x = jax.random.normal(kx, (N, C, H, W), jnp.float32)
    params = init_params(kp, inplanes=C, planes=C)

    fwd = jax.jit(irblock_forward)
    out = fwd(x, params)
    jax.block_until_ready(out)
    assert out.shape == (N, C, H, W) and out.dtype == jnp.float32
    assert bool(jnp.all(jnp.isfinite(out)))
    print("KERNEL_OK")
</pallas_src>

<mosaic_0001>
module attributes {stable_mosaic.version = 11 : i64} {
  func.func @_stats_kernel(%arg0: i32, %arg1: memref<1x256x128xf32, #tpu.memory_space<vmem>>, %arg2: memref<1x1x128xf32, #tpu.memory_space<vmem>>, %arg3: memref<1x1x128xf32, #tpu.memory_space<vmem>>) attributes {dimension_semantics = [#tpu.dimension_semantics<parallel>], iteration_bounds = array<i64: 2>, scalar_prefetch = 0 : i64, scratch_operands = 0 : i64, tpu.core_type = #tpu.core_type<tc>, window_params = [{transform_indices = @transform_0, window_bounds = array<i64: 1, 256, 128>}, {transform_indices = @transform_1, window_bounds = array<i64: 1, 1, 128>}, {transform_indices = @transform_2, window_bounds = array<i64: 1, 1, 128>}]} {
    %c0 = arith.constant 0 : index
    %c0_0 = arith.constant 0 : index
    %c0_1 = arith.constant 0 : index
    %0 = vector.load %arg1[%c0, %c0_0, %c0_1] : memref<1x256x128xf32, #tpu.memory_space<vmem>>, vector<1x256x128xf32>
    %1 = vector.shape_cast %0 : vector<1x256x128xf32> to vector<256x128xf32>
    %cst = arith.constant dense<0.000000e+00> : vector<128xf32>
    %2 = vector.multi_reduction <add>, %1, %cst [0] : vector<256x128xf32> to vector<128xf32>
    %3 = vector.shape_cast %2 : vector<128xf32> to vector<1x128xf32>
    %c0_2 = arith.constant 0 : index
    %c0_3 = arith.constant 0 : index
    %c0_4 = arith.constant 0 : index
    %4 = vector.load %arg2[%c0_2, %c0_3, %c0_4] : memref<1x1x128xf32, #tpu.memory_space<vmem>>, vector<1x1x128xf32>
    %5 = vector.shape_cast %4 : vector<1x1x128xf32> to vector<1x128xf32>
    %6 = vector.shape_cast %3 : vector<1x128xf32> to vector<1x1x128xf32>
    tpu.vector_store %arg2[%c0_2, %c0_3, %c0_4], %6 {strides = array<i32>} : memref<1x1x128xf32, #tpu.memory_space<vmem>>, vector<1x1x128xf32>,
    %7 = arith.mulf %1, %1 : vector<256x128xf32>
    %cst_5 = arith.constant dense<0.000000e+00> : vector<128xf32>
    %8 = vector.multi_reduction <add>, %7, %cst_5 [0] : vector<256x128xf32> to vector<128xf32>
    %9 = vector.shape_cast %8 : vector<128xf32> to vector<1x128xf32>
    %c0_6 = arith.constant 0 : index
    %c0_7 = arith.constant 0 : index
    %c0_8 = arith.constant 0 : index
    %10 = vector.load %arg3[%c0_6, %c0_7, %c0_8] : memref<1x1x128xf32, #tpu.memory_space<vmem>>, vector<1x1x128xf32>
    %11 = vector.shape_cast %10 : vector<1x1x128xf32> to vector<1x128xf32>
    %12 = vector.shape_cast %9 : vector<1x128xf32> to vector<1x1x128xf32>
    tpu.vector_store %arg3[%c0_6, %c0_7, %c0_8], %12 {strides = array<i32>} : memref<1x1x128xf32, #tpu.memory_space<vmem>>, vector<1x1x128xf32>,
    return
  }
  func.func @transform_0(%arg0: i32) -> (i32, i32, i32) {
    %c0_i32 = arith.constant 0 : i32
    %c0_i32_0 = arith.constant 0 : i32
    %c0_i32_1 = arith.constant 0 : i32
    return %arg0, %c0_i32, %c0_i32_0 : i32, i32, i32
  }
  func.func @transform_1(%arg0: i32) -> (i32, i32, i32) {
    %c0_i32 = arith.constant 0 : i32
    %c0_i32_0 = arith.constant 0 : i32
    %c0_i32_1 = arith.constant 0 : i32
    return %arg0, %c0_i32, %c0_i32_0 : i32, i32, i32
  }
  func.func @transform_2(%arg0: i32) -> (i32, i32, i32) {
    %c0_i32 = arith.constant 0 : i32
    %c0_i32_0 = arith.constant 0 : i32
    %c0_i32_1 = arith.constant 0 : i32
    return %arg0, %c0_i32, %c0_i32_0 : i32, i32, i32
  }
}

module attributes {stable_mosaic.version = 11 : i64} {
  func.func @_conv_bn_kernel(%arg0: i32, %arg1: memref<1x256x128xf32, #tpu.memory_space<vmem>>, %arg2: memref<1x1x128xf32, #tpu.memory_space<vmem>>, %arg3: memref<1x1x128xf32, #tpu.memory_space<vmem>>, %arg4: memref<9x128x128xbf16, #tpu.memory_space<vmem>>, %arg5: memref<1x1xf32, #tpu.memory_space<smem>>, %arg6: memref<1x256x128xbf16, #tpu.memory_space<vmem>>, %arg7: memref<1x1x128xf32, #tpu.memory_space<vmem>>, %arg8: memref<1x1x128xf32, #tpu.memory_space<vmem>>, %arg9: memref<18x18x128xf32, #tpu.memory_space<vmem>>, %arg10: memref<256x128xf32, #tpu.memory_space<vmem>>) attributes {dimension_semantics = [#tpu.dimension_semantics<parallel>], iteration_bounds = array<i64: 2>, scalar_prefetch = 0 : i64, scratch_operands = 2 : i64, tpu.core_type = #tpu.core_type<tc>, window_params = [{transform_indices = @transform_0, window_bounds = array<i64: 1, 256, 128>}, {pipeline_mode = #tpu.pipeline_mode<synchronous>, transform_indices = @transform_1, window_bounds = array<i64: 1, 1, 128>}, {pipeline_mode = #tpu.pipeline_mode<synchronous>, transform_indices = @transform_2, window_bounds = array<i64: 1, 1, 128>}, {pipeline_mode = #tpu.pipeline_mode<synchronous>, transform_indices = @transform_3, window_bounds = array<i64: 9, 128, 128>}, {transform_indices = @transform_4, window_bounds = array<i64: 1, 1>}, {transform_indices = @transform_5, window_bounds = array<i64: 1, 256, 128>}, {transform_indices = @transform_6, window_bounds = array<i64: 1, 1, 128>}, {transform_indices = @transform_7, window_bounds = array<i64: 1, 1, 128>}]} {
    %c0 = arith.constant 0 : index
    %c0_0 = arith.constant 0 : index
    %c0_1 = arith.constant 0 : index
    %0 = vector.load %arg1[%c0, %c0_0, %c0_1] : memref<1x256x128xf32, #tpu.memory_space<vmem>>, vector<1x256x128xf32>
    %1 = vector.shape_cast %0 : vector<1x256x128xf32> to vector<256x128xf32>
    %c0_2 = arith.constant 0 : index
    %c0_3 = arith.constant 0 : index
    %c0_4 = arith.constant 0 : index
    %2 = vector.load %arg2[%c0_2, %c0_3, %c0_4] : memref<1x1x128xf32, #tpu.memory_space<vmem>>, vector<1x1x128xf32>
    %3 = vector.shape_cast %2 : vector<1x1x128xf32> to vector<1x128xf32>
    %4 = vector.broadcast %3 : vector<1x128xf32> to vector<256x128xf32>
    %5 = arith.mulf %1, %4 : vector<256x128xf32>
    %c0_5 = arith.constant 0 : index
    %c0_6 = arith.constant 0 : index
    %c0_7 = arith.constant 0 : index
    %6 = vector.load %arg3[%c0_5, %c0_6, %c0_7] : memref<1x1x128xf32, #tpu.memory_space<vmem>>, vector<1x1x128xf32>
    %7 = vector.shape_cast %6 : vector<1x1x128xf32> to vector<1x128xf32>
    %8 = vector.broadcast %7 : vector<1x128xf32> to vector<256x128xf32>
    %9 = arith.addf %5, %8 : vector<256x128xf32>
    %cst = arith.constant 0.000000e+00 : f32
    %10 = vector.broadcast %cst : f32 to vector<18x18x128xf32>
    %c0_8 = arith.constant 0 : index
    %c0_9 = arith.constant 0 : index
    %c0_10 = arith.constant 0 : index
    %11 = vector.load %arg9[%c0_8, %c0_9, %c0_10] : memref<18x18x128xf32, #tpu.memory_space<vmem>>, vector<18x18x128xf32>
    tpu.vector_store %arg9[%c0_8, %c0_9, %c0_10], %10 {strides = array<i32>} : memref<18x18x128xf32, #tpu.memory_space<vmem>>, vector<18x18x128xf32>,
    %12 = vector.shape_cast %9 : vector<256x128xf32> to vector<16x16x128xf32>
    %c1 = arith.constant 1 : index
    %c1_11 = arith.constant 1 : index
    %c0_12 = arith.constant 0 : index
    %13 = vector.load %arg9[%c1, %c1_11, %c0_12] : memref<18x18x128xf32, #tpu.memory_space<vmem>>, vector<16x16x128xf32>
    tpu.vector_store %arg9[%c1, %c1_11, %c0_12], %12 {strides = array<i32>} : memref<18x18x128xf32, #tpu.memory_space<vmem>>, vector<16x16x128xf32>,
    %cst_13 = arith.constant 0.000000e+00 : f32
    %14 = vector.broadcast %cst_13 : f32 to vector<256x128xf32>
    %c0_14 = arith.constant 0 : index
    %c0_15 = arith.constant 0 : index
    %15 = vector.load %arg10[%c0_14, %c0_15] : memref<256x128xf32, #tpu.memory_space<vmem>>, vector<256x128xf32>
    tpu.vector_store %arg10[%c0_14, %c0_15], %14 {strides = array<i32>} : memref<256x128xf32, #tpu.memory_space<vmem>>, vector<256x128xf32>,
    %c0_16 = arith.constant 0 : index
    %c0_17 = arith.constant 0 : index
    %c0_18 = arith.constant 0 : index
    %16 = vector.load %arg9[%c0_16, %c0_17, %c0_18] : memref<18x18x128xf32, #tpu.memory_space<vmem>>, vector<16x16x128xf32>
    %17 = arith.truncf %16 : vector<16x16x128xf32> to vector<16x16x128xbf16>
    %c0_19 = arith.constant 0 : index
    %c0_20 = arith.constant 0 : index
    %18 = vector.load %arg10[%c0_19, %c0_20] : memref<256x128xf32, #tpu.memory_space<vmem>>, vector<256x128xf32>
    %19 = vector.shape_cast %17 : vector<16x16x128xbf16> to vector<256x128xbf16>
    %c0_21 = arith.constant 0 : index
    %c0_22 = arith.constant 0 : index
    %c0_23 = arith.constant 0 : index
    %20 = vector.load %arg4[%c0_21, %c0_22, %c0_23] : memref<9x128x128xbf16, #tpu.memory_space<vmem>>, vector<1x128x128xbf16>
    %21 = vector.shape_cast %20 : vector<1x128x128xbf16> to vector<128x128xbf16>
    %cst_24 = arith.constant dense<0.000000e+00> : vector<256x128xf32>
    %22 = tpu.matmul %19, %21, %cst_24 {dimension_numbers = #tpu.dot_dimension_numbers<[1], [0], [0], [1], [0, 0, 1, 1], [], []>} : vector<256x128xbf16>, vector<128x128xbf16>, vector<256x128xf32> -> vector<256x128xf32>
    %23 = arith.addf %18, %22 : vector<256x128xf32>
    %c0_25 = arith.constant 0 : index
    %c0_26 = arith.constant 0 : index
    %24 = vector.load %arg10[%c0_25, %c0_26] : memref<256x128xf32, #tpu.memory_space<vmem>>, vector<256x128xf32>
    tpu.vector_store %arg10[%c0_25, %c0_26], %23 {strides = array<i32>} : memref<256x128xf32, #tpu.memory_space<vmem>>, vector<256x128xf32>,
    %c0_27 = arith.constant 0 : index
    %c1_28 = arith.constant 1 : index
    %c0_29 = arith.constant 0 : index
    %25 = vector.load %arg9[%c0_27, %c1_28, %c0_29] : memref<18x18x128xf32, #tpu.memory_space<vmem>>, vector<16x16x128xf32>
    %26 = arith.truncf %25 : vector<16x16x128xf32> to vector<16x16x128xbf16>
    %c0_30 = arith.constant 0 : index
    %c0_31 = arith.constant 0 : index
    %27 = vector.load %arg10[%c0_30, %c0_31] : memref<256x128xf32, #tpu.memory_space<vmem>>, vector<256x128xf32>
    %28 = vector.shape_cast %26 : vector<16x16x128xbf16> to vector<256x128xbf16>
    %c1_32 = arith.constant 1 : index
    %c0_33 = arith.constant 0 : index
    %c0_34 = arith.constant 0 : index
    %29 = vector.load %arg4[%c1_32, %c0_33, %c0_34] : memref<9x128x128xbf16, #tpu.memory_space<vmem>>, vector<1x128x128xbf16>
    %30 = vector.shape_cast %29 : vector<1x128x128xbf16> to vector<128x128xbf16>
    %cst_35 = arith.constant dense<0.000000e+00> : vector<256x128xf32>
    %31 = tpu.matmul %28, %30, %cst_35 {dimension_numbers = #tpu.dot_dimension_numbers<[1], [0], [0], [1], [0, 0, 1, 1], [], []>} : vector<256x128xbf16>, vector<128x128xbf16>, vector<256x128xf32> -> vector<256x128xf32>
    %32 = arith.addf %27, %31 : vector<256x128xf32>
    %c0_36 = arith.constant 0 : index
    %c0_37 = arith.constant 0 : index
    %33 = vector.load %arg10[%c0_36, %c0_37] : memref<256x128xf32, #tpu.memory_space<vmem>>, vector<256x128xf32>
    tpu.vector_store %arg10[%c0_36, %c0_37], %32 {strides = array<i32>} : memref<256x128xf32, #tpu.memory_space<vmem>>, vector<256x128xf32>,
    %c0_38 = arith.constant 0 : index
    %c2 = arith.constant 2 : index
    %c0_39 = arith.constant 0 : index
    %34 = vector.load %arg9[%c0_38, %c2, %c0_39] : memref<18x18x128xf32, #tpu.memory_space<vmem>>, vector<16x16x128xf32>
    %35 = arith.truncf %34 : vector<16x16x128xf32> to vector<16x16x128xbf16>
    %c0_40 = arith.constant 0 : index
    %c0_41 = arith.constant 0 : index
    %36 = vector.load %arg10[%c0_40, %c0_41] : memref<256x128xf32, #tpu.memory_space<vmem>>, vector<256x128xf32>
    %37 = vector.shape_cast %35 : vector<16x16x128xbf16> to vector<256x128xbf16>
    %c2_42 = arith.constant 2 : index
    %c0_43 = arith.constant 0 : index
    %c0_44 = arith.constant 0 : index
    %38 = vector.load %arg4[%c2_42, %c0_43, %c0_44] : memref<9x128x128xbf16, #tpu.memory_space<vmem>>, vector<1x128x128xbf16>
    %39 = vector.shape_cast %38 : vector<1x128x128xbf16> to vector<128x128xbf16>
    %cst_45 = arith.constant dense<0.000000e+00> : vector<256x128xf32>
    %40 = tpu.matmul %37, %39, %cst_45 {dimension_numbers = #tpu.dot_dimension_numbers<[1], [0], [0], [1], [0, 0, 1, 1], [], []>} : vector<256x128xbf16>, vector<128x128xbf16>, vector<256x128xf32> -> vector<256x128xf32>
    %41 = arith.addf %36, %40 : vector<256x128xf32>
    %c0_46 = arith.constant 0 : index
    %c0_47 = arith.constant 0 : index
    %42 = vector.load %arg10[%c0_46, %c0_47] : memref<256x128xf32, #tpu.memory_space<vmem>>, vector<256x128xf32>
    tpu.vector_store %arg10[%c0_46, %c0_47], %41 {strides = array<i32>} : memref<256x128xf32, #tpu.memory_space<vmem>>, vector<256x128xf32>,
    %c1_48 = arith.constant 1 : index
    %c0_49 = arith.constant 0 : index
    %c0_50 = arith.constant 0 : index
    %43 = vector.load %arg9[%c1_48, %c0_49, %c0_50] : memref<18x18x128xf32, #tpu.memory_space<vmem>>, vector<16x16x128xf32>
    %44 = arith.truncf %43 : vector<16x16x128xf32> to vector<16x16x128xbf16>
    %c0_51 = arith.constant 0 : index
    %c0_52 = arith.constant 0 : index
    %45 = vector.load %arg10[%c0_51, %c0_52] : memref<256x128xf32, #tpu.memory_space<vmem>>, vector<256x128xf32>
    %46 = vector.shape_cast %44 : vector<16x16x128xbf16> to vector<256x128xbf16>
    %c3 = arith.constant 3 : index
    %c0_53 = arith.constant 0 : index
    %c0_54 = arith.constant 0 : index
    %47 = vector.load %arg4[%c3, %c0_53, %c0_54] : memref<9x128x128xbf16, #tpu.memory_space<vmem>>, vector<1x128x128xbf16>
    %48 = vector.shape_cast %47 : vector<1x128x128xbf16> to vector<128x128xbf16>
    %cst_55 = arith.constant dense<0.000000e+00> : vector<256x128xf32>
    %49 = tpu.matmul %46, %48, %cst_55 {dimension_numbers = #tpu.dot_dimension_numbers<[1], [0], [0], [1], [0, 0, 1, 1], [], []>} : vector<256x128xbf16>, vector<128x128xbf16>, vector<256x128xf32> -> vector<256x128xf32>
    %50 = arith.addf %45, %49 : vector<256x128xf32>
    %c0_56 = arith.constant 0 : index
    %c0_57 = arith.constant 0 : index
    %51 = vector.load %arg10[%c0_56, %c0_57] : memref<256x128xf32, #tpu.memory_space<vmem>>, vector<256x128xf32>
    tpu.vector_store %arg10[%c0_56, %c0_57], %50 {strides = array<i32>} : memref<256x128xf32, #tpu.memory_space<vmem>>, vector<256x128xf32>,
    %c1_58 = arith.constant 1 : index
    %c1_59 = arith.constant 1 : index
    %c0_60 = arith.constant 0 : index
    %52 = vector.load %arg9[%c1_58, %c1_59, %c0_60] : memref<18x18x128xf32, #tpu.memory_space<vmem>>, vector<16x16x128xf32>
    %53 = arith.truncf %52 : vector<16x16x128xf32> to vector<16x16x128xbf16>
    %c0_61 = arith.constant 0 : index
    %c0_62 = arith.constant 0 : index
    %54 = vector.load %arg10[%c0_61, %c0_62] : memref<256x128xf32, #tpu.memory_space<vmem>>, vector<256x128xf32>
    %55 = vector.shape_cast %53 : vector<16x16x128xbf16> to vector<256x128xbf16>
    %c4 = arith.constant 4 : index
    %c0_63 = arith.constant 0 : index
    %c0_64 = arith.constant 0 : index
    %56 = vector.load %arg4[%c4, %c0_63, %c0_64] : memref<9x128x128xbf16, #tpu.memory_space<vmem>>, vector<1x128x128xbf16>
    %57 = vector.shape_cast %56 : vector<1x128x128xbf16> to vector<128x128xbf16>
    %cst_65 = arith.constant dense<0.000000e+00> : vector<256x128xf32>
    %58 = tpu.matmul %55, %57, %cst_65 {dimension_numbers = #tpu.dot_dimension_numbers<[1], [0], [0], [1], [0, 0, 1, 1], [], []>} : vector<256x128xbf16>, vector<128x128xbf16>, vector<256x128xf32> -> vector<256x128xf32>
    %59 = arith.addf %54, %58 : vector<256x128xf32>
    %c0_66 = arith.constant 0 : index
    %c0_67 = arith.constant 0 : index
    %60 = vector.load %arg10[%c0_66, %c0_67] : memref<256x128xf32, #tpu.memory_space<vmem>>, vector<256x128xf32>
    tpu.vector_store %arg10[%c0_66, %c0_67], %59 {strides = array<i32>} : memref<256x128xf32, #tpu.memory_space<vmem>>, vector<256x128xf32>,
    %c1_68 = arith.constant 1 : index
    %c2_69 = arith.constant 2 : index
    %c0_70 = arith.constant 0 : index
    %61 = vector.load %arg9[%c1_68, %c2_69, %c0_70] : memref<18x18x128xf32, #tpu.memory_space<vmem>>, vector<16x16x128xf32>
    %62 = arith.truncf %61 : vector<16x16x128xf32> to vector<16x16x128xbf16>
    %c0_71 = arith.constant 0 : index
    %c0_72 = arith.constant 0 : index
    %63 = vector.load %arg10[%c0_71, %c0_72] : memref<256x128xf32, #tpu.memory_space<vmem>>, vector<256x128xf32>
    %64 = vector.shape_cast %62 : vector<16x16x128xbf16> to vector<256x128xbf16>
    %c5 = arith.constant 5 : index
    %c0_73 = arith.constant 0 : index
    %c0_74 = arith.constant 0 : index
    %65 = vector.load %arg4[%c5, %c0_73, %c0_74] : memref<9x128x128xbf16, #tpu.memory_space<vmem>>, vector<1x128x128xbf16>
    %66 = vector.shape_cast %65 : vector<1x128x128xbf16> to vector<128x128xbf16>
    %cst_75 = arith.constant dense<0.000000e+00> : vector<256x128xf32>
    %67 = tpu.matmul %64, %66, %cst_75 {dimension_numbers = #tpu.dot_dimension_numbers<[1], [0], [0], [1], [0, 0, 1, 1], [], []>} : vector<256x128xbf16>, vector<128x128xbf16>, vector<256x128xf32> -> vector<256x128xf32>
    %68 = arith.addf %63, %67 : vector<256x128xf32>
    %c0_76 = arith.constant 0 : index
    %c0_77 = arith.constant 0 : index
    %69 = vector.load %arg10[%c0_76, %c0_77] : memref<256x128xf32, #tpu.memory_space<vmem>>, vector<256x128xf32>
    tpu.vector_store %arg10[%c0_76, %c0_77], %68 {strides = array<i32>} : memref<256x128xf32, #tpu.memory_space<vmem>>, vector<256x128xf32>,
    %c2_78 = arith.constant 2 : index
    %c0_79 = arith.constant 0 : index
    %c0_80 = arith.constant 0 : index
    %70 = vector.load %arg9[%c2_78, %c0_79, %c0_80] : memref<18x18x128xf32, #tpu.memory_space<vmem>>, vector<16x16x128xf32>
    %71 = arith.truncf %70 : vector<16x16x128xf32> to vector<16x16x128xbf16>
    %c0_81 = arith.constant 0 : index
    %c0_82 = arith.constant 0 : index
    %72 = vector.load %arg10[%c0_81, %c0_82] : memref<256x128xf32, #tpu.memory_space<vmem>>, vector<256x128xf32>
    %73 = vector.shape_cast %71 : vector<16x16x128xbf16> to vector<256x128xbf16>
    %c6 = arith.constant 6 : index
    %c0_83 = arith.constant 0 : index
    %c0_84 = arith.constant 0 : index
    %74 = vector.load %arg4[%c6, %c0_83, %c0_84] : memref<9x128x128xbf16, #tpu.memory_space<vmem>>, vector<1x128x128xbf16>
    %75 = vector.shape_cast %74 : vector<1x128x128xbf16> to vector<128x128xbf16>
    %cst_85 = arith.constant dense<0.000000e+00> : vector<256x128xf32>
    %76 = tpu.matmul %73, %75, %cst_85 {dimension_numbers = #tpu.dot_dimension_numbers<[1], [0], [0], [1], [0, 0, 1, 1], [], []>} : vector<256x128xbf16>, vector<128x128xbf16>, vector<256x128xf32> -> vector<256x128xf32>
    %77 = arith.addf %72, %76 : vector<256x128xf32>
    %c0_86 = arith.constant 0 : index
    %c0_87 = arith.constant 0 : index
    %78 = vector.load %arg10[%c0_86, %c0_87] : memref<256x128xf32, #tpu.memory_space<vmem>>, vector<256x128xf32>
    tpu.vector_store %arg10[%c0_86, %c0_87], %77 {strides = array<i32>} : memref<256x128xf32, #tpu.memory_space<vmem>>, vector<256x128xf32>,
    %c2_88 = arith.constant 2 : index
    %c1_89 = arith.constant 1 : index
    %c0_90 = arith.constant 0 : index
    %79 = vector.load %arg9[%c2_88, %c1_89, %c0_90] : memref<18x18x128xf32, #tpu.memory_space<vmem>>, vector<16x16x128xf32>
    %80 = arith.truncf %79 : vector<16x16x128xf32> to vector<16x16x128xbf16>
    %c0_91 = arith.constant 0 : index
    %c0_92 = arith.constant 0 : index
    %81 = vector.load %arg10[%c0_91, %c0_92] : memref<256x128xf32, #tpu.memory_space<vmem>>, vector<256x128xf32>
    %82 = vector.shape_cast %80 : vector<16x16x128xbf16> to vector<256x128xbf16>
    %c7 = arith.constant 7 : index
    %c0_93 = arith.constant 0 : index
    %c0_94 = arith.constant 0 : index
    %83 = vector.load %arg4[%c7, %c0_93, %c0_94] : memref<9x128x128xbf16, #tpu.memory_space<vmem>>, vector<1x128x128xbf16>
    %84 = vector.shape_cast %83 : vector<1x128x128xbf16> to vector<128x128xbf16>
    %cst_95 = arith.constant dense<0.000000e+00> : vector<256x128xf32>
    %85 = tpu.matmul %82, %84, %cst_95 {dimension_numbers = #tpu.dot_dimension_numbers<[1], [0], [0], [1], [0, 0, 1, 1], [], []>} : vector<256x128xbf16>, vector<128x128xbf16>, vector<256x128xf32> -> vector<256x128xf32>
    %86 = arith.addf %81, %85 : vector<256x128xf32>
    %c0_96 = arith.constant 0 : index
    %c0_97 = arith.constant 0 : index
    %87 = vector.load %arg10[%c0_96, %c0_97] : memref<256x128xf32, #tpu.memory_space<vmem>>, vector<256x128xf32>
    tpu.vector_store %arg10[%c0_96, %c0_97], %86 {strides = array<i32>} : memref<256x128xf32, #tpu.memory_space<vmem>>, vector<256x128xf32>,
    %c2_98 = arith.constant 2 : index
    %c2_99 = arith.constant 2 : index
    %c0_100 = arith.constant 0 : index
    %88 = vector.load %arg9[%c2_98, %c2_99, %c0_100] : memref<18x18x128xf32, #tpu.memory_space<vmem>>, vector<16x16x128xf32>
    %89 = arith.truncf %88 : vector<16x16x128xf32> to vector<16x16x128xbf16>
    %c0_101 = arith.constant 0 : index
    %c0_102 = arith.constant 0 : index
    %90 = vector.load %arg10[%c0_101, %c0_102] : memref<256x128xf32, #tpu.memory_space<vmem>>, vector<256x128xf32>
    %91 = vector.shape_cast %89 : vector<16x16x128xbf16> to vector<256x128xbf16>
    %c8 = arith.constant 8 : index
    %c0_103 = arith.constant 0 : index
    %c0_104 = arith.constant 0 : index
    %92 = vector.load %arg4[%c8, %c0_103, %c0_104] : memref<9x128x128xbf16, #tpu.memory_space<vmem>>, vector<1x128x128xbf16>
    %93 = vector.shape_cast %92 : vector<1x128x128xbf16> to vector<128x128xbf16>
    %cst_105 = arith.constant dense<0.000000e+00> : vector<256x128xf32>
    %94 = tpu.matmul %91, %93, %cst_105 {dimension_numbers = #tpu.dot_dimension_numbers<[1], [0], [0], [1], [0, 0, 1, 1], [], []>} : vector<256x128xbf16>, vector<128x128xbf16>, vector<256x128xf32> -> vector<256x128xf32>
    %95 = arith.addf %90, %94 : vector<256x128xf32>
    %c0_106 = arith.constant 0 : index
    %c0_107 = arith.constant 0 : index
    %96 = vector.load %arg10[%c0_106, %c0_107] : memref<256x128xf32, #tpu.memory_space<vmem>>, vector<256x128xf32>
    tpu.vector_store %arg10[%c0_106, %c0_107], %95 {strides = array<i32>} : memref<256x128xf32, #tpu.memory_space<vmem>>, vector<256x128xf32>,
    %c0_108 = arith.constant 0 : index
    %c0_109 = arith.constant 0 : index
    %97 = vector.load %arg10[%c0_108, %c0_109] : memref<256x128xf32, #tpu.memory_space<vmem>>, vector<256x128xf32>
    %cst_110 = arith.constant dense<0.000000e+00> : vector<128xf32>
    %98 = vector.multi_reduction <add>, %97, %cst_110 [0] : vector<256x128xf32> to vector<128xf32>
    %99 = vector.shape_cast %98 : vector<128xf32> to vector<1x128xf32>
    %c0_111 = arith.constant 0 : index
    %c0_112 = arith.constant 0 : index
    %c0_113 = arith.constant 0 : index
    %100 = vector.load %arg7[%c0_111, %c0_112, %c0_113] : memref<1x1x128xf32, #tpu.memory_space<vmem>>, vector<1x1x128xf32>
    %101 = vector.shape_cast %100 : vector<1x1x128xf32> to vector<1x128xf32>
    %102 = vector.shape_cast %99 : vector<1x128xf32> to vector<1x1x128xf32>
    tpu.vector_store %arg7[%c0_111, %c0_112, %c0_113], %102 {strides = array<i32>} : memref<1x1x128xf32, #tpu.memory_space<vmem>>, vector<1x1x128xf32>,
    %103 = arith.mulf %97, %97 : vector<256x128xf32>
    %cst_114 = arith.constant dense<0.000000e+00> : vector<128xf32>
    %104 = vector.multi_reduction <add>, %103, %cst_114 [0] : vector<256x128xf32> to vector<128xf32>
    %105 = vector.shape_cast %104 : vector<128xf32> to vector<1x128xf32>
    %c0_115 = arith.constant 0 : index
    %c0_116 = arith.constant 0 : index
    %c0_117 = arith.constant 0 : index
    %106 = vector.load %arg8[%c0_115, %c0_116, %c0_117] : memref<1x1x128xf32, #tpu.memory_space<vmem>>, vector<1x1x128xf32>
    %107 = vector.shape_cast %106 : vector<1x1x128xf32> to vector<1x128xf32>
    %108 = vector.shape_cast %105 : vector<1x128xf32> to vector<1x1x128xf32>
    tpu.vector_store %arg8[%c0_115, %c0_116, %c0_117], %108 {strides = array<i32>} : memref<1x1x128xf32, #tpu.memory_space<vmem>>, vector<1x1x128xf32>,
    %109 = arith.truncf %97 : vector<256x128xf32> to vector<256x128xbf16>
    %c0_118 = arith.constant 0 : index
    %c0_119 = arith.constant 0 : index
    %c0_120 = arith.constant 0 : index
    %110 = vector.load %arg6[%c0_118, %c0_119, %c0_120] : memref<1x256x128xbf16, #tpu.memory_space<vmem>>, vector<1x256x128xbf16>
    %111 = vector.shape_cast %110 : vector<1x256x128xbf16> to vector<256x128xbf16>
    %112 = vector.shape_cast %109 : vector<256x128xbf16> to vector<1x256x128xbf16>
    tpu.vector_store %arg6[%c0_118, %c0_119, %c0_120], %112 {strides = array<i32>} : memref<1x256x128xbf16, #tpu.memory_space<vmem>>, vector<1x256x128xbf16>,
    return
  }
  func.func @transform_0(%arg0: i32) -> (i32, i32, i32) {
    %c0_i32 = arith.constant 0 : i32
    %c0_i32_0 = arith.constant 0 : i32
    %c0_i32_1 = arith.constant 0 : i32
    return %arg0, %c0_i32, %c0_i32_0 : i32, i32, i32
  }
  func.func @transform_1(%arg0: i32) -> (i32, i32, i32) {
    %c0_i32 = arith.constant 0 : i32
    %c0_i32_0 = arith.constant 0 : i32
    %c0_i32_1 = arith.constant 0 : i32
    %c0_i32_2 = arith.constant 0 : i32
    return %c0_i32, %c0_i32_0, %c0_i32_1 : i32, i32, i32
  }
  func.func @transform_2(%arg0: i32) -> (i32, i32, i32) {
    %c0_i32 = arith.constant 0 : i32
    %c0_i32_0 = arith.constant 0 : i32
    %c0_i32_1 = arith.constant 0 : i32
    %c0_i32_2 = arith.constant 0 : i32
    return %c0_i32, %c0_i32_0, %c0_i32_1 : i32, i32, i32
  }
  func.func @transform_3(%arg0: i32) -> (i32, i32, i32) {
    %c0_i32 = arith.constant 0 : i32
    %c0_i32_0 = arith.constant 0 : i32
    %c0_i32_1 = arith.constant 0 : i32
    %c0_i32_2 = arith.constant 0 : i32
    return %c0_i32, %c0_i32_0, %c0_i32_1 : i32, i32, i32
  }
  func.func @transform_4(%arg0: i32) -> (i32, i32) {
    %c0_i32 = arith.constant 0 : i32
    %c0_i32_0 = arith.constant 0 : i32
    %c0_i32_1 = arith.constant 0 : i32
    return %c0_i32, %c0_i32_0 : i32, i32
  }
  func.func @transform_5(%arg0: i32) -> (i32, i32, i32) {
    %c0_i32 = arith.constant 0 : i32
    %c0_i32_0 = arith.constant 0 : i32
    %c0_i32_1 = arith.constant 0 : i32
    return %arg0, %c0_i32, %c0_i32_0 : i32, i32, i32
  }
  func.func @transform_6(%arg0: i32) -> (i32, i32, i32) {
    %c0_i32 = arith.constant 0 : i32
    %c0_i32_0 = arith.constant 0 : i32
    %c0_i32_1 = arith.constant 0 : i32
    return %arg0, %c0_i32, %c0_i32_0 : i32, i32, i32
  }
  func.func @transform_7(%arg0: i32) -> (i32, i32, i32) {
    %c0_i32 = arith.constant 0 : i32
    %c0_i32_0 = arith.constant 0 : i32
    %c0_i32_1 = arith.constant 0 : i32
    return %arg0, %c0_i32, %c0_i32_0 : i32, i32, i32
  }
}

module attributes {stable_mosaic.version = 11 : i64} {
  func.func @_conv_bn_kernel(%arg0: i32, %arg1: memref<1x256x128xbf16, #tpu.memory_space<vmem>>, %arg2: memref<1x1x128xf32, #tpu.memory_space<vmem>>, %arg3: memref<1x1x128xf32, #tpu.memory_space<vmem>>, %arg4: memref<9x128x128xbf16, #tpu.memory_space<vmem>>, %arg5: memref<1x1xf32, #tpu.memory_space<smem>>, %arg6: memref<1x256x128xf32, #tpu.memory_space<vmem>>, %arg7: memref<1x1x128xf32, #tpu.memory_space<vmem>>, %arg8: memref<1x1x128xf32, #tpu.memory_space<vmem>>, %arg9: memref<18x18x128xf32, #tpu.memory_space<vmem>>, %arg10: memref<256x128xf32, #tpu.memory_space<vmem>>) attributes {dimension_semantics = [#tpu.dimension_semantics<parallel>], iteration_bounds = array<i64: 2>, scalar_prefetch = 0 : i64, scratch_operands = 2 : i64, tpu.core_type = #tpu.core_type<tc>, window_params = [{transform_indices = @transform_0, window_bounds = array<i64: 1, 256, 128>}, {pipeline_mode = #tpu.pipeline_mode<synchronous>, transform_indices = @transform_1, window_bounds = array<i64: 1, 1, 128>}, {pipeline_mode = #tpu.pipeline_mode<synchronous>, transform_indices = @transform_2, window_bounds = array<i64: 1, 1, 128>}, {pipeline_mode = #tpu.pipeline_mode<synchronous>, transform_indices = @transform_3, window_bounds = array<i64: 9, 128, 128>}, {transform_indices = @transform_4, window_bounds = array<i64: 1, 1>}, {transform_indices = @transform_5, window_bounds = array<i64: 1, 256, 128>}, {transform_indices = @transform_6, window_bounds = array<i64: 1, 1, 128>}, {transform_indices = @transform_7, window_bounds = array<i64: 1, 1, 128>}]} {
    %c0 = arith.constant 0 : index
    %c0_0 = arith.constant 0 : index
    %c0_1 = arith.constant 0 : index
    %0 = vector.load %arg1[%c0, %c0_0, %c0_1] : memref<1x256x128xbf16, #tpu.memory_space<vmem>>, vector<1x256x128xbf16>
    %1 = vector.shape_cast %0 : vector<1x256x128xbf16> to vector<256x128xbf16>
    %2 = arith.extf %1 : vector<256x128xbf16> to vector<256x128xf32>
    %c0_2 = arith.constant 0 : index
    %c0_3 = arith.constant 0 : index
    %c0_4 = arith.constant 0 : index
    %3 = vector.load %arg2[%c0_2, %c0_3, %c0_4] : memref<1x1x128xf32, #tpu.memory_space<vmem>>, vector<1x1x128xf32>
    %4 = vector.shape_cast %3 : vector<1x1x128xf32> to vector<1x128xf32>
    %5 = vector.broadcast %4 : vector<1x128xf32> to vector<256x128xf32>
    %6 = arith.mulf %2, %5 : vector<256x128xf32>
    %c0_5 = arith.constant 0 : index
    %c0_6 = arith.constant 0 : index
    %c0_7 = arith.constant 0 : index
    %7 = vector.load %arg3[%c0_5, %c0_6, %c0_7] : memref<1x1x128xf32, #tpu.memory_space<vmem>>, vector<1x1x128xf32>
    %8 = vector.shape_cast %7 : vector<1x1x128xf32> to vector<1x128xf32>
    %9 = vector.broadcast %8 : vector<1x128xf32> to vector<256x128xf32>
    %10 = arith.addf %6, %9 : vector<256x128xf32>
    %c0_8 = arith.constant 0 : index
    %c0_9 = arith.constant 0 : index
    %11 = memref.load %arg5[%c0_8, %c0_9] : memref<1x1xf32, #tpu.memory_space<smem>>
    %cst = arith.constant 0.000000e+00 : f32
    %12 = vector.broadcast %cst : f32 to vector<256x128xf32>
    %13 = arith.cmpf oge, %10, %12 : vector<256x128xf32>
    %14 = vector.broadcast %11 : f32 to vector<256x128xf32>
    %15 = arith.mulf %14, %10 : vector<256x128xf32>
    %16 = arith.select %13, %10, %15 : vector<256x128xi1>, vector<256x128xf32>
    %cst_10 = arith.constant 0.000000e+00 : f32
    %17 = vector.broadcast %cst_10 : f32 to vector<18x18x128xf32>
    %c0_11 = arith.constant 0 : index
    %c0_12 = arith.constant 0 : index
    %c0_13 = arith.constant 0 : index
    %18 = vector.load %arg9[%c0_11, %c0_12, %c0_13] : memref<18x18x128xf32, #tpu.memory_space<vmem>>, vector<18x18x128xf32>
    tpu.vector_store %arg9[%c0_11, %c0_12, %c0_13], %17 {strides = array<i32>} : memref<18x18x128xf32, #tpu.memory_space<vmem>>, vector<18x18x128xf32>,
    %19 = vector.shape_cast %16 : vector<256x128xf32> to vector<16x16x128xf32>
    %c1 = arith.constant 1 : index
    %c1_14 = arith.constant 1 : index
    %c0_15 = arith.constant 0 : index
    %20 = vector.load %arg9[%c1, %c1_14, %c0_15] : memref<18x18x128xf32, #tpu.memory_space<vmem>>, vector<16x16x128xf32>
    tpu.vector_store %arg9[%c1, %c1_14, %c0_15], %19 {strides = array<i32>} : memref<18x18x128xf32, #tpu.memory_space<vmem>>, vector<16x16x128xf32>,
    %cst_16 = arith.constant 0.000000e+00 : f32
    %21 = vector.broadcast %cst_16 : f32 to vector<256x128xf32>
    %c0_17 = arith.constant 0 : index
    %c0_18 = arith.constant 0 : index
    %22 = vector.load %arg10[%c0_17, %c0_18] : memref<256x128xf32, #tpu.memory_space<vmem>>, vector<256x128xf32>
    tpu.vector_store %arg10[%c0_17, %c0_18], %21 {strides = array<i32>} : memref<256x128xf32, #tpu.memory_space<vmem>>, vector<256x128xf32>,
    %c0_19 = arith.constant 0 : index
    %c0_20 = arith.constant 0 : index
    %c0_21 = arith.constant 0 : index
    %23 = vector.load %arg9[%c0_19, %c0_20, %c0_21] : memref<18x18x128xf32, #tpu.memory_space<vmem>>, vector<16x16x128xf32>
    %24 = arith.truncf %23 : vector<16x16x128xf32> to vector<16x16x128xbf16>
    %c0_22 = arith.constant 0 : index
    %c0_23 = arith.constant 0 : index
    %25 = vector.load %arg10[%c0_22, %c0_23] : memref<256x128xf32, #tpu.memory_space<vmem>>, vector<256x128xf32>
    %26 = vector.shape_cast %24 : vector<16x16x128xbf16> to vector<256x128xbf16>
    %c0_24 = arith.constant 0 : index
    %c0_25 = arith.constant 0 : index
    %c0_26 = arith.constant 0 : index
    %27 = vector.load %arg4[%c0_24, %c0_25, %c0_26] : memref<9x128x128xbf16, #tpu.memory_space<vmem>>, vector<1x128x128xbf16>
    %28 = vector.shape_cast %27 : vector<1x128x128xbf16> to vector<128x128xbf16>
    %cst_27 = arith.constant dense<0.000000e+00> : vector<256x128xf32>
    %29 = tpu.matmul %26, %28, %cst_27 {dimension_numbers = #tpu.dot_dimension_numbers<[1], [0], [0], [1], [0, 0, 1, 1], [], []>} : vector<256x128xbf16>, vector<128x128xbf16>, vector<256x128xf32> -> vector<256x128xf32>
    %30 = arith.addf %25, %29 : vector<256x128xf32>
    %c0_28 = arith.constant 0 : index
    %c0_29 = arith.constant 0 : index
    %31 = vector.load %arg10[%c0_28, %c0_29] : memref<256x128xf32, #tpu.memory_space<vmem>>, vector<256x128xf32>
    tpu.vector_store %arg10[%c0_28, %c0_29], %30 {strides = array<i32>} : memref<256x128xf32, #tpu.memory_space<vmem>>, vector<256x128xf32>,
    %c0_30 = arith.constant 0 : index
    %c1_31 = arith.constant 1 : index
    %c0_32 = arith.constant 0 : index
    %32 = vector.load %arg9[%c0_30, %c1_31, %c0_32] : memref<18x18x128xf32, #tpu.memory_space<vmem>>, vector<16x16x128xf32>
    %33 = arith.truncf %32 : vector<16x16x128xf32> to vector<16x16x128xbf16>
    %c0_33 = arith.constant 0 : index
    %c0_34 = arith.constant 0 : index
    %34 = vector.load %arg10[%c0_33, %c0_34] : memref<256x128xf32, #tpu.memory_space<vmem>>, vector<256x128xf32>
    %35 = vector.shape_cast %33 : vector<16x16x128xbf16> to vector<256x128xbf16>
    %c1_35 = arith.constant 1 : index
    %c0_36 = arith.constant 0 : index
    %c0_37 = arith.constant 0 : index
    %36 = vector.load %arg4[%c1_35, %c0_36, %c0_37] : memref<9x128x128xbf16, #tpu.memory_space<vmem>>, vector<1x128x128xbf16>
    %37 = vector.shape_cast %36 : vector<1x128x128xbf16> to vector<128x128xbf16>
    %cst_38 = arith.constant dense<0.000000e+00> : vector<256x128xf32>
    %38 = tpu.matmul %35, %37, %cst_38 {dimension_numbers = #tpu.dot_dimension_numbers<[1], [0], [0], [1], [0, 0, 1, 1], [], []>} : vector<256x128xbf16>, vector<128x128xbf16>, vector<256x128xf32> -> vector<256x128xf32>
    %39 = arith.addf %34, %38 : vector<256x128xf32>
    %c0_39 = arith.constant 0 : index
    %c0_40 = arith.constant 0 : index
    %40 = vector.load %arg10[%c0_39, %c0_40] : memref<256x128xf32, #tpu.memory_space<vmem>>, vector<256x128xf32>
    tpu.vector_store %arg10[%c0_39, %c0_40], %39 {strides = array<i32>} : memref<256x128xf32, #tpu.memory_space<vmem>>, vector<256x128xf32>,
    %c0_41 = arith.constant 0 : index
    %c2 = arith.constant 2 : index
    %c0_42 = arith.constant 0 : index
    %41 = vector.load %arg9[%c0_41, %c2, %c0_42] : memref<18x18x128xf32, #tpu.memory_space<vmem>>, vector<16x16x128xf32>
    %42 = arith.truncf %41 : vector<16x16x128xf32> to vector<16x16x128xbf16>
    %c0_43 = arith.constant 0 : index
    %c0_44 = arith.constant 0 : index
    %43 = vector.load %arg10[%c0_43, %c0_44] : memref<256x128xf32, #tpu.memory_space<vmem>>, vector<256x128xf32>
    %44 = vector.shape_cast %42 : vector<16x16x128xbf16> to vector<256x128xbf16>
    %c2_45 = arith.constant 2 : index
    %c0_46 = arith.constant 0 : index
    %c0_47 = arith.constant 0 : index
    %45 = vector.load %arg4[%c2_45, %c0_46, %c0_47] : memref<9x128x128xbf16, #tpu.memory_space<vmem>>, vector<1x128x128xbf16>
    %46 = vector.shape_cast %45 : vector<1x128x128xbf16> to vector<128x128xbf16>
    %cst_48 = arith.constant dense<0.000000e+00> : vector<256x128xf32>
    %47 = tpu.matmul %44, %46, %cst_48 {dimension_numbers = #tpu.dot_dimension_numbers<[1], [0], [0], [1], [0, 0, 1, 1], [], []>} : vector<256x128xbf16>, vector<128x128xbf16>, vector<256x128xf32> -> vector<256x128xf32>
    %48 = arith.addf %43, %47 : vector<256x128xf32>
    %c0_49 = arith.constant 0 : index
    %c0_50 = arith.constant 0 : index
    %49 = vector.load %arg10[%c0_49, %c0_50] : memref<256x128xf32, #tpu.memory_space<vmem>>, vector<256x128xf32>
    tpu.vector_store %arg10[%c0_49, %c0_50], %48 {strides = array<i32>} : memref<256x128xf32, #tpu.memory_space<vmem>>, vector<256x128xf32>,
    %c1_51 = arith.constant 1 : index
    %c0_52 = arith.constant 0 : index
    %c0_53 = arith.constant 0 : index
    %50 = vector.load %arg9[%c1_51, %c0_52, %c0_53] : memref<18x18x128xf32, #tpu.memory_space<vmem>>, vector<16x16x128xf32>
    %51 = arith.truncf %50 : vector<16x16x128xf32> to vector<16x16x128xbf16>
    %c0_54 = arith.constant 0 : index
    %c0_55 = arith.constant 0 : index
    %52 = vector.load %arg10[%c0_54, %c0_55] : memref<256x128xf32, #tpu.memory_space<vmem>>, vector<256x128xf32>
    %53 = vector.shape_cast %51 : vector<16x16x128xbf16> to vector<256x128xbf16>
    %c3 = arith.constant 3 : index
    %c0_56 = arith.constant 0 : index
    %c0_57 = arith.constant 0 : index
    %54 = vector.load %arg4[%c3, %c0_56, %c0_57] : memref<9x128x128xbf16, #tpu.memory_space<vmem>>, vector<1x128x128xbf16>
    %55 = vector.shape_cast %54 : vector<1x128x128xbf16> to vector<128x128xbf16>
    %cst_58 = arith.constant dense<0.000000e+00> : vector<256x128xf32>
    %56 = tpu.matmul %53, %55, %cst_58 {dimension_numbers = #tpu.dot_dimension_numbers<[1], [0], [0], [1], [0, 0, 1, 1], [], []>} : vector<256x128xbf16>, vector<128x128xbf16>, vector<256x128xf32> -> vector<256x128xf32>
    %57 = arith.addf %52, %56 : vector<256x128xf32>
    %c0_59 = arith.constant 0 : index
    %c0_60 = arith.constant 0 : index
    %58 = vector.load %arg10[%c0_59, %c0_60] : memref<256x128xf32, #tpu.memory_space<vmem>>, vector<256x128xf32>
    tpu.vector_store %arg10[%c0_59, %c0_60], %57 {strides = array<i32>} : memref<256x128xf32, #tpu.memory_space<vmem>>, vector<256x128xf32>,
    %c1_61 = arith.constant 1 : index
    %c1_62 = arith.constant 1 : index
    %c0_63 = arith.constant 0 : index
    %59 = vector.load %arg9[%c1_61, %c1_62, %c0_63] : memref<18x18x128xf32, #tpu.memory_space<vmem>>, vector<16x16x128xf32>
    %60 = arith.truncf %59 : vector<16x16x128xf32> to vector<16x16x128xbf16>
    %c0_64 = arith.constant 0 : index
    %c0_65 = arith.constant 0 : index
    %61 = vector.load %arg10[%c0_64, %c0_65] : memref<256x128xf32, #tpu.memory_space<vmem>>, vector<256x128xf32>
    %62 = vector.shape_cast %60 : vector<16x16x128xbf16> to vector<256x128xbf16>
    %c4 = arith.constant 4 : index
    %c0_66 = arith.constant 0 : index
    %c0_67 = arith.constant 0 : index
    %63 = vector.load %arg4[%c4, %c0_66, %c0_67] : memref<9x128x128xbf16, #tpu.memory_space<vmem>>, vector<1x128x128xbf16>
    %64 = vector.shape_cast %63 : vector<1x128x128xbf16> to vector<128x128xbf16>
    %cst_68 = arith.constant dense<0.000000e+00> : vector<256x128xf32>
    %65 = tpu.matmul %62, %64, %cst_68 {dimension_numbers = #tpu.dot_dimension_numbers<[1], [0], [0], [1], [0, 0, 1, 1], [], []>} : vector<256x128xbf16>, vector<128x128xbf16>, vector<256x128xf32> -> vector<256x128xf32>
    %66 = arith.addf %61, %65 : vector<256x128xf32>
    %c0_69 = arith.constant 0 : index
    %c0_70 = arith.constant 0 : index
    %67 = vector.load %arg10[%c0_69, %c0_70] : memref<256x128xf32, #tpu.memory_space<vmem>>, vector<256x128xf32>
    tpu.vector_store %arg10[%c0_69, %c0_70], %66 {strides = array<i32>} : memref<256x128xf32, #tpu.memory_space<vmem>>, vector<256x128xf32>,
    %c1_71 = arith.constant 1 : index
    %c2_72 = arith.constant 2 : index
    %c0_73 = arith.constant 0 : index
    %68 = vector.load %arg9[%c1_71, %c2_72, %c0_73] : memref<18x18x128xf32, #tpu.memory_space<vmem>>, vector<16x16x128xf32>
    %69 = arith.truncf %68 : vector<16x16x128xf32> to vector<16x16x128xbf16>
    %c0_74 = arith.constant 0 : index
    %c0_75 = arith.constant 0 : index
    %70 = vector.load %arg10[%c0_74, %c0_75] : memref<256x128xf32, #tpu.memory_space<vmem>>, vector<256x128xf32>
    %71 = vector.shape_cast %69 : vector<16x16x128xbf16> to vector<256x128xbf16>
    %c5 = arith.constant 5 : index
    %c0_76 = arith.constant 0 : index
    %c0_77 = arith.constant 0 : index
    %72 = vector.load %arg4[%c5, %c0_76, %c0_77] : memref<9x128x128xbf16, #tpu.memory_space<vmem>>, vector<1x128x128xbf16>
    %73 = vector.shape_cast %72 : vector<1x128x128xbf16> to vector<128x128xbf16>
    %cst_78 = arith.constant dense<0.000000e+00> : vector<256x128xf32>
    %74 = tpu.matmul %71, %73, %cst_78 {dimension_numbers = #tpu.dot_dimension_numbers<[1], [0], [0], [1], [0, 0, 1, 1], [], []>} : vector<256x128xbf16>, vector<128x128xbf16>, vector<256x128xf32> -> vector<256x128xf32>
    %75 = arith.addf %70, %74 : vector<256x128xf32>
    %c0_79 = arith.constant 0 : index
    %c0_80 = arith.constant 0 : index
    %76 = vector.load %arg10[%c0_79, %c0_80] : memref<256x128xf32, #tpu.memory_space<vmem>>, vector<256x128xf32>
    tpu.vector_store %arg10[%c0_79, %c0_80], %75 {strides = array<i32>} : memref<256x128xf32, #tpu.memory_space<vmem>>, vector<256x128xf32>,
    %c2_81 = arith.constant 2 : index
    %c0_82 = arith.constant 0 : index
    %c0_83 = arith.constant 0 : index
    %77 = vector.load %arg9[%c2_81, %c0_82, %c0_83] : memref<18x18x128xf32, #tpu.memory_space<vmem>>, vector<16x16x128xf32>
    %78 = arith.truncf %77 : vector<16x16x128xf32> to vector<16x16x128xbf16>
    %c0_84 = arith.constant 0 : index
    %c0_85 = arith.constant 0 : index
    %79 = vector.load %arg10[%c0_84, %c0_85] : memref<256x128xf32, #tpu.memory_space<vmem>>, vector<256x128xf32>
    %80 = vector.shape_cast %78 : vector<16x16x128xbf16> to vector<256x128xbf16>
    %c6 = arith.constant 6 : index
    %c0_86 = arith.constant 0 : index
    %c0_87 = arith.constant 0 : index
    %81 = vector.load %arg4[%c6, %c0_86, %c0_87] : memref<9x128x128xbf16, #tpu.memory_space<vmem>>, vector<1x128x128xbf16>
    %82 = vector.shape_cast %81 : vector<1x128x128xbf16> to vector<128x128xbf16>
    %cst_88 = arith.constant dense<0.000000e+00> : vector<256x128xf32>
    %83 = tpu.matmul %80, %82, %cst_88 {dimension_numbers = #tpu.dot_dimension_numbers<[1], [0], [0], [1], [0, 0, 1, 1], [], []>} : vector<256x128xbf16>, vector<128x128xbf16>, vector<256x128xf32> -> vector<256x128xf32>
    %84 = arith.addf %79, %83 : vector<256x128xf32>
    %c0_89 = arith.constant 0 : index
    %c0_90 = arith.constant 0 : index
    %85 = vector.load %arg10[%c0_89, %c0_90] : memref<256x128xf32, #tpu.memory_space<vmem>>, vector<256x128xf32>
    tpu.vector_store %arg10[%c0_89, %c0_90], %84 {strides = array<i32>} : memref<256x128xf32, #tpu.memory_space<vmem>>, vector<256x128xf32>,
    %c2_91 = arith.constant 2 : index
    %c1_92 = arith.constant 1 : index
    %c0_93 = arith.constant 0 : index
    %86 = vector.load %arg9[%c2_91, %c1_92, %c0_93] : memref<18x18x128xf32, #tpu.memory_space<vmem>>, vector<16x16x128xf32>
    %87 = arith.truncf %86 : vector<16x16x128xf32> to vector<16x16x128xbf16>
    %c0_94 = arith.constant 0 : index
    %c0_95 = arith.constant 0 : index
    %88 = vector.load %arg10[%c0_94, %c0_95] : memref<256x128xf32, #tpu.memory_space<vmem>>, vector<256x128xf32>
    %89 = vector.shape_cast %87 : vector<16x16x128xbf16> to vector<256x128xbf16>
    %c7 = arith.constant 7 : index
    %c0_96 = arith.constant 0 : index
    %c0_97 = arith.constant 0 : index
    %90 = vector.load %arg4[%c7, %c0_96, %c0_97] : memref<9x128x128xbf16, #tpu.memory_space<vmem>>, vector<1x128x128xbf16>
    %91 = vector.shape_cast %90 : vector<1x128x128xbf16> to vector<128x128xbf16>
    %cst_98 = arith.constant dense<0.000000e+00> : vector<256x128xf32>
    %92 = tpu.matmul %89, %91, %cst_98 {dimension_numbers = #tpu.dot_dimension_numbers<[1], [0], [0], [1], [0, 0, 1, 1], [], []>} : vector<256x128xbf16>, vector<128x128xbf16>, vector<256x128xf32> -> vector<256x128xf32>
    %93 = arith.addf %88, %92 : vector<256x128xf32>
    %c0_99 = arith.constant 0 : index
    %c0_100 = arith.constant 0 : index
    %94 = vector.load %arg10[%c0_99, %c0_100] : memref<256x128xf32, #tpu.memory_space<vmem>>, vector<256x128xf32>
    tpu.vector_store %arg10[%c0_99, %c0_100], %93 {strides = array<i32>} : memref<256x128xf32, #tpu.memory_space<vmem>>, vector<256x128xf32>,
    %c2_101 = arith.constant 2 : index
    %c2_102 = arith.constant 2 : index
    %c0_103 = arith.constant 0 : index
    %95 = vector.load %arg9[%c2_101, %c2_102, %c0_103] : memref<18x18x128xf32, #tpu.memory_space<vmem>>, vector<16x16x128xf32>
    %96 = arith.truncf %95 : vector<16x16x128xf32> to vector<16x16x128xbf16>
    %c0_104 = arith.constant 0 : index
    %c0_105 = arith.constant 0 : index
    %97 = vector.load %arg10[%c0_104, %c0_105] : memref<256x128xf32, #tpu.memory_space<vmem>>, vector<256x128xf32>
    %98 = vector.shape_cast %96 : vector<16x16x128xbf16> to vector<256x128xbf16>
    %c8 = arith.constant 8 : index
    %c0_106 = arith.constant 0 : index
    %c0_107 = arith.constant 0 : index
    %99 = vector.load %arg4[%c8, %c0_106, %c0_107] : memref<9x128x128xbf16, #tpu.memory_space<vmem>>, vector<1x128x128xbf16>
    %100 = vector.shape_cast %99 : vector<1x128x128xbf16> to vector<128x128xbf16>
    %cst_108 = arith.constant dense<0.000000e+00> : vector<256x128xf32>
    %101 = tpu.matmul %98, %100, %cst_108 {dimension_numbers = #tpu.dot_dimension_numbers<[1], [0], [0], [1], [0, 0, 1, 1], [], []>} : vector<256x128xbf16>, vector<128x128xbf16>, vector<256x128xf32> -> vector<256x128xf32>
    %102 = arith.addf %97, %101 : vector<256x128xf32>
    %c0_109 = arith.constant 0 : index
    %c0_110 = arith.constant 0 : index
    %103 = vector.load %arg10[%c0_109, %c0_110] : memref<256x128xf32, #tpu.memory_space<vmem>>, vector<256x128xf32>
    tpu.vector_store %arg10[%c0_109, %c0_110], %102 {strides = array<i32>} : memref<256x128xf32, #tpu.memory_space<vmem>>, vector<256x128xf32>,
    %c0_111 = arith.constant 0 : index
    %c0_112 = arith.constant 0 : index
    %104 = vector.load %arg10[%c0_111, %c0_112] : memref<256x128xf32, #tpu.memory_space<vmem>>, vector<256x128xf32>
    %cst_113 = arith.constant dense<0.000000e+00> : vector<128xf32>
    %105 = vector.multi_reduction <add>, %104, %cst_113 [0] : vector<256x128xf32> to vector<128xf32>
    %106 = vector.shape_cast %105 : vector<128xf32> to vector<1x128xf32>
    %c0_114 = arith.constant 0 : index
    %c0_115 = arith.constant 0 : index
    %c0_116 = arith.constant 0 : index
    %107 = vector.load %arg7[%c0_114, %c0_115, %c0_116] : memref<1x1x128xf32, #tpu.memory_space<vmem>>, vector<1x1x128xf32>
    %108 = vector.shape_cast %107 : vector<1x1x128xf32> to vector<1x128xf32>
    %109 = vector.shape_cast %106 : vector<1x128xf32> to vector<1x1x128xf32>
    tpu.vector_store %arg7[%c0_114, %c0_115, %c0_116], %109 {strides = array<i32>} : memref<1x1x128xf32, #tpu.memory_space<vmem>>, vector<1x1x128xf32>,
    %110 = arith.mulf %104, %104 : vector<256x128xf32>
    %cst_117 = arith.constant dense<0.000000e+00> : vector<128xf32>
    %111 = vector.multi_reduction <add>, %110, %cst_117 [0] : vector<256x128xf32> to vector<128xf32>
    %112 = vector.shape_cast %111 : vector<128xf32> to vector<1x128xf32>
    %c0_118 = arith.constant 0 : index
    %c0_119 = arith.constant 0 : index
    %c0_120 = arith.constant 0 : index
    %113 = vector.load %arg8[%c0_118, %c0_119, %c0_120] : memref<1x1x128xf32, #tpu.memory_space<vmem>>, vector<1x1x128xf32>
    %114 = vector.shape_cast %113 : vector<1x1x128xf32> to vector<1x128xf32>
    %115 = vector.shape_cast %112 : vector<1x128xf32> to vector<1x1x128xf32>
    tpu.vector_store %arg8[%c0_118, %c0_119, %c0_120], %115 {strides = array<i32>} : memref<1x1x128xf32, #tpu.memory_space<vmem>>, vector<1x1x128xf32>,
    %c0_121 = arith.constant 0 : index
    %c0_122 = arith.constant 0 : index
    %c0_123 = arith.constant 0 : index
    %116 = vector.load %arg6[%c0_121, %c0_122, %c0_123] : memref<1x256x128xf32, #tpu.memory_space<vmem>>, vector<1x256x128xf32>
    %117 = vector.shape_cast %116 : vector<1x256x128xf32> to vector<256x128xf32>
    %118 = vector.shape_cast %104 : vector<256x128xf32> to vector<1x256x128xf32>
    tpu.vector_store %arg6[%c0_121, %c0_122, %c0_123], %118 {strides = array<i32>} : memref<1x256x128xf32, #tpu.memory_space<vmem>>, vector<1x256x128xf32>,
    return
  }
  func.func @transform_0(%arg0: i32) -> (i32, i32, i32) {
    %c0_i32 = arith.constant 0 : i32
    %c0_i32_0 = arith.constant 0 : i32
    %c0_i32_1 = arith.constant 0 : i32
    return %arg0, %c0_i32, %c0_i32_0 : i32, i32, i32
  }
  func.func @transform_1(%arg0: i32) -> (i32, i32, i32) {
    %c0_i32 = arith.constant 0 : i32
    %c0_i32_0 = arith.constant 0 : i32
    %c0_i32_1 = arith.constant 0 : i32
    %c0_i32_2 = arith.constant 0 : i32
    return %c0_i32, %c0_i32_0, %c0_i32_1 : i32, i32, i32
  }
  func.func @transform_2(%arg0: i32) -> (i32, i32, i32) {
    %c0_i32 = arith.constant 0 : i32
    %c0_i32_0 = arith.constant 0 : i32
    %c0_i32_1 = arith.constant 0 : i32
    %c0_i32_2 = arith.constant 0 : i32
    return %c0_i32, %c0_i32_0, %c0_i32_1 : i32, i32, i32
  }
  func.func @transform_3(%arg0: i32) -> (i32, i32, i32) {
    %c0_i32 = arith.constant 0 : i32
    %c0_i32_0 = arith.constant 0 : i32
    %c0_i32_1 = arith.constant 0 : i32
    %c0_i32_2 = arith.constant 0 : i32
    return %c0_i32, %c0_i32_0, %c0_i32_1 : i32, i32, i32
  }
  func.func @transform_4(%arg0: i32) -> (i32, i32) {
    %c0_i32 = arith.constant 0 : i32
    %c0_i32_0 = arith.constant 0 : i32
    %c0_i32_1 = arith.constant 0 : i32
    return %c0_i32, %c0_i32_0 : i32, i32
  }
  func.func @transform_5(%arg0: i32) -> (i32, i32, i32) {
    %c0_i32 = arith.constant 0 : i32
    %c0_i32_0 = arith.constant 0 : i32
    %c0_i32_1 = arith.constant 0 : i32
    return %arg0, %c0_i32, %c0_i32_0 : i32, i32, i32
  }
  func.func @transform_6(%arg0: i32) -> (i32, i32, i32) {
    %c0_i32 = arith.constant 0 : i32
    %c0_i32_0 = arith.constant 0 : i32
    %c0_i32_1 = arith.constant 0 : i32
    return %arg0, %c0_i32, %c0_i32_0 : i32, i32, i32
  }
  func.func @transform_7(%arg0: i32) -> (i32, i32, i32) {
    %c0_i32 = arith.constant 0 : i32
    %c0_i32_0 = arith.constant 0 : i32
    %c0_i32_1 = arith.constant 0 : i32
    return %arg0, %c0_i32, %c0_i32_0 : i32, i32, i32
  }
}

module attributes {stable_mosaic.version = 11 : i64} {
  func.func @_bn_se_res_kernel(%arg0: i32, %arg1: memref<1x256x128xf32, #tpu.memory_space<vmem>>, %arg2: memref<1x256x128xf32, #tpu.memory_space<vmem>>, %arg3: memref<1x1x128xf32, #tpu.memory_space<vmem>>, %arg4: memref<1x1x128xf32, #tpu.memory_space<vmem>>, %arg5: memref<128x128xf32, #tpu.memory_space<vmem>>, %arg6: memref<1x128xf32, #tpu.memory_space<vmem>>, %arg7: memref<128x128xf32, #tpu.memory_space<vmem>>, %arg8: memref<1x128xf32, #tpu.memory_space<vmem>>, %arg9: memref<1x1xf32, #tpu.memory_space<smem>>, %arg10: memref<1x1xf32, #tpu.memory_space<smem>>, %arg11: memref<1x256x128xf32, #tpu.memory_space<vmem>>) attributes {dimension_semantics = [#tpu.dimension_semantics<parallel>], iteration_bounds = array<i64: 2>, scalar_prefetch = 0 : i64, scratch_operands = 0 : i64, tpu.core_type = #tpu.core_type<tc>, window_params = [{transform_indices = @transform_0, window_bounds = array<i64: 1, 256, 128>}, {transform_indices = @transform_1, window_bounds = array<i64: 1, 256, 128>}, {pipeline_mode = #tpu.pipeline_mode<synchronous>, transform_indices = @transform_2, window_bounds = array<i64: 1, 1, 128>}, {pipeline_mode = #tpu.pipeline_mode<synchronous>, transform_indices = @transform_3, window_bounds = array<i64: 1, 1, 128>}, {pipeline_mode = #tpu.pipeline_mode<synchronous>, transform_indices = @transform_4, window_bounds = array<i64: 128, 128>}, {pipeline_mode = #tpu.pipeline_mode<synchronous>, transform_indices = @transform_5, window_bounds = array<i64: 1, 128>}, {pipeline_mode = #tpu.pipeline_mode<synchronous>, transform_indices = @transform_6, window_bounds = array<i64: 128, 128>}, {pipeline_mode = #tpu.pipeline_mode<synchronous>, transform_indices = @transform_7, window_bounds = array<i64: 1, 128>}, {transform_indices = @transform_8, window_bounds = array<i64: 1, 1>}, {transform_indices = @transform_9, window_bounds = array<i64: 1, 1>}, {transform_indices = @transform_10, window_bounds = array<i64: 1, 256, 128>}]} {
    %c0 = arith.constant 0 : index
    %c0_0 = arith.constant 0 : index
    %c0_1 = arith.constant 0 : index
    %0 = vector.load %arg1[%c0, %c0_0, %c0_1] : memref<1x256x128xf32, #tpu.memory_space<vmem>>, vector<1x256x128xf32>
    %1 = vector.shape_cast %0 : vector<1x256x128xf32> to vector<256x128xf32>
    %c0_2 = arith.constant 0 : index
    %c0_3 = arith.constant 0 : index
    %c0_4 = arith.constant 0 : index
    %2 = vector.load %arg3[%c0_2, %c0_3, %c0_4] : memref<1x1x128xf32, #tpu.memory_space<vmem>>, vector<1x1x128xf32>
    %3 = vector.shape_cast %2 : vector<1x1x128xf32> to vector<1x128xf32>
    %4 = vector.broadcast %3 : vector<1x128xf32> to vector<256x128xf32>
    %5 = arith.mulf %1, %4 : vector<256x128xf32>
    %c0_5 = arith.constant 0 : index
    %c0_6 = arith.constant 0 : index
    %c0_7 = arith.constant 0 : index
    %6 = vector.load %arg4[%c0_5, %c0_6, %c0_7] : memref<1x1x128xf32, #tpu.memory_space<vmem>>, vector<1x1x128xf32>
    %7 = vector.shape_cast %6 : vector<1x1x128xf32> to vector<1x128xf32>
    %8 = vector.broadcast %7 : vector<1x128xf32> to vector<256x128xf32>
    %9 = arith.addf %5, %8 : vector<256x128xf32>
    %cst = arith.constant dense<0.000000e+00> : vector<128xf32>
    %10 = vector.multi_reduction <add>, %9, %cst [0] : vector<256x128xf32> to vector<128xf32>
    %11 = vector.shape_cast %10 : vector<128xf32> to vector<1x128xf32>
    %cst_8 = arith.constant 3.906250e-03 : f32
    %12 = vector.broadcast %cst_8 : f32 to vector<1x128xf32>
    %13 = arith.mulf %11, %12 : vector<1x128xf32>
    %cst_9 = arith.constant dense<0xFF800000> : vector<128xf32>
    %14 = vector.multi_reduction <maximumf>, %9, %cst_9 [0] : vector<256x128xf32> to vector<128xf32>
    %15 = vector.shape_cast %14 : vector<128xf32> to vector<1x128xf32>
    %16 = arith.addf %13, %15 : vector<1x128xf32>
    %c0_10 = arith.constant 0 : index
    %c0_11 = arith.constant 0 : index
    %17 = vector.load %arg5[%c0_10, %c0_11] : memref<128x128xf32, #tpu.memory_space<vmem>>, vector<128x128xf32>
    %cst_12 = arith.constant dense<0.000000e+00> : vector<1x128xf32>
    %18 = tpu.matmul %16, %17, %cst_12 {dimension_numbers = #tpu.dot_dimension_numbers<[1], [0], [0], [1], [0, 0, 1, 1], [], []>} : vector<1x128xf32>, vector<128x128xf32>, vector<1x128xf32> -> vector<1x128xf32>
    %c0_13 = arith.constant 0 : index
    %c0_14 = arith.constant 0 : index
    %19 = vector.load %arg6[%c0_13, %c0_14] : memref<1x128xf32, #tpu.memory_space<vmem>>, vector<1x128xf32>
    %20 = arith.addf %18, %19 : vector<1x128xf32>
    %c0_15 = arith.constant 0 : index
    %c0_16 = arith.constant 0 : index
    %21 = memref.load %arg9[%c0_15, %c0_16] : memref<1x1xf32, #tpu.memory_space<smem>>
    %cst_17 = arith.constant 0.000000e+00 : f32
    %22 = vector.broadcast %cst_17 : f32 to vector<1x128xf32>
    %23 = arith.cmpf oge, %20, %22 : vector<1x128xf32>
    %24 = vector.broadcast %21 : f32 to vector<1x128xf32>
    %25 = arith.mulf %24, %20 : vector<1x128xf32>
    %26 = arith.select %23, %20, %25 : vector<1x128xi1>, vector<1x128xf32>
    %c0_18 = arith.constant 0 : index
    %c0_19 = arith.constant 0 : index
    %27 = vector.load %arg7[%c0_18, %c0_19] : memref<128x128xf32, #tpu.memory_space<vmem>>, vector<128x128xf32>
    %cst_20 = arith.constant dense<0.000000e+00> : vector<1x128xf32>
    %28 = tpu.matmul %26, %27, %cst_20 {dimension_numbers = #tpu.dot_dimension_numbers<[1], [0], [0], [1], [0, 0, 1, 1], [], []>} : vector<1x128xf32>, vector<128x128xf32>, vector<1x128xf32> -> vector<1x128xf32>
    %c0_21 = arith.constant 0 : index
    %c0_22 = arith.constant 0 : index
    %29 = vector.load %arg8[%c0_21, %c0_22] : memref<1x128xf32, #tpu.memory_space<vmem>>, vector<1x128xf32>
    %30 = arith.addf %28, %29 : vector<1x128xf32>
    %31 = arith.negf %30 : vector<1x128xf32>
    %32 = math.exp %31 : vector<1x128xf32>
    %cst_23 = arith.constant 1.000000e+00 : f32
    %33 = vector.broadcast %cst_23 : f32 to vector<1x128xf32>
    %34 = arith.addf %33, %32 : vector<1x128xf32>
    %35 = arith.divf %33, %34 : vector<1x128xf32>
    %36 = vector.broadcast %35 : vector<1x128xf32> to vector<256x128xf32>
    %37 = arith.mulf %9, %36 : vector<256x128xf32>
    %c0_24 = arith.constant 0 : index
    %c0_25 = arith.constant 0 : index
    %c0_26 = arith.constant 0 : index
    %38 = vector.load %arg2[%c0_24, %c0_25, %c0_26] : memref<1x256x128xf32, #tpu.memory_space<vmem>>, vector<1x256x128xf32>
    %39 = vector.shape_cast %38 : vector<1x256x128xf32> to vector<256x128xf32>
    %40 = arith.addf %37, %39 : vector<256x128xf32>
    %c0_27 = arith.constant 0 : index
    %c0_28 = arith.constant 0 : index
    %41 = memref.load %arg10[%c0_27, %c0_28] : memref<1x1xf32, #tpu.memory_space<smem>>
    %cst_29 = arith.constant 0.000000e+00 : f32
    %42 = vector.broadcast %cst_29 : f32 to vector<256x128xf32>
    %43 = arith.cmpf oge, %40, %42 : vector<256x128xf32>
    %44 = vector.broadcast %41 : f32 to vector<256x128xf32>
    %45 = arith.mulf %44, %40 : vector<256x128xf32>
    %46 = arith.select %43, %40, %45 : vector<256x128xi1>, vector<256x128xf32>
    %c0_30 = arith.constant 0 : index
    %c0_31 = arith.constant 0 : index
    %c0_32 = arith.constant 0 : index
    %47 = vector.load %arg11[%c0_30, %c0_31, %c0_32] : memref<1x256x128xf32, #tpu.memory_space<vmem>>, vector<1x256x128xf32>
    %48 = vector.shape_cast %47 : vector<1x256x128xf32> to vector<256x128xf32>
    %49 = vector.shape_cast %46 : vector<256x128xf32> to vector<1x256x128xf32>
    tpu.vector_store %arg11[%c0_30, %c0_31, %c0_32], %49 {strides = array<i32>} : memref<1x256x128xf32, #tpu.memory_space<vmem>>, vector<1x256x128xf32>,
    return
  }
  func.func @transform_0(%arg0: i32) -> (i32, i32, i32) {
    %c0_i32 = arith.constant 0 : i32
    %c0_i32_0 = arith.constant 0 : i32
    %c0_i32_1 = arith.constant 0 : i32
    return %arg0, %c0_i32, %c0_i32_0 : i32, i32, i32
  }
  func.func @transform_1(%arg0: i32) -> (i32, i32, i32) {
    %c0_i32 = arith.constant 0 : i32
    %c0_i32_0 = arith.constant 0 : i32
    %c0_i32_1 = arith.constant 0 : i32
    return %arg0, %c0_i32, %c0_i32_0 : i32, i32, i32
  }
  func.func @transform_2(%arg0: i32) -> (i32, i32, i32) {
    %c0_i32 = arith.constant 0 : i32
    %c0_i32_0 = arith.constant 0 : i32
    %c0_i32_1 = arith.constant 0 : i32
    %c0_i32_2 = arith.constant 0 : i32
    return %c0_i32, %c0_i32_0, %c0_i32_1 : i32, i32, i32
  }
  func.func @transform_3(%arg0: i32) -> (i32, i32, i32) {
    %c0_i32 = arith.constant 0 : i32
    %c0_i32_0 = arith.constant 0 : i32
    %c0_i32_1 = arith.constant 0 : i32
    %c0_i32_2 = arith.constant 0 : i32
    return %c0_i32, %c0_i32_0, %c0_i32_1 : i32, i32, i32
  }
  func.func @transform_4(%arg0: i32) -> (i32, i32) {
    %c0_i32 = arith.constant 0 : i32
    %c0_i32_0 = arith.constant 0 : i32
    %c0_i32_1 = arith.constant 0 : i32
    return %c0_i32, %c0_i32_0 : i32, i32
  }
  func.func @transform_5(%arg0: i32) -> (i32, i32) {
    %c0_i32 = arith.constant 0 : i32
    %c0_i32_0 = arith.constant 0 : i32
    %c0_i32_1 = arith.constant 0 : i32
    return %c0_i32, %c0_i32_0 : i32, i32
  }
  func.func @transform_6(%arg0: i32) -> (i32, i32) {
    %c0_i32 = arith.constant 0 : i32
    %c0_i32_0 = arith.constant 0 : i32
    %c0_i32_1 = arith.constant 0 : i32
    return %c0_i32, %c0_i32_0 : i32, i32
  }
  func.func @transform_7(%arg0: i32) -> (i32, i32) {
    %c0_i32 = arith.constant 0 : i32
    %c0_i32_0 = arith.constant 0 : i32
    %c0_i32_1 = arith.constant 0 : i32
    return %c0_i32, %c0_i32_0 : i32, i32
  }
  func.func @transform_8(%arg0: i32) -> (i32, i32) {
    %c0_i32 = arith.constant 0 : i32
    %c0_i32_0 = arith.constant 0 : i32
    %c0_i32_1 = arith.constant 0 : i32
    return %c0_i32, %c0_i32_0 : i32, i32
  }
  func.func @transform_9(%arg0: i32) -> (i32, i32) {
    %c0_i32 = arith.constant 0 : i32
    %c0_i32_0 = arith.constant 0 : i32
    %c0_i32_1 = arith.constant 0 : i32
    return %c0_i32, %c0_i32_0 : i32, i32
  }
  func.func @transform_10(%arg0: i32) -> (i32, i32, i32) {
    %c0_i32 = arith.constant 0 : i32
    %c0_i32_0 = arith.constant 0 : i32
    %c0_i32_1 = arith.constant 0 : i32
    return %arg0, %c0_i32, %c0_i32_0 : i32, i32, i32
  }
}

</mosaic_0001>

<bundles_post_ra>
// kernel: irblock_forward.4
= control target key start
LH: loop header
LB: loop body
LE: loop exit
PB: predicated region body
PF: predicated region fallthrough
CT: control target
= control target key end

     0   :  { %s402_s9 = smov 0   ;;  %s461_s0 = inlined_call_operand.vmem [shape: f32[2,256,128], index: 0, kind: input, shape index: {}]   ;;  %s462_s1 = inlined_call_operand.vmem [shape: f32[2,1,128], index: 1, kind: output, shape index: {0}]   ;;  %s463_s2 = inlined_call_operand.vmem [shape: f32[2,1,128], index: 2, kind: output, shape index: {1}]  }
   0x1 LB: > { %s361_s10 = sadd.s32 4294967295, %s385_s9   ;;  %p365_p0 = scmp.ge.s32.totalorder %s385_s9, 1  ;;  %s385_s9 = sphi %s402_s9, %s13_s9  }
   0x2   : > { %p115_p1 = scmp.lt.s32.totalorder %s385_s9, 3 }
   0x4   : > { %p116_p2 = pnand %p365_p0, %p115_p1 }
   0x5   : > { %p138_p3 = scmp.lt.s32.totalorder (!%p116_p2), %s361_s10, 1 }
   0x6   : > { %119 = sbr.rel (%p116_p2) target bundleno = 94 (0x5e), region = 24 }
   0xd   : > { %s465_s10 = smov (!%p138_p3, %s361_s10), 1 }
   0xe   : > { %s370_s11 = sshll.u32 %s465_s10, 8  ;;  %s145_s17 = scalar_lea.vmem %s462_s1, %s465_s10 }
   0xf   : > { %s416_s14 = scalar_lea.vmem %s461_s0, %s370_s11  ;;  %s148_s20 = scalar_lea.vmem %s463_s2, %s465_s10 }
  0x10   : > { %v149_v0 = vld [vmem:[%s416_s14] sm:$0xff]  ;;  %v150_v1 = vld [vmem:[%s416_s14 + $0x8] sm:$0xff]  ;;  %v151_v2 = vld [vmem:[%s416_s14 + $0x10] sm:$0xff] }
  0x11   : > { %v152_v3 = vld [vmem:[%s416_s14 + $0x18] sm:$0xff]  ;;  %v181_v4 = vadd.f32 %v150_v1, %v149_v0  ;;  %v219_v5 = vmul.f32 %v149_v0, %v149_v0  ;;  %v220_v6 = vmul.f32 %v150_v1, %v150_v1  ;;  %v221_v7 = vmul.f32 %v151_v2, %v151_v2  ;;  %v153_v8 = vld [vmem:[%s416_s14 + $0x20] sm:$0xff]  ;;  %v154_v12 = vld [vmem:[%s416_s14 + $0x28] sm:$0xff] }
  0x12   : > { %v222_v10 = vmul.f32 %v152_v3, %v152_v3  ;;  %v223_v14 = vmul.f32 %v153_v8, %v153_v8  ;;  %v155_v16 = vld [vmem:[%s416_s14 + $0x30] sm:$0xff]  ;;  %v224_v18 = vmul.f32 %v154_v12, %v154_v12  ;;  %v156_v20 = vld [vmem:[%s416_s14 + $0x38] sm:$0xff]  ;;  %v157_v24 = vld [vmem:[%s416_s14 + $0x40] sm:$0xff] }
  0x13   : > { %v182_v9 = vadd.f32 %v181_v4, %v151_v2  ;;  %v251_v11 = vadd.f32 %v220_v6, %v219_v5  ;;  %v225_v22 = vmul.f32 %v155_v16, %v155_v16  ;;  %v226_v26 = vmul.f32 %v156_v20, %v156_v20  ;;  %v158_v28 = vld [vmem:[%s416_s14 + $0x48] sm:$0xff]  ;;  %v159_v32 = vld [vmem:[%s416_s14 + $0x50] sm:$0xff]  ;;  %v160_v36 = vld [vmem:[%s416_s14 + $0x58] sm:$0xff] }
  0x14   : > { %v227_v30 = vmul.f32 %v157_v24, %v157_v24  ;;  %v228_v34 = vmul.f32 %v158_v28, %v158_v28  ;;  %v229_v38 = vmul.f32 %v159_v32, %v159_v32  ;;  %v161_v40 = vld [vmem:[%s416_s14 + $0x60] sm:$0xff]  ;;  %v230_v42 = vmul.f32 %v160_v36, %v160_v36  ;;  %v162_v44 = vld [vmem:[%s416_s14 + $0x68] sm:$0xff]  ;;  %v163_v48 = vld [vmem:[%s416_s14 + $0x70] sm:$0xff] }
  0x15   : > { %v183_v13 = vadd.f32 %v182_v9, %v152_v3  ;;  %v252_v15 = vadd.f32 %v251_v11, %v221_v7  ;;  %v231_v46 = vmul.f32 %v161_v40, %v161_v40  ;;  %v232_v50 = vmul.f32 %v162_v44, %v162_v44  ;;  %v164_v52 = vld [vmem:[%s416_s14 + $0x78] sm:$0xff]  ;;  %v165_v56 = vld [vmem:[%s416_s14 + $0x80] sm:$0xff]  ;;  %v166_v60 = vld [vmem:[%s416_s14 + $0x88] sm:$0xff] }
  0x16   : > { %v233_v54 = vmul.f32 %v163_v48, %v163_v48  ;;  %v234_v58 = vmul.f32 %v164_v52, %v164_v52  ;;  %v235_v62 = vmul.f32 %v165_v56, %v165_v56  ;;  %v167_v0 = vld [vmem:[%s416_s14 + $0x90] sm:$0xff]  ;;  %v236_v2 = vmul.f32 %v166_v60, %v166_v60  ;;  %v168_v4 = vld [vmem:[%s416_s14 + $0x98] sm:$0xff] }
  0x17   : > { %v184_v17 = vadd.f32 %v183_v13, %v153_v8  ;;  %v253_v19 = vadd.f32 %v252_v15, %v222_v10  ;;  %v237_v6 = vmul.f32 %v167_v0, %v167_v0  ;;  %v169_v8 = vld [vmem:[%s416_s14 + $0xa0] sm:$0xff]  ;;  %v238_v10 = vmul.f32 %v168_v4, %v168_v4 }
  0x19   : > { %v185_v21 = vadd.f32 %v184_v17, %v154_v12  ;;  %v254_v23 = vadd.f32 %v253_v19, %v223_v14  ;;  %v170_v12 = vld [vmem:[%s416_s14 + $0xa8] sm:$0xff]  ;;  %v239_v14 = vmul.f32 %v169_v8, %v169_v8 }
  0x1b   : > { %v186_v25 = vadd.f32 %v185_v21, %v155_v16  ;;  %v255_v27 = vadd.f32 %v254_v23, %v224_v18  ;;  %v171_v16 = vld [vmem:[%s416_s14 + $0xb0] sm:$0xff]  ;;  %v240_v18 = vmul.f32 %v170_v12, %v170_v12 }
  0x1d   : > { %v187_v29 = vadd.f32 %v186_v25, %v156_v20  ;;  %v256_v31 = vadd.f32 %v255_v27, %v225_v22  ;;  %v172_v20 = vld [vmem:[%s416_s14 + $0xb8] sm:$0xff]  ;;  %v241_v22 = vmul.f32 %v171_v16, %v171_v16 }
  0x1f   : > { %v188_v33 = vadd.f32 %v187_v29, %v157_v24  ;;  %v257_v35 = vadd.f32 %v256_v31, %v226_v26  ;;  %v173_v24 = vld [vmem:[%s416_s14 + $0xc0] sm:$0xff]  ;;  %v242_v26 = vmul.f32 %v172_v20, %v172_v20 }
  0x21   : > { %v189_v37 = vadd.f32 %v188_v33, %v158_v28  ;;  %v258_v39 = vadd.f32 %v257_v35, %v227_v30  ;;  %v174_v28 = vld [vmem:[%s416_s14 + $0xc8] sm:$0xff]  ;;  %v243_v30 = vmul.f32 %v173_v24, %v173_v24 }
  0x23   : > { %v190_v41 = vadd.f32 %v189_v37, %v159_v32  ;;  %v259_v43 = vadd.f32 %v258_v39, %v228_v34  ;;  %v175_v32 = vld [vmem:[%s416_s14 + $0xd0] sm:$0xff]  ;;  %v244_v34 = vmul.f32 %v174_v28, %v174_v28 }
  0x25   : > { %v191_v45 = vadd.f32 %v190_v41, %v160_v36  ;;  %v260_v47 = vadd.f32 %v259_v43, %v229_v38  ;;  %v176_v36 = vld [vmem:[%s416_s14 + $0xd8] sm:$0xff]  ;;  %v245_v38 = vmul.f32 %v175_v32, %v175_v32 }
  0x27   : > { %v192_v49 = vadd.f32 %v191_v45, %v161_v40  ;;  %v261_v51 = vadd.f32 %v260_v47, %v230_v42  ;;  %v177_v40 = vld [vmem:[%s416_s14 + $0xe0] sm:$0xff]  ;;  %v246_v42 = vmul.f32 %v176_v36, %v176_v36 }
  0x29   : > { %v193_v53 = vadd.f32 %v192_v49, %v162_v44  ;;  %v262_v55 = vadd.f32 %v261_v51, %v231_v46  ;;  %v178_v44 = vld [vmem:[%s416_s14 + $0xe8] sm:$0xff]  ;;  %v247_v46 = vmul.f32 %v177_v40, %v177_v40 }
  0x2b   : > { %v194_v57 = vadd.f32 %v193_v53, %v163_v48  ;;  %v263_v59 = vadd.f32 %v262_v55, %v232_v50  ;;  %v179_v48 = vld [vmem:[%s416_s14 + $0xf0] sm:$0xff]  ;;  %v248_v50 = vmul.f32 %v178_v44, %v178_v44 }
  0x2d   : > { %v195_v61 = vadd.f32 %v194_v57, %v164_v52  ;;  %v264_v63 = vadd.f32 %v263_v59, %v233_v54  ;;  %v180_v52 = vld [vmem:[%s416_s14 + $0xf8] sm:$0xff]  ;;  %v249_v54 = vmul.f32 %v179_v48, %v179_v48 }
  0x2e   : > { %v250_v57 = vmul.f32 %v180_v52, %v180_v52 }
  0x2f   : > { %v196_v1 = vadd.f32 %v195_v61, %v165_v56  ;;  %v265_v3 = vadd.f32 %v264_v63, %v234_v58 }
  0x31   : > { %v197_v5 = vadd.f32 %v196_v1, %v166_v60  ;;  %v266_v7 = vadd.f32 %v265_v3, %v235_v62 }
  0x33   : > { %v198_v9 = vadd.f32 %v197_v5, %v167_v0  ;;  %v267_v11 = vadd.f32 %v266_v7, %v236_v2 }
  0x35   : > { %v199_v13 = vadd.f32 %v198_v9, %v168_v4  ;;  %v268_v15 = vadd.f32 %v267_v11, %v237_v6 }
  0x37   : > { %v200_v17 = vadd.f32 %v199_v13, %v169_v8  ;;  %v269_v19 = vadd.f32 %v268_v15, %v238_v10 }
  0x39   : > { %v201_v21 = vadd.f32 %v200_v17, %v170_v12  ;;  %v270_v23 = vadd.f32 %v269_v19, %v239_v14 }
  0x3b   : > { %v202_v25 = vadd.f32 %v201_v21, %v171_v16  ;;  %v271_v27 = vadd.f32 %v270_v23, %v240_v18 }
  0x3d   : > { %v203_v29 = vadd.f32 %v202_v25, %v172_v20  ;;  %v272_v31 = vadd.f32 %v271_v27, %v241_v22 }
  0x3f   : > { %v204_v33 = vadd.f32 %v203_v29, %v173_v24  ;;  %v273_v35 = vadd.f32 %v272_v31, %v242_v26 }
  0x41   : > { %v205_v37 = vadd.f32 %v204_v33, %v174_v28  ;;  %v274_v39 = vadd.f32 %v273_v35, %v243_v30 }
  0x43   : > { %v206_v41 = vadd.f32 %v205_v37, %v175_v32  ;;  %v275_v43 = vadd.f32 %v274_v39, %v244_v34 }
  0x45   : > { %v207_v45 = vadd.f32 %v206_v41, %v176_v36  ;;  %v276_v47 = vadd.f32 %v275_v43, %v245_v38 }
  0x47   : > { %v208_v49 = vadd.f32 %v207_v45, %v177_v40  ;;  %v277_v51 = vadd.f32 %v276_v47, %v246_v42 }
  0x49   : > { %v209_v53 = vadd.f32 %v208_v49, %v178_v44  ;;  %v278_v55 = vadd.f32 %v277_v51, %v247_v46 }
  0x4b   : > { %v210_v56 = vadd.f32 %v209_v53, %v179_v48  ;;  %v279_v58 = vadd.f32 %v278_v55, %v248_v50 }
  0x4d   : > { %v211_v59 = vadd.f32 %v210_v56, %v180_v52  ;;  %v280_v60 = vadd.f32 %v279_v58, %v249_v54 }
  0x4f   : > { %v212_v61 = vrot.slane %v211_v59, 4  ;;  %v281_v62 = vadd.f32 %v280_v60, %v250_v57 }
  0x51   : > { %v213_v63 = vadd.f32 %v212_v61, %v211_v59  ;;  %v282_v0 = vrot.slane %v281_v62, 4 }
  0x53   : > { %v214_v1 = vrot.slane %v213_v63, 2  ;;  %v283_v2 = vadd.f32 %v282_v0, %v281_v62 }
  0x55   : > { %v215_v3 = vadd.f32 %v214_v1, %v213_v63  ;;  %v284_v4 = vrot.slane %v283_v2, 2 }
  0x57   : > { %v216_v5 = vrot.slane %v215_v3, 1  ;;  %v285_v6 = vadd.f32 %v284_v4, %v283_v2 }
  0x59   : > { %v217_v7 = vadd.f32 %v216_v5, %v215_v3  ;;  %v286_v8 = vrot.slane %v285_v6, 1 }
  0x5b   : > { %218 = vst [vmem:[%s145_s17] sm:$0x1] %v217_v7  ;;  %v287_v9 = vadd.f32 %v286_v8, %v285_v6 }
  0x5d   : > { %288 = vst [vmem:[%s148_s20] sm:$0x1] %v287_v9 }
  0x5e PF: > { %s13_s9 = sadd.s32 1, %s385_s9  }
  0x5f   : > { %p10_p4 = scmp.ge.s32.totalorder %s13_s9, 4  }
  0x61   :  { %12 = sbr.rel (!%p10_p4) target bundleno = 1 (0x1), region = 66 }

// kernel: irblock_forward.7
= control target key start
LH: loop header
LB: loop body
LE: loop exit
PB: predicated region body
PF: predicated region fallthrough
CT: control target
= control target key end

     0   :  { %s1308_s17 = smov 0   ;;  %s2045_s0 = inlined_call_operand.vmem [shape: f32[2,256,128], index: 0, kind: input, shape index: {}]   ;;  %s2046_s1 = inlined_call_operand.vmem [shape: f32[2,256,128], index: 1, kind: input, shape index: {}]   ;;  %s2047_s2 = inlined_call_operand.vmem [shape: f32[1,1,128], index: 2, kind: input, shape index: {}]   ;;  %s2048_s3 = inlined_call_operand.vmem [shape: f32[1,1,128], index: 3, kind: input, shape index: {}]   ;;  %s2049_s4 = inlined_call_operand.vmem [shape: f32[128,128], index: 4, kind: input, shape index: {}]   ;;  %s2050_s5 = inlined_call_operand.vmem [shape: f32[1,128], index: 5, kind: input, shape index: {}]   ;;  %s2051_s6 = inlined_call_operand.vmem [shape: f32[128,128], index: 6, kind: input, shape index: {}]   ;;  %s2052_s7 = inlined_call_operand.vmem [shape: f32[1,128], index: 7, kind: input, shape index: {}]   ;;  %s2053_s8 = inlined_call_operand.<no memory space> [shape: f32[1,1], index: 8, kind: input, shape index: {}]   ;;  %s2054_s9 = inlined_call_operand.<no memory space> [shape: f32[1,1], index: 9, kind: input, shape index: {}]   ;;  %s2055_s10 = inlined_call_operand.vmem [shape: f32[2,256,128], index: 10, kind: output, shape index: {}]  }
   0x1   :  { %15 = sst [smem:[#allocation2]] %s2053_s8 }
   0x2   :  { %16 = sst [smem:[#allocation3]] %s2054_s9 }
   0x3 LB: > { %s1050_s18 = sadd.s32 4294967295, %s1242_s17   ;;  %p1054_p0 = scmp.ge.s32.totalorder %s1242_s17, 1  ;;  %s1242_s17 = sphi %s1308_s17, %s22_s17  }
   0x4   : > { %p324_p1 = scmp.lt.s32.totalorder %s1242_s17, 3 }
   0x6   : > { %p325_p2 = pnand %p1054_p0, %p324_p1 }
   0x8   : > { %328 = sbr.rel (%p325_p2) target bundleno = 609 (0x261), region = 60 }
   0xf   : > { %v568_v0 = vld [vmem:[%s2049_s4] sm:$0xff]  ;;  %v569_v1 = vld [vmem:[%s2049_s4 + $0x8] sm:$0xff]  ;;  %v570_v2 = vld [vmem:[%s2049_s4 + $0x10] sm:$0xff]  ;;  %v1244_v3 = vmov 0.0|0.0   ;;  %vm1245_vm0 = vmmov 0   ;;  %v1246_v6 = vmov 0.0  }
  0x10   : > { %1173 = vmatprep.subr.bf16.mxu0 %v1244_v3  ;;  %v1174_v4 = vpack.c.bf16 %v569_v1, %v568_v0  ;;  %v571_v5 = vld [vmem:[%s2049_s4 + $0x18] sm:$0xff]  ;;  %1135 = vmatprep.mubr.msk.f32.mxu0 %vm1245_vm0, %v1246_v6  ;;  %p367_p3 = scmp.lt.s32.totalorder %s1050_s18, 1  ;;  %v572_v8 = vld [vmem:[%s2049_s4 + $0x20] sm:$0xff]  ;;  %v573_v9 = vld [vmem:[%s2049_s4 + $0x28] sm:$0xff]  ;;  %s655_s29 = sld [smem:[#allocation2]] }
  0x11   : > { %1197 = vmatprep.subr.bf16.mxu1 %v1244_v3  ;;  %1170 = vmatprep.mubr.msk.f32.mxu1 %vm1245_vm0, %v1246_v6  ;;  %v1177_v7 = vpack.c.bf16 %v571_v5, %v570_v2  ;;  %v660_v10 = vld [vmem:[%s2051_s6] sm:$0xff]  ;;  %v661_v11 = vld [vmem:[%s2051_s6 + $0x8] sm:$0xff]  ;;  %v1180_v12 = vpack.c.bf16 %v573_v9, %v572_v8  ;;  %v574_v14 = vld [vmem:[%s2049_s4 + $0x30] sm:$0xff]  ;;  %s853_s19 = sld [smem:[#allocation3]] }
  0x12   : > { %1175 = vmatpush3.bf16.msra.mxu0 %v1174_v4  ;;  %s2093_s18 = smov (!%p367_p3, %s1050_s18), 1  ;;  %v1198_v13 = vpack.c.bf16 %v661_v11, %v660_v10  ;;  %v575_v15 = vld [vmem:[%s2049_s4 + $0x38] sm:$0xff]  ;;  %v576_v17 = vld [vmem:[%s2049_s4 + $0x40] sm:$0xff]  ;;  %v577_v18 = vld [vmem:[%s2049_s4 + $0x48] sm:$0xff] }
  0x13   : > { %1176 = vmatprep.subr.bf16.mxu0 %v1244_v3  ;;  %s1343_s13 = sshll.u32 %s2093_s18, 8  ;;  %v1183_v16 = vpack.c.bf16 %v575_v15, %v574_v14  ;;  %v1371_v21 = vld [vmem:[%s2047_s2] ss:$0 sm:$0xff]  ;;  %v1186_v22 = vpack.c.bf16 %v577_v18, %v576_v17  ;;  %v578_v24 = vld [vmem:[%s2049_s4 + $0x50] sm:$0xff]  ;;  %v579_v25 = vld [vmem:[%s2049_s4 + $0x58] sm:$0xff] }
  0x14   : > { %1199 = vmatpush3.bf16.msra.mxu1 %v1198_v13  ;;  %s1356_s20 = scalar_lea.vmem %s2045_s0, %s1343_s13  ;;  %v1387_v29 = vld [vmem:[%s2048_s3] ss:$0 sm:$0xff]  ;;  %v1189_v31 = vpack.c.bf16 %v579_v25, %v578_v24  ;;  %v581_v34 = vld [vmem:[%s2049_s4 + $0x68] sm:$0xff]  ;;  %v662_v41 = vld [vmem:[%s2051_s6 + $0x10] sm:$0xff]  ;;  %s1680_s8 = scalar_lea.vmem %s2046_s1, %s1343_s13 }
  0x15   : > { %1200 = vmatprep.subr.bf16.mxu1 %v1244_v3  ;;  %v382_v19 = vld [vmem:[%s1356_s20] sm:$0xff]  ;;  %v383_v20 = vld [vmem:[%s1356_s20 + $0x8] sm:$0xff]  ;;  %v384_v23 = vld [vmem:[%s1356_s20 + $0x10] sm:$0xff]  ;;  %s1896_s21 = scalar_lea.vmem %s2055_s10, %s1343_s13 }
  0x16   : > { %1178 = vmatpush3.bf16.msra.mxu0 %v1177_v7  ;;  %v421_v26 = vmul.f32 %v1371_v21, %v382_v19  ;;  %v422_v27 = vmul.f32 %v1371_v21, %v383_v20  ;;  %v385_v28 = vld [vmem:[%s1356_s20 + $0x18] sm:$0xff]  ;;  %v423_v30 = vmul.f32 %v1371_v21, %v384_v23  ;;  %v386_v32 = vld [vmem:[%s1356_s20 + $0x20] sm:$0xff]  ;;  %v387_v38 = vld [vmem:[%s1356_s20 + $0x28] sm:$0xff] }
  0x17   : > { %1179 = vmatprep.subr.bf16.mxu0 %v1244_v3  ;;  %v580_v33 = vld [vmem:[%s2049_s4 + $0x60] sm:$0xff]  ;;  %v424_v35 = vmul.f32 %v1371_v21, %v385_v28  ;;  %v425_v39 = vmul.f32 %v1371_v21, %v386_v32  ;;  %v663_v42 = vld [vmem:[%s2051_s6 + $0x18] sm:$0xff]  ;;  %v582_v44 = vld [vmem:[%s2049_s4 + $0x70] sm:$0xff]  ;;  %v426_v47 = vmul.f32 %v1371_v21, %v387_v38 }
  0x18   : > { %v1400_v36 = vadd.f32 %v1387_v29, %v421_v26  ;;  %v1403_v37 = vadd.f32 %v1387_v29, %v422_v27  ;;  %v1408_v40 = vadd.f32 %v1387_v29, %v423_v30  ;;  %v1192_v43 = vpack.c.bf16 %v581_v34, %v580_v33  ;;  %v388_v45 = vld [vmem:[%s1356_s20 + $0x30] sm:$0xff]  ;;  %v583_v46 = vld [vmem:[%s2049_s4 + $0x78] sm:$0xff]  ;;  %v664_v50 = vld [vmem:[%s2051_s6 + $0x20] sm:$0xff] }
  0x19   : > { %v1426_v48 = vadd.f32 %v1387_v29, %v424_v35  ;;  %v665_v51 = vld [vmem:[%s2051_s6 + $0x28] sm:$0xff]  ;;  %v389_v52 = vld [vmem:[%s1356_s20 + $0x38] sm:$0xff]  ;;  %v1201_v53 = vpack.c.bf16 %v663_v42, %v662_v41  ;;  %v427_v54 = vmul.f32 %v1371_v21, %v388_v45  ;;  %v1439_v55 = vadd.f32 %v1387_v29, %v425_v39  ;;  %v390_v58 = vld [vmem:[%s1356_s20 + $0x40] sm:$0xff] }
  0x1a   : > { %1181 = vmatpush3.bf16.msra.mxu0 %v1180_v12  ;;  %v492_v49 = vadd.f32 %v1403_v37, %v1400_v36  ;;  %v1195_v57 = vpack.c.bf16 %v583_v46, %v582_v44  ;;  %v1204_v59 = vpack.c.bf16 %v665_v51, %v664_v50  ;;  %v428_v60 = vmul.f32 %v1371_v21, %v389_v52  ;;  %v666_v63 = vld [vmem:[%s2051_s6 + $0x30] sm:$0xff]  ;;  %v667_v0 = vld [vmem:[%s2051_s6 + $0x38] sm:$0xff]  ;;  %v391_v1 = vld [vmem:[%s1356_s20 + $0x48] sm:$0xff] }
  0x1b   : > { %1182 = vmatprep.subr.bf16.mxu0 %v1244_v3  ;;  %1202 = vmatpush3.bf16.msra.mxu1 %v1201_v53  ;;  %v1446_v61 = vadd.f32 %v1387_v29, %v426_v47  ;;  %v429_v2 = vmul.f32 %v1371_v21, %v390_v58  ;;  %v1459_v4 = vadd.f32 %v1387_v29, %v427_v54  ;;  %v392_v6 = vld [vmem:[%s1356_s20 + $0x50] sm:$0xff]  ;;  %v393_v8 = vld [vmem:[%s1356_s20 + $0x58] sm:$0xff]  ;;  %v668_v12 = vld [vmem:[%s2051_s6 + $0x40] sm:$0xff] }
  0x1c   : > { %v493_v56 = vadd.f32 %v492_v49, %v1408_v40  ;;  %1203 = vmatprep.subr.bf16.mxu1 %v1244_v3  ;;  %v1207_v7 = vpack.c.bf16 %v667_v0, %v666_v63  ;;  %v430_v9 = vmul.f32 %v1371_v21, %v391_v1  ;;  %v1466_v10 = vadd.f32 %v1387_v29, %v428_v60  ;;  %v669_v13 = vld [vmem:[%s2051_s6 + $0x48] sm:$0xff]  ;;  %v394_v17 = vld [vmem:[%s1356_s20 + $0x60] sm:$0xff]  ;;  %v670_v24 = vld [vmem:[%s2051_s6 + $0x50] sm:$0xff] }
  0x1d   : > { %v431_v14 = vmul.f32 %v1371_v21, %v392_v6  ;;  %v1478_v15 = vadd.f32 %v1387_v29, %v429_v2  ;;  %v432_v18 = vmul.f32 %v1371_v21, %v393_v8  ;;  %v1210_v19 = vpack.c.bf16 %v669_v13, %v668_v12  ;;  %v395_v20 = vld [vmem:[%s1356_s20 + $0x68] sm:$0xff]  ;;  %v671_v25 = vld [vmem:[%s2051_s6 + $0x58] sm:$0xff]  ;;  %v396_v30 = vld [vmem:[%s1356_s20 + $0x70] sm:$0xff] }
  0x1e   : > { %1184 = vmatpush3.bf16.msra.mxu0 %v1183_v16  ;;  %v494_v62 = vadd.f32 %v493_v56, %v1426_v48  ;;  %v433_v26 = vmul.f32 %v1371_v21, %v394_v17  ;;  %v434_v32 = vmul.f32 %v1371_v21, %v395_v20  ;;  %v530_v34 = vmax.f32 %v1400_v36, %v1439_v55  ;;  %v673_v44 = vld [vmem:[%s2051_s6 + $0x68] sm:$0xff]  ;;  %v398_v45 = vld [vmem:[%s1356_s20 + $0x80] sm:$0xff]  ;;  %v400_v47 = vld [vmem:[%s1356_s20 + $0x90] sm:$0xff] }
  0x1f   : > { %1185 = vmatprep.subr.bf16.mxu0 %v1244_v3  ;;  %1205 = vmatpush3.bf16.msra.mxu1 %v1204_v59  ;;  %v1497_v27 = vadd.f32 %v1387_v29, %v431_v14  ;;  %v1504_v33 = vadd.f32 %v1387_v29, %v432_v18  ;;  %v1213_v35 = vpack.c.bf16 %v671_v25, %v670_v24  ;;  %v399_v46 = vld [vmem:[%s1356_s20 + $0x88] sm:$0xff]  ;;  %v401_v53 = vld [vmem:[%s1356_s20 + $0x98] sm:$0xff]  ;;  %v402_v58 = vld [vmem:[%s1356_s20 + $0xa0] sm:$0xff] }
  0x20   : > { %v495_v5 = vadd.f32 %v494_v62, %v1439_v55  ;;  %1206 = vmatprep.subr.bf16.mxu1 %v1244_v3  ;;  %v531_v39 = vmax.f32 %v1403_v37, %v1446_v61  ;;  %v532_v41 = vmax.f32 %v1408_v40, %v1459_v4  ;;  %v533_v42 = vmax.f32 %v1426_v48, %v1466_v10  ;;  %v404_v6 = vld [vmem:[%s1356_s20 + $0xb0] sm:$0xff] }
  0x21   : > { %v435_v49 = vmul.f32 %v1371_v21, %v396_v30  ;;  %v1528_v51 = vadd.f32 %v1387_v29, %v433_v26  ;;  %v1533_v54 = vadd.f32 %v1387_v29, %v434_v32  ;;  %v534_v56 = vmax.f32 %v530_v34, %v1478_v15  ;;  %v408_v30 = vld [vmem:[%s1356_s20 + $0xd0] sm:$0xff] }
  0x22   : > { %1187 = vmatpush3.bf16.msra.mxu0 %v1186_v22  ;;  %v496_v11 = vadd.f32 %v495_v5, %v1446_v61  ;;  %v1485_v22 = vadd.f32 %v1387_v29, %v430_v9  ;;  %v536_v62 = vmax.f32 %v532_v41, %v1497_v27  ;;  %v537_v63 = vmax.f32 %v533_v42, %v1504_v33  ;;  %v403_v5 = vld [vmem:[%s1356_s20 + $0xa8] sm:$0xff]  ;;  %v412_v41 = vld [vmem:[%s1356_s20 + $0xf0] sm:$0xff]  ;;  %v413_v42 = vld [vmem:[%s1356_s20 + $0xf8] sm:$0xff] }
  0x23   : > { %1188 = vmatprep.subr.bf16.mxu0 %v1244_v3  ;;  %1208 = vmatpush3.bf16.msra.mxu1 %v1207_v7  ;;  %v437_v0 = vmul.f32 %v1371_v21, %v398_v45  ;;  %v438_v1 = vmul.f32 %v1371_v21, %v399_v46  ;;  %v439_v2 = vmul.f32 %v1371_v21, %v400_v47  ;;  %v405_v7 = vld [vmem:[%s1356_s20 + $0xb8] sm:$0xff] }
  0x24   : > { %v497_v16 = vadd.f32 %v496_v11, %v1459_v4  ;;  %1209 = vmatprep.subr.bf16.mxu1 %v1244_v3  ;;  %v535_v60 = vmax.f32 %v531_v39, %v1485_v22  ;;  %v440_v8 = vmul.f32 %v1371_v21, %v401_v53  ;;  %v1550_v9 = vadd.f32 %v1387_v29, %v435_v49  ;;  %v410_v53 = vld [vmem:[%s1356_s20 + $0xe0] sm:$0xff] }
  0x25   : > { %v441_v13 = vmul.f32 %v1371_v21, %v402_v58  ;;  %v538_v14 = vmax.f32 %v534_v56, %v1528_v51  ;;  %v443_v24 = vmul.f32 %v1371_v21, %v404_v6  ;;  %v444_v25 = vmul.f32 %v1371_v21, %v405_v7  ;;  %v411_v56 = vld [vmem:[%s1356_s20 + $0xe8] sm:$0xff] }
  0x26   : > { %1190 = vmatpush3.bf16.msra.mxu0 %v1189_v31  ;;  %v498_v23 = vadd.f32 %v497_v16, %v1466_v10  ;;  %v397_v31 = vld [vmem:[%s1356_s20 + $0x78] sm:$0xff]  ;;  %v406_v16 = vld [vmem:[%s1356_s20 + $0xc0] sm:$0xff]  ;;  %v539_v18 = vmax.f32 %v535_v60, %v1533_v54  ;;  %v1568_v26 = vadd.f32 %v1387_v29, %v437_v0  ;;  %v1574_v32 = vadd.f32 %v1387_v29, %v438_v1 }
  0x27   : > { %1191 = vmatprep.subr.bf16.mxu0 %v1244_v3  ;;  %1211 = vmatpush3.bf16.msra.mxu1 %v1210_v19  ;;  %v436_v50 = vmul.f32 %v1371_v21, %v397_v31  ;;  %v540_v19 = vmax.f32 %v536_v62, %v1550_v9  ;;  %v409_v31 = vld [vmem:[%s1356_s20 + $0xd8] sm:$0xff]  ;;  %v1577_v34 = vadd.f32 %v1387_v29, %v439_v2 }
  0x28   : > { %v499_v28 = vadd.f32 %v498_v23, %v1478_v15  ;;  %1212 = vmatprep.subr.bf16.mxu1 %v1244_v3  ;;  %v442_v23 = vmul.f32 %v1371_v21, %v403_v5  ;;  %v542_v39 = vmax.f32 %v538_v14, %v1568_v26  ;;  %v447_v49 = vmul.f32 %v1371_v21, %v408_v30 }
  0x29   : > { %v1553_v11 = vadd.f32 %v1387_v29, %v436_v50  ;;  %v544_v45 = vmax.f32 %v540_v19, %v1577_v34  ;;  %v448_v50 = vmul.f32 %v1371_v21, %v409_v31  ;;  %v1603_v58 = vadd.f32 %v1387_v29, %v443_v24 }
  0x2a   : > { %1193 = vmatpush3.bf16.msra.mxu0 %v1192_v43  ;;  %v500_v38 = vadd.f32 %v499_v28, %v1485_v22  ;;  %v672_v43 = vld [vmem:[%s2051_s6 + $0x60] sm:$0xff]  ;;  %v407_v28 = vld [vmem:[%s1356_s20 + $0xc8] sm:$0xff]  ;;  %v451_v62 = vmul.f32 %v1371_v21, %v412_v41  ;;  %v449_v7 = vmul.f32 %v1371_v21, %v410_v53  ;;  %v1625_v14 = vadd.f32 %v1387_v29, %v447_v49 }
  0x2b   : > { %1194 = vmatprep.subr.bf16.mxu0 %v1244_v3  ;;  %1214 = vmatpush3.bf16.msra.mxu1 %v1213_v35  ;;  %v541_v20 = vmax.f32 %v537_v63, %v1553_v11  ;;  %v446_v47 = vmul.f32 %v1371_v21, %v407_v28  ;;  %v452_v63 = vmul.f32 %v1371_v21, %v413_v42 }
  0x2c   : > { %v501_v52 = vadd.f32 %v500_v38, %v1497_v27  ;;  %1215 = vmatprep.subr.bf16.mxu1 %v1244_v3  ;;  %v445_v38 = vmul.f32 %v1371_v21, %v406_v16  ;;  %v548_v5 = vmax.f32 %v544_v45, %v1603_v58  ;;  %v1628_v16 = vadd.f32 %v1387_v29, %v448_v50 }
  0x2d   : > { %v1635_v19 = vadd.f32 %v1387_v29, %v452_v63  ;;  %v1643_v28 = vadd.f32 %v1387_v29, %v449_v7 }
  0x2e   : > { %1196 = vmatpush3.bf16.msra.mxu0 %v1195_v57  ;;  %v1216_v57 = vpack.c.bf16 %v673_v44, %v672_v43  ;;  %v502_v59 = vadd.f32 %v501_v52, %v1504_v33  ;;  %v543_v44 = vmax.f32 %v539_v18, %v1574_v32  ;;  %v1595_v52 = vadd.f32 %v1387_v29, %v441_v13 }
  0x2f   : > { %v1622_v13 = vadd.f32 %v1387_v29, %v446_v47  ;;  %v1632_v18 = vadd.f32 %v1387_v29, %v451_v62  ;;  %v552_v24 = vmax.f32 %v548_v5, %v1625_v14 }
  0x30   : > { %v503_v12 = vadd.f32 %v502_v59, %v1528_v51  ;;  %1217 = vmatpush3.bf16.msra.mxu1 %v1216_v57  ;;  %v1600_v57 = vadd.f32 %v1387_v29, %v442_v23  ;;  %v1606_v59 = vadd.f32 %v1387_v29, %v444_v25  ;;  %v546_v0 = vmax.f32 %v542_v39, %v1595_v52 }
  0x31   : > { %1218 = vmatprep.subr.bf16.mxu1 %v1244_v3  ;;  %v1580_v3 = vadd.f32 %v1387_v29, %v440_v8  ;;  %v450_v8 = vmul.f32 %v1371_v21, %v411_v56  ;;  %v556_v41 = vmax.f32 %v552_v24, %v1632_v18 }
  0x32   : > { %v504_v17 = vadd.f32 %v503_v12, %v1533_v54  ;;  %v547_v2 = vmax.f32 %v543_v44, %v1600_v57  ;;  %v1619_v12 = vadd.f32 %v1387_v29, %v445_v38 }
  0x33   : > { %v545_v46 = vmax.f32 %v541_v20, %v1580_v3  ;;  %v1646_v30 = vadd.f32 %v1387_v29, %v450_v8 }
  0x34   : > { %v505_v35 = vadd.f32 %v504_v17, %v1550_v9  ;;  %v550_v21 = vmax.f32 %v546_v0, %v1619_v12  ;;  %v551_v23 = vmax.f32 %v547_v2, %v1622_v13 }
  0x35   : > { %v549_v6 = vmax.f32 %v545_v46, %v1606_v59 }
  0x36   : > { %v506_v43 = vadd.f32 %v505_v35, %v1553_v11  ;;  %v554_v35 = vmax.f32 %v550_v21, %v1643_v28  ;;  %v555_v39 = vmax.f32 %v551_v23, %v1646_v30 }
  0x37   : > { %v553_v25 = vmax.f32 %v549_v6, %v1628_v16 }
  0x38   : > { %v507_v60 = vadd.f32 %v506_v43, %v1568_v26  ;;  %v558_v45 = vmax.f32 %v554_v35, %v555_v39  ;;  %v674_v35 = vld [vmem:[%s2051_s6 + $0x70] sm:$0xff] }
  0x39   : > { %v557_v42 = vmax.f32 %v553_v25, %v1635_v19 }
  0x3a   : > { %v508_v1 = vadd.f32 %v507_v60, %v1574_v32 }
  0x3b   : > { %v559_v46 = vmax.f32 %v556_v41, %v557_v42  ;;  %v584_v41 = vld [vmem:[%s2050_s5] sm:$0x1] }
  0x3c   : > { %v509_v17 = vadd.f32 %v508_v1, %v1577_v34 }
  0x3d   : > { %v560_v49 = vmax.f32 %v558_v45, %v559_v46 }
  0x3e   : > { %v510_v20 = vadd.f32 %v509_v17, %v1580_v3 }
  0x3f   : > { %v561_v56 = vrot.slane %v560_v49, 4 }
  0x40   : > { %v511_v31 = vadd.f32 %v510_v20, %v1595_v52 }
  0x41   : > { %v562_v63 = vmax.f32 %v560_v49, %v561_v56 }
  0x42   : > { %v512_v38 = vadd.f32 %v511_v31, %v1600_v57 }
  0x43   : > { %v563_v2 = vrot.slane %v562_v63, 2 }
  0x44   : > { %v513_v43 = vadd.f32 %v512_v38, %v1603_v58  ;;  %v675_v38 = vld [vmem:[%s2051_s6 + $0x78] sm:$0xff] }
  0x45   : > { %v564_v7 = vmax.f32 %v562_v63, %v563_v2  ;;  %v1219_v39 = vpack.c.bf16 %v675_v38, %v674_v35  ;;  %v753_v63 = vlaneseq  ;;  %v796_v38 = vld [vmem:[%s1680_s8 + $0x38] sm:$0xff] }
  0x46   : > { %v514_v44 = vadd.f32 %v513_v43, %v1606_v59  ;;  %v657_v43 = vstv %s655_s29 }
  0x47   : > { %v565_v21 = vrot.slane %v564_v7, 1  ;;  %1220 = vmatpush3.bf16.msra.mxu1 %v1219_v39 }
  0x48   : > { %v515_v29 = vadd.f32 %v514_v44, %v1619_v12 }
  0x49   : > { %v566_v24 = vmax.f32 %v564_v7, %v565_v21 }
  0x4a   : > { %v516_v47 = vadd.f32 %v515_v29, %v1622_v13 }
  0x4c   : > { %v517_v50 = vadd.f32 %v516_v47, %v1625_v14  ;;  %v676_v47 = vld [vmem:[%s2052_s7] sm:$0x1] }
  0x4e   : > { %v518_v53 = vadd.f32 %v517_v50, %v1628_v16 }
  0x50   : > { %v519_v60 = vadd.f32 %v518_v53, %v1643_v28 }
  0x52   : > { %v520_v62 = vadd.f32 %v519_v60, %v1646_v30 }
  0x54   : > { %v521_v0 = vadd.f32 %v520_v62, %v1632_v18 }
  0x56   : > { %v522_v1 = vadd.f32 %v521_v0, %v1635_v19  ;;  %v754_v0 = vshrl.u32 %v753_v63, 7 }
  0x58   : > { %v523_v5 = vrot.slane %v522_v1, 4 }
  0x5a   : > { %v524_v6 = vadd.f32 %v523_v5, %v522_v1  ;;  %v755_v1 = vsub.s32 0, %v754_v0 }
  0x5c   : > { %v525_v8 = vrot.slane %v524_v6, 2 }
  0x5e   : > { %v526_v17 = vadd.f32 %v525_v8, %v524_v6 }
  0x60   : > { %v527_v20 = vrot.slane %v526_v17, 1 }
  0x62   : > { %v528_v23 = vadd.f32 %v527_v20, %v526_v17 }
  0x64   : > { %v529_v25 = vmul.f32 0.00390625, %v528_v23 }
  0x66   : > { %v567_v31 = vadd.f32 %v566_v24, %v529_v25  ;;  %v789_v25 = vld [vmem:[%s1680_s8] sm:$0xff] }
  0x68   : > { %1136 = vmatmul.mubr.f32.vlgmr.msra.gmra.mrb[0].mxu0 %v567_v31  ;;  %v792_v31 = vld [vmem:[%s1680_s8 + $0x18] sm:$0xff] }
 0x13b   : > { %v651_v42 = vpop.f32.mrb[0].mxu0 }
 0x13c   : > { %v652_v44 = vadd.f32 %v651_v42, %v584_v41  ;;  %v1137_v45 = vpop.f32.mrb[1].mxu0 }
 0x13d   : > { %v801_v45 = vld [vmem:[%s1680_s8 + $0x60] sm:$0xff] }
 0x13e   : > { %v658_v46 = vmul.f32 %v657_v43, %v652_v44  ;;  %vm656_vm1 = vcmp.ge.f32.partialorder %v652_v44, 0.0 }
 0x140   : > { %v659_v29 = vsel %vm656_vm1, %v652_v44, %v658_v46 }
 0x141   : > { %1171 = vmatmul.mubr.f32.vlgmr.msra.gmra.mrb[0].mxu1 %v659_v29 }
 0x214   : > { %v743_v49 = vpop.f32.mrb[0].mxu1 }
 0x215   : > { %v744_v50 = vadd.f32 %v743_v49, %v676_v47  ;;  %v1172_v53 = vpop.f32.mrb[1].mxu1  ;;  %v803_v49 = vld [vmem:[%s1680_s8 + $0x70] sm:$0xff] }
 0x216   : > { %v808_v53 = vld [vmem:[%s1680_s8 + $0x98] sm:$0xff] }
 0x217   : > { %v1063_v56 = vmul.f32 -1.442695, %v744_v50  ;;  %v807_v50 = vld [vmem:[%s1680_s8 + $0x90] sm:$0xff] }
 0x219   : > { %1232 = vpow2.f32 %v1063_v56 }
 0x223   : > { %v1233_v60 = vpop.eup %1232 }
 0x224   : > { %v750_v62 = vadd.f32 1.0, %v1233_v60 }
 0x226   : > { %1234 = vrcp.f32 %v750_v62  ;;  %v811_v62 = vld [vmem:[%s1680_s8 + $0xb0] sm:$0xff] }
 0x230   : > { %v1235_v2 = vpop.eup %1234 }
 0x231   : > { %v756_v5 = vrot.slane %v1235_v2, %v755_v1 }
 0x233   : > { %v757_v6 = vmul.f32 %v756_v5, %v1400_v36  ;;  %v758_v7 = vmul.f32 %v756_v5, %v1403_v37  ;;  %v759_v8 = vmul.f32 %v756_v5, %v1408_v40  ;;  %v760_v17 = vmul.f32 %v756_v5, %v1426_v48 }
 0x234   : > { %v761_v21 = vmul.f32 %v756_v5, %v1439_v55  ;;  %v762_v20 = vmul.f32 %v756_v5, %v1446_v61  ;;  %v763_v23 = vmul.f32 %v756_v5, %v1459_v4  ;;  %v764_v24 = vmul.f32 %v756_v5, %v1466_v10 }
 0x235   : > { %v765_v36 = vmul.f32 %v756_v5, %v1478_v15  ;;  %v766_v37 = vmul.f32 %v756_v5, %v1485_v22  ;;  %v767_v40 = vmul.f32 %v756_v5, %v1497_v27  ;;  %v768_v48 = vmul.f32 %v756_v5, %v1504_v33  ;;  %v790_v15 = vld [vmem:[%s1680_s8 + $0x8] sm:$0xff]  ;;  %v791_v22 = vld [vmem:[%s1680_s8 + $0x10] sm:$0xff] }
 0x236   : > { %v769_v55 = vmul.f32 %v756_v5, %v1528_v51  ;;  %v770_v61 = vmul.f32 %v756_v5, %v1533_v54  ;;  %v771_v4 = vmul.f32 %v756_v5, %v1550_v9  ;;  %v772_v10 = vmul.f32 %v756_v5, %v1553_v11  ;;  %v793_v54 = vld [vmem:[%s1680_s8 + $0x20] sm:$0xff]  ;;  %v794_v9 = vld [vmem:[%s1680_s8 + $0x28] sm:$0xff]  ;;  %v795_v11 = vld [vmem:[%s1680_s8 + $0x30] sm:$0xff] }
 0x237   : > { %v773_v27 = vmul.f32 %v756_v5, %v1568_v26  ;;  %v774_v33 = vmul.f32 %v756_v5, %v1574_v32  ;;  %v775_v35 = vmul.f32 %v756_v5, %v1577_v34  ;;  %v776_v51 = vmul.f32 %v756_v5, %v1580_v3  ;;  %v797_v32 = vld [vmem:[%s1680_s8 + $0x40] sm:$0xff]  ;;  %v798_v34 = vld [vmem:[%s1680_s8 + $0x48] sm:$0xff]  ;;  %v799_v3 = vld [vmem:[%s1680_s8 + $0x50] sm:$0xff] }
 0x238   : > { %v777_v39 = vmul.f32 %v756_v5, %v1595_v52  ;;  %v778_v41 = vmul.f32 %v756_v5, %v1600_v57  ;;  %v779_v42 = vmul.f32 %v756_v5, %v1603_v58  ;;  %v780_v26 = vmul.f32 %v756_v5, %v1606_v59  ;;  %v800_v58 = vld [vmem:[%s1680_s8 + $0x58] sm:$0xff]  ;;  %v802_v59 = vld [vmem:[%s1680_s8 + $0x68] sm:$0xff] }
 0x239   : > { %v781_v43 = vmul.f32 %v756_v5, %v1619_v12  ;;  %v782_v44 = vmul.f32 %v756_v5, %v1622_v13  ;;  %v783_v52 = vmul.f32 %v756_v5, %v1625_v14  ;;  %v784_v57 = vmul.f32 %v756_v5, %v1628_v16  ;;  %v804_v13 = vld [vmem:[%s1680_s8 + $0x78] sm:$0xff]  ;;  %v805_v14 = vld [vmem:[%s1680_s8 + $0x80] sm:$0xff]  ;;  %v806_v16 = vld [vmem:[%s1680_s8 + $0x88] sm:$0xff] }
 0x23a   : > { %v785_v46 = vmul.f32 %v756_v5, %v1643_v28  ;;  %v786_v29 = vmul.f32 %v756_v5, %v1646_v30  ;;  %v787_v47 = vmul.f32 %v756_v5, %v1632_v18  ;;  %v788_v12 = vmul.f32 %v756_v5, %v1635_v19  ;;  %v809_v18 = vld [vmem:[%s1680_s8 + $0xa0] sm:$0xff]  ;;  %v810_v19 = vld [vmem:[%s1680_s8 + $0xa8] sm:$0xff]  ;;  %v812_v5 = vld [vmem:[%s1680_s8 + $0xb8] sm:$0xff] }
 0x23b   : > { %v1734_v56 = vadd.f32 %v789_v25, %v757_v6  ;;  %v1736_v60 = vadd.f32 %v790_v15, %v758_v7  ;;  %v1738_v28 = vadd.f32 %v791_v22, %v759_v8  ;;  %v1740_v30 = vadd.f32 %v792_v31, %v760_v17  ;;  %v813_v6 = vld [vmem:[%s1680_s8 + $0xc0] sm:$0xff]  ;;  %v814_v7 = vld [vmem:[%s1680_s8 + $0xc8] sm:$0xff]  ;;  %v816_v15 = vld [vmem:[%s1680_s8 + $0xd8] sm:$0xff] }
 0x23c   : > { %v1745_v63 = vadd.f32 %v793_v54, %v761_v21  ;;  %v1747_v0 = vadd.f32 %v794_v9, %v762_v20  ;;  %v1749_v1 = vadd.f32 %v795_v11, %v763_v23  ;;  %v1751_v2 = vadd.f32 %v796_v38, %v764_v24  ;;  %v815_v20 = vld [vmem:[%s1680_s8 + $0xd0] sm:$0xff]  ;;  %v817_v23 = vld [vmem:[%s1680_s8 + $0xe0] sm:$0xff]  ;;  %v818_v9 = vld [vmem:[%s1680_s8 + $0xe8] sm:$0xff] }
 0x23d   : > { %v1756_v8 = vadd.f32 %v797_v32, %v765_v36  ;;  %v1758_v17 = vadd.f32 %v798_v34, %v766_v37  ;;  %v1760_v25 = vadd.f32 %v799_v3, %v767_v40  ;;  %v1762_v21 = vadd.f32 %v800_v58, %v768_v48  ;;  %v819_v36 = vld [vmem:[%s1680_s8 + $0xf0] sm:$0xff]  ;;  %v820_v11 = vld [vmem:[%s1680_s8 + $0xf8] sm:$0xff] }
 0x23e   : > { %v1767_v22 = vadd.f32 %v801_v45, %v769_v55  ;;  %v1769_v24 = vadd.f32 %v802_v59, %v770_v61  ;;  %v1771_v31 = vadd.f32 %v803_v49, %v771_v4  ;;  %v1773_v54 = vadd.f32 %v804_v13, %v772_v10 }
 0x23f   : > { %v1778_v37 = vadd.f32 %v805_v14, %v773_v27  ;;  %v1780_v40 = vadd.f32 %v806_v16, %v774_v33  ;;  %v1782_v48 = vadd.f32 %v807_v50, %v775_v35  ;;  %v1784_v38 = vadd.f32 %v808_v53, %v776_v51 }
 0x240   : > { %v1786_v55 = vadd.f32 %v809_v18, %v777_v39  ;;  %v1788_v61 = vadd.f32 %v810_v19, %v778_v41  ;;  %v1790_v4 = vadd.f32 %v811_v62, %v779_v42  ;;  %v1792_v10 = vadd.f32 %v812_v5, %v780_v26 }
 0x241   : > { %v1794_v32 = vadd.f32 %v813_v6, %v781_v43  ;;  %v1796_v34 = vadd.f32 %v814_v7, %v782_v44  ;;  %v1798_v27 = vadd.f32 %v815_v20, %v783_v52  ;;  %v1800_v33 = vadd.f32 %v816_v15, %v784_v57 }
 0x242   : > { %v1802_v35 = vadd.f32 %v817_v23, %v785_v46  ;;  %v1804_v51 = vadd.f32 %v818_v9, %v786_v29  ;;  %v1806_v39 = vadd.f32 %v819_v36, %v787_v47  ;;  %v1808_v41 = vadd.f32 %v820_v11, %v788_v12 }
 0x243   : > { %2066 = vst [vmem:[#allocation4_spill] sm:$0xff] %v1796_v34  ;;  %2067 = vst [vmem:[#allocation5_spill] sm:$0xff] %v1798_v27  ;;  %v1810_v42 = vstv %s853_s19  ;;  %vm854_vm2 = vcmp.ge.f32.partialorder %v1734_v56, 0.0  ;;  %vm855_vm3 = vcmp.ge.f32.partialorder %v1736_v60, 0.0  ;;  %vm856_vm4 = vcmp.ge.f32.partialorder %v1738_v28, 0.0 }
 0x244   : > { %2068 = vst [vmem:[#allocation6_spill] sm:$0xff] %v1800_v33  ;;  %2069 = vst [vmem:[#allocation7_spill] sm:$0xff] %v1804_v51  ;;  %vm857_vm5 = vcmp.ge.f32.partialorder %v1740_v30, 0.0  ;;  %vm858_vm6 = vcmp.ge.f32.partialorder %v1745_v63, 0.0  ;;  %vm859_vm7 = vcmp.ge.f32.partialorder %v1747_v0, 0.0  ;;  %vm860_vm8 = vcmp.ge.f32.partialorder %v1749_v1, 0.0 }
 0x245   : > { %2070 = vst [vmem:[#allocation8_spill] sm:$0xff] %v1806_v39  ;;  %vm861_vm9 = vcmp.ge.f32.partialorder %v1751_v2, 0.0  ;;  %vm862_vm10 = vcmp.ge.f32.partialorder %v1756_v8, 0.0  ;;  %vm863_vm11 = vcmp.ge.f32.partialorder %v1758_v17, 0.0  ;;  %vm864_vm12 = vcmp.ge.f32.partialorder %v1760_v25, 0.0 }
 0x246   : > { %vm865_vm13 = vcmp.ge.f32.partialorder %v1762_v21, 0.0  ;;  %v887_v26 = vmul.f32 %v1810_v42, %v1734_v56  ;;  %v888_v3 = vmul.f32 %v1810_v42, %v1736_v60  ;;  %v889_v43 = vmul.f32 %v1810_v42, %v1738_v28 }
 0x247   : > { %v890_v44 = vmul.f32 %v1810_v42, %v1740_v30  ;;  %v891_v52 = vmul.f32 %v1810_v42, %v1745_v63  ;;  %v892_v57 = vmul.f32 %v1810_v42, %v1747_v0  ;;  %v893_v58 = vmul.f32 %v1810_v42, %v1749_v1 }
 0x248   : > { %v894_v45 = vmul.f32 %v1810_v42, %v1751_v2  ;;  %v895_v59 = vmul.f32 %v1810_v42, %v1756_v8  ;;  %v896_v46 = vmul.f32 %v1810_v42, %v1758_v17  ;;  %v897_v29 = vmul.f32 %v1810_v42, %v1760_v25 }
 0x249   : > { %v898_v47 = vmul.f32 %v1810_v42, %v1762_v21  ;;  %v899_v12 = vmul.f32 %v1810_v42, %v1767_v22  ;;  %v900_v49 = vmul.f32 %v1810_v42, %v1769_v24  ;;  %v901_v13 = vmul.f32 %v1810_v42, %v1771_v31 }
 0x24a   : > { %v902_v14 = vmul.f32 %v1810_v42, %v1773_v54  ;;  %vm882_vm14 = vcmp.ge.f32.partialorder %v1802_v35, 0.0  ;;  %vm883_vm15 = vcmp.ge.f32.partialorder %v1804_v51, 0.0  ;;  %vm884_vm0 = vcmp.ge.f32.partialorder %v1806_v39, 0.0 }
 0x24b   : > { %vm885_vm1 = vcmp.ge.f32.partialorder %v1808_v41, 0.0  ;;  %v903_v16 = vmul.f32 %v1810_v42, %v1778_v37  ;;  %v904_v50 = vmul.f32 %v1810_v42, %v1780_v40  ;;  %v905_v53 = vmul.f32 %v1810_v42, %v1782_v48 }
 0x24c   : > { %v906_v18 = vmul.f32 %v1810_v42, %v1784_v38  ;;  %v907_v19 = vmul.f32 %v1810_v42, %v1786_v55  ;;  %v908_v62 = vmul.f32 %v1810_v42, %v1788_v61  ;;  %v909_v5 = vmul.f32 %v1810_v42, %v1790_v4 }
 0x24d   : > { %v910_v6 = vmul.f32 %v1810_v42, %v1792_v10  ;;  %v911_v7 = vmul.f32 %v1810_v42, %v1794_v32  ;;  %v912_v20 = vmul.f32 %v1810_v42, %v1796_v34  ;;  %v913_v15 = vmul.f32 %v1810_v42, %v1798_v27 }
 0x24e   : > { %v914_v23 = vmul.f32 %v1810_v42, %v1800_v33  ;;  %v915_v9 = vmul.f32 %v1810_v42, %v1802_v35  ;;  %v916_v36 = vmul.f32 %v1810_v42, %v1804_v51  ;;  %v917_v11 = vmul.f32 %v1810_v42, %v1806_v39 }
 0x24f   : > { %v918_v34 = vmul.f32 %v1810_v42, %v1808_v41  ;;  %v919_v27 = vsel %vm854_vm2, %v1734_v56, %v887_v26  ;;  %v920_v33 = vsel %vm855_vm3, %v1736_v60, %v888_v3  ;;  %v921_v51 = vsel %vm856_vm4, %v1738_v28, %v889_v43  ;;  %v2091_v26 = vld [vmem:[#allocation8_spill] sm:$0xff] }
 0x250   : > { %v922_v39 = vsel %vm857_vm5, %v1740_v30, %v890_v44  ;;  %v923_v56 = vsel %vm858_vm6, %v1745_v63, %v891_v52  ;;  %v924_v42 = vsel %vm859_vm7, %v1747_v0, %v892_v57  ;;  %v925_v60 = vsel %vm860_vm8, %v1749_v1, %v893_v58  ;;  %951 = vst [vmem:[%s1896_s21] sm:$0xff] %v919_v27  ;;  %v2088_v27 = vld [vmem:[#allocation6_spill] sm:$0xff] }
 0x251   : > { %v926_v28 = vsel %vm861_vm9, %v1751_v2, %v894_v45  ;;  %952 = vst [vmem:[%s1896_s21 + $0x8] sm:$0xff] %v920_v33  ;;  %953 = vst [vmem:[%s1896_s21 + $0x10] sm:$0xff] %v921_v51  ;;  %v927_v30 = vsel %vm862_vm10, %v1756_v8, %v895_v59  ;;  %v928_v63 = vsel %vm863_vm11, %v1758_v17, %v896_v46  ;;  %vm2071_vm2 = vcmp.ge.f32.partialorder %v1767_v22, 0.0  ;;  %v2090_v51 = vld [vmem:[#allocation7_spill] sm:$0xff] }
 0x252   : > { %954 = vst [vmem:[%s1896_s21 + $0x18] sm:$0xff] %v922_v39  ;;  %v929_v0 = vsel %vm864_vm12, %v1760_v25, %v897_v29  ;;  %v930_v1 = vsel %vm865_vm13, %v1762_v21, %v898_v47  ;;  %955 = vst [vmem:[%s1896_s21 + $0x20] sm:$0xff] %v923_v56  ;;  %v931_v2 = vsel %vm2071_vm2, %v1767_v22, %v899_v12  ;;  %vm2072_vm3 = vcmp.ge.f32.partialorder %v1769_v24, 0.0 }
 0x253   : > { %956 = vst [vmem:[%s1896_s21 + $0x28] sm:$0xff] %v924_v42  ;;  %957 = vst [vmem:[%s1896_s21 + $0x30] sm:$0xff] %v925_v60  ;;  %v932_v8 = vsel %vm2072_vm3, %v1769_v24, %v900_v49  ;;  %vm2073_vm4 = vcmp.ge.f32.partialorder %v1771_v31, 0.0  ;;  %vm2074_vm5 = vcmp.ge.f32.partialorder %v1773_v54, 0.0  ;;  %vm2075_vm6 = vcmp.ge.f32.partialorder %v1778_v37, 0.0 }
 0x254   : > { %958 = vst [vmem:[%s1896_s21 + $0x38] sm:$0xff] %v926_v28  ;;  %v933_v17 = vsel %vm2073_vm4, %v1771_v31, %v901_v13  ;;  %v934_v25 = vsel %vm2074_vm5, %v1773_v54, %v902_v14  ;;  %959 = vst [vmem:[%s1896_s21 + $0x40] sm:$0xff] %v927_v30  ;;  %v935_v21 = vsel %vm2075_vm6, %v1778_v37, %v903_v16  ;;  %vm2076_vm7 = vcmp.ge.f32.partialorder %v1780_v40, 0.0 }
 0x255   : > { %960 = vst [vmem:[%s1896_s21 + $0x48] sm:$0xff] %v928_v63  ;;  %961 = vst [vmem:[%s1896_s21 + $0x50] sm:$0xff] %v929_v0  ;;  %v936_v22 = vsel %vm2076_vm7, %v1780_v40, %v904_v50  ;;  %vm2077_vm8 = vcmp.ge.f32.partialorder %v1782_v48, 0.0  ;;  %vm2078_vm9 = vcmp.ge.f32.partialorder %v1784_v38, 0.0  ;;  %vm2079_vm10 = vcmp.ge.f32.partialorder %v1786_v55, 0.0 }
 0x256   : > { %962 = vst [vmem:[%s1896_s21 + $0x58] sm:$0xff] %v930_v1  ;;  %v937_v24 = vsel %vm2077_vm8, %v1782_v48, %v905_v53  ;;  %v938_v31 = vsel %vm2078_vm9, %v1784_v38, %v906_v18  ;;  %963 = vst [vmem:[%s1896_s21 + $0x60] sm:$0xff] %v931_v2  ;;  %v939_v54 = vsel %vm2079_vm10, %v1786_v55, %v907_v19  ;;  %vm2080_vm11 = vcmp.ge.f32.partialorder %v1788_v61, 0.0  ;;  %v2084_v55 = vld [vmem:[#allocation4_spill] sm:$0xff] }
 0x257   : > { %964 = vst [vmem:[%s1896_s21 + $0x68] sm:$0xff] %v932_v8  ;;  %965 = vst [vmem:[%s1896_s21 + $0x70] sm:$0xff] %v933_v17  ;;  %v940_v37 = vsel %vm2080_vm11, %v1788_v61, %v908_v62  ;;  %vm2081_vm12 = vcmp.ge.f32.partialorder %v1790_v4, 0.0  ;;  %vm2082_vm13 = vcmp.ge.f32.partialorder %v1792_v10, 0.0  ;;  %vm2083_vm2 = vcmp.ge.f32.partialorder %v1794_v32, 0.0 }
 0x258   : > { %966 = vst [vmem:[%s1896_s21 + $0x78] sm:$0xff] %v934_v25  ;;  %v941_v40 = vsel %vm2081_vm12, %v1790_v4, %v909_v5  ;;  %v942_v48 = vsel %vm2082_vm13, %v1792_v10, %v910_v6  ;;  %967 = vst [vmem:[%s1896_s21 + $0x80] sm:$0xff] %v935_v21  ;;  %v943_v38 = vsel %vm2083_vm2, %v1794_v32, %v911_v7  ;;  %vm2085_vm3 = vcmp.ge.f32.partialorder %v2084_v55, 0.0  ;;  %v2086_v4 = vld [vmem:[#allocation5_spill] sm:$0xff] }
 0x259   : > { %968 = vst [vmem:[%s1896_s21 + $0x88] sm:$0xff] %v936_v22  ;;  %969 = vst [vmem:[%s1896_s21 + $0x90] sm:$0xff] %v937_v24  ;;  %v944_v61 = vsel %vm2085_vm3, %v2084_v55, %v912_v20  ;;  %vm2087_vm4 = vcmp.ge.f32.partialorder %v2086_v4, 0.0  ;;  %vm2089_vm5 = vcmp.ge.f32.partialorder %v2088_v27, 0.0  ;;  %v947_v32 = vsel %vm882_vm14, %v1802_v35, %v915_v9 }
 0x25a   : > { %970 = vst [vmem:[%s1896_s21 + $0x98] sm:$0xff] %v938_v31  ;;  %v945_v10 = vsel %vm2087_vm4, %v2086_v4, %v913_v15  ;;  %v946_v33 = vsel %vm2089_vm5, %v2088_v27, %v914_v23  ;;  %971 = vst [vmem:[%s1896_s21 + $0xa0] sm:$0xff] %v939_v54  ;;  %v948_v39 = vsel %vm883_vm15, %v2090_v51, %v916_v36 }
 0x25b   : > { %972 = vst [vmem:[%s1896_s21 + $0xa8] sm:$0xff] %v940_v37  ;;  %973 = vst [vmem:[%s1896_s21 + $0xb0] sm:$0xff] %v941_v40  ;;  %v949_v3 = vsel %vm884_vm0, %v2091_v26, %v917_v11  ;;  %v950_v43 = vsel %vm885_vm1, %v1808_v41, %v918_v34 }
 0x25c   : > { %974 = vst [vmem:[%s1896_s21 + $0xb8] sm:$0xff] %v942_v48  ;;  %975 = vst [vmem:[%s1896_s21 + $0xc0] sm:$0xff] %v943_v38 }
 0x25d   : > { %976 = vst [vmem:[%s1896_s21 + $0xc8] sm:$0xff] %v944_v61  ;;  %977 = vst [vmem:[%s1896_s21 + $0xd0] sm:$0xff] %v945_v10 }
 0x25e   : > { %978 = vst [vmem:[%s1896_s21 + $0xd8] sm:$0xff] %v946_v33  ;;  %979 = vst [vmem:[%s1896_s21 + $0xe0] sm:$0xff] %v947_v32 }
 0x25f   : > { %980 = vst [vmem:[%s1896_s21 + $0xe8] sm:$0xff] %v948_v39  ;;  %981 = vst [vmem:[%s1896_s21 + $0xf0] sm:$0xff] %v949_v3 }
 0x260   : > { %982 = vst [vmem:[%s1896_s21 + $0xf8] sm:$0xff] %v950_v43 }
 0x261 PF: > { %s22_s17 = sadd.s32 1, %s1242_s17  }
 0x262   : > { %p19_p4 = scmp.ge.s32.totalorder %s22_s17, 4  }
 0x264   :  { %21 = sbr.rel (!%p19_p4) target bundleno = 3 (0x3), region = 93 }

// kernel: irblock_forward.5
= control target key start
LH: loop header
LB: loop body
LE: loop exit
PB: predicated region body
PF: predicated region fallthrough
CT: control target
= control target key end

     0   :  { %s5696_s24 = smov 0   ;;  %s6401_s0 = inlined_call_operand.vmem [shape: f32[2,256,128], index: 0, kind: input, shape index: {}]   ;;  %s6402_s1 = inlined_call_operand.vmem [shape: f32[1,1,128], index: 1, kind: input, shape index: {}]   ;;  %s6403_s2 = inlined_call_operand.vmem [shape: f32[1,1,128], index: 2, kind: input, shape index: {}]   ;;  %s6404_s3 = inlined_call_operand.vmem [shape: bf16[9,128,128], index: 3, kind: input, shape index: {}]   ;;  %s6405_s4 = inlined_call_operand.<no memory space> [shape: f32[1,1], index: 4, kind: input, shape index: {}]   ;;  %s6406_s5 = inlined_call_operand.vmem [shape: bf16[2,256,128], index: 5, kind: output, shape index: {0}]   ;;  %s6407_s6 = inlined_call_operand.vmem [shape: f32[2,1,128], index: 6, kind: output, shape index: {1}]   ;;  %s6408_s7 = inlined_call_operand.vmem [shape: f32[2,1,128], index: 7, kind: output, shape index: {2}]  }
   0x1 LB: > { %s4262_s4 = sadd.s32 4294967295, %s5652_s24   ;;  %p4266_p0 = scmp.ge.s32.totalorder %s5652_s24, 1  ;;  %s5652_s24 = sphi %s5696_s24, %s19_s24  }
   0x2   : > { %p243_p1 = scmp.lt.s32.totalorder %s5652_s24, 3 }
   0x4   : > { %p244_p2 = pnand %p4266_p0, %p243_p1 }
   0x5   : > { %v5565_v0 = vld [vmem:[%s6404_s3] sm:$0xff] (!%p244_p2)   ;;  %v5654_v2 = vmov (!%p244_p2), 0.0   ;;  %v5567_v3 = vld [vmem:[%s6404_s3 + $0x8] sm:$0xff] (!%p244_p2)   ;;  %p281_p3 = scmp.lt.s32.totalorder (!%p244_p2), %s4262_s4, 1  ;;  %v5569_v5 = vld [vmem:[%s6404_s3 + $0x10] sm:$0xff] (!%p244_p2)   ;;  %v5655_v7 = vmov (!%p244_p2), 0.0|0.0  }
   0x6   : > { %247 = sbr.rel (%p244_p2) target bundleno = 561 (0x231), region = 40  ;;  %v5566_v1 = vld [vmem:[%s6404_s3 + $0x100] sm:$0xff] (!%p244_p2)   ;;  %408 = vst [vmem:[#allocation2] sm:$0xff] (!%p244_p2), %v5654_v2  ;;  %409 = vst [vmem:[#allocation2 + $0x8] sm:$0xff] (!%p244_p2), %v5654_v2  ;;  %4852 = vmatprep.subr.bf16.mxu1 (!%p244_p2), %v5565_v0  ;;  %v5568_v4 = vld [vmem:[%s6404_s3 + $0x108] sm:$0xff] (!%p244_p2)   ;;  %4868 = vmatprep.mubr.bf16.mxu1 (!%p244_p2), %v5655_v7 }
   0x7   : > { %410 = vst [vmem:[#allocation2 + $0x10] sm:$0x3] (!%p244_p2), %v5654_v2  ;;  %411 = vst [vmem:[#allocation2 + $0x18] sm:$0xff] (!%p244_p2), %v5654_v2  ;;  %5044 = vmatprep.subr.bf16.mxu0 (!%p244_p2), %v5566_v1  ;;  %4853 = vmatpush3.bf16.msra.mxu1 (!%p244_p2), %v5565_v0  ;;  %v5570_v6 = vld [vmem:[%s6404_s3 + $0x110] sm:$0xff] (!%p244_p2)   ;;  %v5571_v8 = vld [vmem:[%s6404_s3 + $0x18] sm:$0xff] (!%p244_p2)  }
   0x8   : > { %412 = vst [vmem:[#allocation2 + $0x20] sm:$0xff] (!%p244_p2), %v5654_v2  ;;  %413 = vst [vmem:[#allocation2 + $0x28] sm:$0x3] (!%p244_p2), %v5654_v2  ;;  %5045 = vmatpush3.bf16.msra.mxu0 (!%p244_p2), %v5566_v1  ;;  %4854 = vmatprep.subr.bf16.mxu1 (!%p244_p2), %v5567_v3  ;;  %v5572_v9 = vld [vmem:[%s6404_s3 + $0x118] sm:$0xff] (!%p244_p2)   ;;  %v5573_v10 = vld [vmem:[%s6404_s3 + $0x20] sm:$0xff] (!%p244_p2)  }
   0x9   : > { %414 = vst [vmem:[#allocation2 + $0x30] sm:$0xff] (!%p244_p2), %v5654_v2  ;;  %415 = vst [vmem:[#allocation2 + $0x38] sm:$0xff] (!%p244_p2), %v5654_v2  ;;  %5046 = vmatprep.subr.bf16.mxu0 (!%p244_p2), %v5568_v4  ;;  %v5574_v11 = vld [vmem:[%s6404_s3 + $0x120] sm:$0xff] (!%p244_p2)   ;;  %v5575_v12 = vld [vmem:[%s6404_s3 + $0x28] sm:$0xff] (!%p244_p2)  }
   0xa   : > { %416 = vst [vmem:[#allocation2 + $0x40] sm:$0x3] (!%p244_p2), %v5654_v2  ;;  %417 = vst [vmem:[#allocation2 + $0x48] sm:$0xff] (!%p244_p2), %v5654_v2  ;;  %v5576_v13 = vld [vmem:[%s6404_s3 + $0x128] sm:$0xff] (!%p244_p2)   ;;  %v5757_v16 = vld [vmem:[%s6402_s1] ss:$0 sm:$0xff] (!%p244_p2) }
   0xb   : > { %418 = vst [vmem:[#allocation2 + $0x50] sm:$0xff] (!%p244_p2), %v5654_v2  ;;  %419 = vst [vmem:[#allocation2 + $0x58] sm:$0x3] (!%p244_p2), %v5654_v2  ;;  %4855 = vmatpush3.bf16.msra.mxu1 (!%p244_p2), %v5567_v3  ;;  %v5764_v19 = vld [vmem:[%s6403_s2] ss:$0 sm:$0xff] (!%p244_p2)  ;;  %v5577_v22 = vld [vmem:[%s6404_s3 + $0x30] sm:$0xff] (!%p244_p2)  }
   0xc   : > { %420 = vst [vmem:[#allocation2 + $0x60] sm:$0xff] (!%p244_p2), %v5654_v2  ;;  %421 = vst [vmem:[#allocation2 + $0x68] sm:$0xff] (!%p244_p2), %v5654_v2  ;;  %5047 = vmatpush3.bf16.msra.mxu0 (!%p244_p2), %v5568_v4  ;;  %4856 = vmatprep.subr.bf16.mxu1 (!%p244_p2), %v5569_v5  ;;  %v5578_v27 = vld [vmem:[%s6404_s3 + $0x130] sm:$0xff] (!%p244_p2)   ;;  %v5579_v38 = vld [vmem:[%s6404_s3 + $0x38] sm:$0xff] (!%p244_p2)  }
   0xd   : > { %422 = vst [vmem:[#allocation2 + $0x70] sm:$0x3] %v5654_v2  ;;  %423 = vst [vmem:[#allocation2 + $0x78] sm:$0xff] %v5654_v2  ;;  %s6411_s4 = smov (!%p281_p3, %s4262_s4), 1  ;;  %5048 = vmatprep.subr.bf16.mxu0 %v5570_v6  ;;  %v5580_v42 = vld [vmem:[%s6404_s3 + $0x138] sm:$0xff]   ;;  %v5581_v46 = vld [vmem:[%s6404_s3 + $0x40] sm:$0xff]  }
   0xe   : > { %424 = vst [vmem:[#allocation2 + $0x80] sm:$0xff] %v5654_v2  ;;  %425 = vst [vmem:[#allocation2 + $0x88] sm:$0x3] %v5654_v2  ;;  %s4507_s18 = sshll.u32 %s6411_s4, 8  ;;  %v5582_v56 = vld [vmem:[%s6404_s3 + $0x140] sm:$0xff]   ;;  %v5583_v7 = vld [vmem:[%s6404_s3 + $0x148] sm:$0xff]   ;;  %s293_s23 = scalar_lea.vmem %s6407_s6, %s6411_s4 }
   0xf   : > { %426 = vst [vmem:[#allocation2 + $0x90] sm:$0xff] %v5654_v2  ;;  %427 = vst [vmem:[#allocation2 + $0x98] sm:$0xff] %v5654_v2  ;;  %4857 = vmatpush3.bf16.msra.mxu1 %v5569_v5  ;;  %s5744_s26 = scalar_lea.vmem %s6401_s0, %s4507_s18  ;;  %s4508_s18 = sshll.u32 %s6411_s4, 7 }
  0x10   : > { %428 = vst [vmem:[#allocation2 + $0xa0] sm:$0x3] %v5654_v2  ;;  %429 = vst [vmem:[#allocation2 + $0xa8] sm:$0xff] %v5654_v2  ;;  %5049 = vmatpush3.bf16.msra.mxu0 %v5570_v6  ;;  %4858 = vmatprep.subr.bf16.mxu1 %v5571_v8  ;;  %v298_v14 = vld [vmem:[%s5744_s26] sm:$0xff]  ;;  %v299_v15 = vld [vmem:[%s5744_s26 + $0x8] sm:$0xff]  ;;  %s6368_s21 = scalar_lea.vmem %s6406_s5, %s4508_s18  ;;  %s296_s28 = scalar_lea.vmem %s6408_s7, %s6411_s4 }
  0x11   : > { %430 = vst [vmem:[#allocation2 + $0xb0] sm:$0xff] %v5654_v2  ;;  %431 = vst [vmem:[#allocation2 + $0xb8] sm:$0x3] %v5654_v2  ;;  %5050 = vmatprep.subr.bf16.mxu0 %v5572_v9  ;;  %v337_v17 = vmul.f32 %v5757_v16, %v298_v14  ;;  %v338_v18 = vmul.f32 %v5757_v16, %v299_v15  ;;  %v300_v20 = vld [vmem:[%s5744_s26 + $0x10] sm:$0xff]  ;;  %v301_v21 = vld [vmem:[%s5744_s26 + $0x18] sm:$0xff] }
  0x12   : > { %432 = vst [vmem:[#allocation2 + $0xc0] sm:$0xff] %v5654_v2  ;;  %433 = vst [vmem:[#allocation2 + $0xc8] sm:$0xff] %v5654_v2  ;;  %v339_v25 = vmul.f32 %v5757_v16, %v300_v20  ;;  %v340_v26 = vmul.f32 %v5757_v16, %v301_v21  ;;  %v302_v31 = vld [vmem:[%s5744_s26 + $0x20] sm:$0xff]  ;;  %v303_v32 = vld [vmem:[%s5744_s26 + $0x28] sm:$0xff] }
  0x13   : > { %434 = vst [vmem:[#allocation2 + $0xd0] sm:$0x3] %v5654_v2  ;;  %435 = vst [vmem:[#allocation2 + $0xd8] sm:$0xff] %v5654_v2  ;;  %4859 = vmatpush3.bf16.msra.mxu1 %v5571_v8  ;;  %v376_v23 = vadd.f32 %v5764_v19, %v337_v17  ;;  %v377_v24 = vadd.f32 %v5764_v19, %v338_v18  ;;  %v341_v33 = vmul.f32 %v5757_v16, %v302_v31  ;;  %v304_v35 = vld [vmem:[%s5744_s26 + $0x30] sm:$0xff]  ;;  %v305_v36 = vld [vmem:[%s5744_s26 + $0x38] sm:$0xff] }
  0x14   : > { %436 = vst [vmem:[#allocation2 + $0xe0] sm:$0xff] %v5654_v2  ;;  %437 = vst [vmem:[#allocation2 + $0xe8] sm:$0x3] %v5654_v2  ;;  %5051 = vmatpush3.bf16.msra.mxu0 %v5572_v9  ;;  %4860 = vmatprep.subr.bf16.mxu1 %v5573_v10  ;;  %v378_v29 = vadd.f32 %v5764_v19, %v339_v25  ;;  %v379_v30 = vadd.f32 %v5764_v19, %v340_v26  ;;  %v306_v44 = vld [vmem:[%s5744_s26 + $0x40] sm:$0xff]  ;;  %v307_v45 = vld [vmem:[%s5744_s26 + $0x48] sm:$0xff] }
  0x15   : > { %438 = vst [vmem:[#allocation2 + $0xf0] sm:$0xff] %v5654_v2  ;;  %439 = vst [vmem:[#allocation2 + $0xf8] sm:$0xff] %v5654_v2  ;;  %5052 = vmatprep.subr.bf16.mxu0 %v5574_v11  ;;  %v5778_v28 = vpack.c.bf16 %v377_v24, %v376_v23  ;;  %v342_v34 = vmul.f32 %v5757_v16, %v303_v32  ;;  %v343_v37 = vmul.f32 %v5757_v16, %v304_v35  ;;  %v308_v50 = vld [vmem:[%s5744_s26 + $0x50] sm:$0xff]  ;;  %v309_v51 = vld [vmem:[%s5744_s26 + $0x58] sm:$0xff] }
  0x16   : > { %440 = vst [vmem:[#allocation2 + $0x100] sm:$0x3] %v5654_v2  ;;  %441 = vst [vmem:[#allocation2 + $0x108] sm:$0xff] %v5654_v2  ;;  %v380_v39 = vadd.f32 %v5764_v19, %v341_v33  ;;  %v344_v41 = vmul.f32 %v5757_v16, %v305_v36  ;;  %v345_v48 = vmul.f32 %v5757_v16, %v306_v44  ;;  %v310_v1 = vld [vmem:[%s5744_s26 + $0x60] sm:$0xff]  ;;  %v312_v6 = vld [vmem:[%s5744_s26 + $0x70] sm:$0xff] }
  0x17   : > { %442 = vst [vmem:[#allocation2 + $0x110] sm:$0xff] %v5654_v2  ;;  %443 = vst [vmem:[#allocation2 + $0x118] sm:$0x3] %v5654_v2  ;;  %4861 = vmatpush3.bf16.msra.mxu1 %v5573_v10  ;;  %5060 = vmatprep.mubr.bf16.mxu0 %v5778_v28  ;;  %v381_v40 = vadd.f32 %v5764_v19, %v342_v34  ;;  %v5800_v43 = vadd.f32 %v5764_v19, %v343_v37  ;;  %v5584_v9 = vld [vmem:[%s6404_s3 + $0x48] sm:$0xff]   ;;  %v313_v10 = vld [vmem:[%s5744_s26 + $0x78] sm:$0xff] }
  0x18   : > { %444 = vst [vmem:[#allocation2 + $0x120] sm:$0xff] %v5654_v2  ;;  %445 = vst [vmem:[#allocation2 + $0x128] sm:$0xff] %v5654_v2  ;;  %5053 = vmatpush3.bf16.msra.mxu0 %v5574_v11  ;;  %4862 = vmatprep.subr.bf16.mxu1 %v5575_v12  ;;  %v5808_v47 = vadd.f32 %v5764_v19, %v344_v41  ;;  %v346_v49 = vmul.f32 %v5757_v16, %v307_v45  ;;  %v314_v26 = vld [vmem:[%s5744_s26 + $0x80] sm:$0xff]  ;;  %v5586_v34 = vld [vmem:[%s6404_s3 + $0x158] sm:$0xff]  }
  0x19   : > { %446 = vst [vmem:[#allocation2 + $0x130] sm:$0x3] %v5654_v2  ;;  %447 = vst [vmem:[#allocation2 + $0x138] sm:$0xff] %v5654_v2  ;;  %5054 = vmatprep.subr.bf16.mxu0 %v5576_v13  ;;  %v5817_v54 = vadd.f32 %v5764_v19, %v345_v48  ;;  %v347_v57 = vmul.f32 %v5757_v16, %v308_v50  ;;  %v348_v58 = vmul.f32 %v5757_v16, %v309_v51  ;;  %v5590_v37 = vld [vmem:[%s6404_s3 + $0x58] sm:$0xff]   ;;  %v319_v48 = vld [vmem:[%s5744_s26 + $0xa8] sm:$0xff] }
  0x1a   : > { %448 = vst [vmem:[#allocation2 + $0x140] sm:$0xff] %v5654_v2  ;;  %449 = vst [vmem:[#allocation2 + $0x148] sm:$0x3] %v5654_v2  ;;  %v385_v55 = vadd.f32 %v5764_v19, %v346_v49  ;;  %v5826_v62 = vpack.c.bf16 %v379_v30, %v378_v29  ;;  %v349_v4 = vmul.f32 %v5757_v16, %v310_v1  ;;  %v5588_v49 = vld [vmem:[%s6404_s3 + $0x160] sm:$0xff]   ;;  %v5589_v1 = vld [vmem:[%s6404_s3 + $0x168] sm:$0xff]  }
  0x1b   : > { %450 = vst [vmem:[#allocation2 + $0x150] sm:$0xff] %v5654_v2  ;;  %451 = vst [vmem:[#allocation2 + $0x158] sm:$0xff] %v5654_v2  ;;  %4863 = vmatpush3.bf16.msra.mxu1 %v5575_v12  ;;  %v5829_v63 = vadd.f32 %v5764_v19, %v347_v57  ;;  %v5832_v0 = vadd.f32 %v5764_v19, %v348_v58  ;;  %v5844_v8 = vpack.c.bf16 %v381_v40, %v380_v39  ;;  %v5587_v12 = vld [vmem:[%s6404_s3 + $0x50] sm:$0xff]  }
  0x1c   : > { %452 = vst [vmem:[#allocation2 + $0x160] sm:$0x3] %v5654_v2  ;;  %453 = vst [vmem:[#allocation2 + $0x168] sm:$0xff] %v5654_v2  ;;  %5055 = vmatpush3.bf16.msra.mxu0 %v5576_v13  ;;  %4864 = vmatprep.subr.bf16.mxu1 %v5577_v22  ;;  %v351_v11 = vmul.f32 %v5757_v16, %v312_v6  ;;  %v5857_v13 = vadd.f32 %v5764_v19, %v349_v4  ;;  %v323_v6 = vld [vmem:[%s5744_s26 + $0xc8] sm:$0xff] }
  0x1d   : > { %454 = vst [vmem:[#allocation2 + $0x170] sm:$0xff] %v5654_v2  ;;  %455 = vst [vmem:[#allocation2 + $0x178] sm:$0x3] %v5654_v2  ;;  %5056 = vmatprep.subr.bf16.mxu0 %v5578_v27  ;;  %v352_v15 = vmul.f32 %v5757_v16, %v313_v10  ;;  %v353_v31 = vmul.f32 %v5757_v16, %v314_v26  ;;  %v5892_v33 = vpack.c.bf16 %v385_v55, %v5817_v54 }
  0x1e   : > { %456 = vst [vmem:[#allocation2 + $0x180] sm:$0xff] %v5654_v2  ;;  %457 = vst [vmem:[#allocation2 + $0x188] sm:$0xff] %v5654_v2  ;;  %v5865_v20 = vadd.f32 %v5764_v19, %v351_v11  ;;  %v362_v11 = vmul.f32 %v5757_v16, %v323_v6 }
  0x1f   : > { %458 = vst [vmem:[#allocation2 + $0x190] sm:$0x3] %v5654_v2  ;;  %459 = vst [vmem:[#allocation2 + $0x198] sm:$0xff] %v5654_v2  ;;  %4865 = vmatpush3.bf16.msra.mxu1 %v5577_v22  ;;  %v5898_v35 = vadd.f32 %v5764_v19, %v353_v31  ;;  %v324_v31 = vld [vmem:[%s5744_s26 + $0xd0] sm:$0xff] }
  0x20   : > { %460 = vst [vmem:[#allocation2 + $0x1a0] sm:$0xff] %v5654_v2  ;;  %461 = vst [vmem:[#allocation2 + $0x1a8] sm:$0x3] %v5654_v2  ;;  %5057 = vmatpush3.bf16.msra.mxu0 %v5578_v27  ;;  %4866 = vmatprep.subr.bf16.mxu1 %v5579_v38  ;;  %v311_v2 = vld [vmem:[%s5744_s26 + $0x68] sm:$0xff] }
  0x21   : > { %463 = vst [vmem:[#allocation2 + $0x19] sm:$0xff] %v376_v23  ;;  %464 = vst [vmem:[#allocation2 + $0x21] sm:$0xff] %v377_v24  ;;  %5058 = vmatprep.subr.bf16.mxu0 %v5580_v42  ;;  %v350_v5 = vmul.f32 %v5757_v16, %v311_v2  ;;  %v5871_v23 = vadd.f32 %v5764_v19, %v352_v15  ;;  %v5585_v24 = vld [vmem:[%s6404_s3 + $0x150] sm:$0xff]   ;;  %v315_v27 = vld [vmem:[%s5744_s26 + $0x88] sm:$0xff] }
  0x22   : > { %465 = vst [vmem:[#allocation2 + $0x31] sm:$0xff] %v378_v29  ;;  %466 = vst [vmem:[#allocation2 + $0x39] sm:$0xff] %v379_v30  ;;  %v5885_v29 = vpack.c.bf16 %v5808_v47, %v5800_v43  ;;  %v354_v32 = vmul.f32 %v5757_v16, %v315_v27 }
  0x23   : > { %467 = vst [vmem:[#allocation2 + $0x49] sm:$0xff] %v380_v39  ;;  %468 = vst [vmem:[#allocation2 + $0x51] sm:$0xff] %v381_v40  ;;  %4867 = vmatpush3.bf16.msra.mxu1 %v5579_v38  ;;  %v5860_v14 = vadd.f32 %v5764_v19, %v350_v5  ;;  %v316_v38 = vld [vmem:[%s5744_s26 + $0x90] sm:$0xff]  ;;  %v317_v39 = vld [vmem:[%s5744_s26 + $0x98] sm:$0xff] }
  0x24   : > { %469 = vst [vmem:[#allocation2 + $0x61] sm:$0xff] %v5800_v43  ;;  %470 = vst [vmem:[#allocation2 + $0x69] sm:$0xff] %v5808_v47  ;;  %5059 = vmatpush3.bf16.msra.mxu0 %v5580_v42  ;;  %4900 = vmatprep.subr.bf16.mxu1 %v5581_v46  ;;  %v5901_v36 = vadd.f32 %v5764_v19, %v354_v32  ;;  %v355_v43 = vmul.f32 %v5757_v16, %v316_v38  ;;  %v318_v47 = vld [vmem:[%s5744_s26 + $0xa0] sm:$0xff]  ;;  %v325_v32 = vld [vmem:[%s5744_s26 + $0xd8] sm:$0xff] }
  0x25   : > { %471 = vst [vmem:[#allocation2 + $0x79] sm:$0xff] %v5817_v54  ;;  %472 = vst [vmem:[#allocation2 + $0x81] sm:$0xff] %v385_v55  ;;  %5092 = vmatprep.subr.bf16.mxu0 %v5582_v56  ;;  %v356_v44 = vmul.f32 %v5757_v16, %v317_v39  ;;  %v5593_v54 = vld [vmem:[%s6404_s3 + $0x60] sm:$0xff]   ;;  %v358_v55 = vmul.f32 %v5757_v16, %v319_v48  ;;  %v5597_v38 = vld [vmem:[%s6404_s3 + $0x70] sm:$0xff]   ;;  %v363_v39 = vmul.f32 %v5757_v16, %v324_v31 }
  0x26   : > { %473 = vst [vmem:[#allocation2 + $0x91] sm:$0xff] %v5829_v63  ;;  %474 = vst [vmem:[#allocation2 + $0x99] sm:$0xff] %v5832_v0  ;;  %v937_v45 = vpack.c.bf16 %v5901_v36, %v5898_v35  ;;  %v5924_v50 = vadd.f32 %v5764_v19, %v355_v43  ;;  %v322_v5 = vld [vmem:[%s5744_s26 + $0xc0] sm:$0xff]  ;;  %v5596_v31 = vld [vmem:[%s6404_s3 + $0x188] sm:$0xff]  }
  0x27   : > { %5061 = vmatmul.mubr.bf16.vlgmr.msra.gmra.mrb[0].mxu0 %v5826_v62  ;;  %475 = vst [vmem:[#allocation2 + $0xa9] sm:$0xff] %v5857_v13  ;;  %476 = vst [vmem:[#allocation2 + $0xb1] sm:$0xff] %v5860_v14  ;;  %v5927_v51 = vadd.f32 %v5764_v19, %v356_v44  ;;  %v361_v10 = vmul.f32 %v5757_v16, %v322_v5  ;;  %v326_v44 = vld [vmem:[%s5744_s26 + $0xe0] sm:$0xff]  ;;  %v402_v48 = vadd.f32 %v5764_v19, %v363_v39 }
  0x28   : > { %v529_v52 = vld [vmem:[#allocation2 + $0x18] sm:$0xff]  ;;  %v530_v53 = vld [vmem:[#allocation2 + $0x20] sm:$0xff]  ;;  %5093 = vmatpush3.bf16.msra.mxu0 %v5582_v56  ;;  %5064 = vmatprep.mubr.bf16.mxu0 %v5844_v8  ;;  %477 = vst [vmem:[#allocation2 + $0xc1] sm:$0xff] %v5865_v20  ;;  %478 = vst [vmem:[#allocation2 + $0xc9] sm:$0xff] %v5871_v23  ;;  %v5938_v56 = vpack.c.bf16 %v5832_v0, %v5829_v63 }
  0x29   : > { %v560_v59 = vpack.c.bf16 %v530_v53, %v529_v52  ;;  %v531_v60 = vld [vmem:[#allocation2 + $0x30] sm:$0xff]  ;;  %v532_v61 = vld [vmem:[#allocation2 + $0x38] sm:$0xff]  ;;  %5094 = vmatprep.subr.bf16.mxu0 %v5583_v7  ;;  %479 = vst [vmem:[#allocation2 + $0xd9] sm:$0xff] %v5898_v35  ;;  %480 = vst [vmem:[#allocation2 + $0xe1] sm:$0xff] %v5901_v36  ;;  %v357_v52 = vmul.f32 %v5757_v16, %v318_v47 }
  0x2a   : > { %v5836_v3 = vpack.c.bf16 %v532_v61, %v531_v60  ;;  %v533_v17 = vld [vmem:[#allocation2 + $0x48] sm:$0xff]  ;;  %v534_v18 = vld [vmem:[#allocation2 + $0x50] sm:$0xff]  ;;  %481 = vst [vmem:[#allocation2 + $0xf1] sm:$0xff] %v5924_v50  ;;  %482 = vst [vmem:[#allocation2 + $0xf9] sm:$0xff] %v5927_v51  ;;  %v5951_v60 = vpack.c.bf16 %v5860_v14, %v5857_v13  ;;  %v5954_v61 = vadd.f32 %v5764_v19, %v358_v55 }
  0x2b   : > { %4869 = vmatmul.mubr.bf16.vlgmr.msra.gmra.mrb[0].mxu1 %v560_v59  ;;  %v535_v21 = vld [vmem:[#allocation2 + $0x60] sm:$0xff]  ;;  %v536_v22 = vld [vmem:[#allocation2 + $0x68] sm:$0xff]  ;;  %v5878_v25 = vpack.c.bf16 %v534_v18, %v533_v17  ;;  %v5945_v58 = vadd.f32 %v5764_v19, %v357_v52  ;;  %v938_v59 = vpack.c.bf16 %v5927_v51, %v5924_v50  ;;  %v320_v63 = vld [vmem:[%s5744_s26 + $0xb0] sm:$0xff]  ;;  %v365_v52 = vmul.f32 %v5757_v16, %v326_v44 }
  0x2c   : > { %4901 = vmatpush3.bf16.msra.mxu1 %v5581_v46  ;;  %4872 = vmatprep.mubr.bf16.mxu1 %v5836_v3  ;;  %v5887_v30 = vpack.c.bf16 %v536_v22, %v535_v21  ;;  %v537_v40 = vld [vmem:[#allocation2 + $0x78] sm:$0xff]  ;;  %v538_v41 = vld [vmem:[#allocation2 + $0x80] sm:$0xff]  ;;  %v359_v2 = vmul.f32 %v5757_v16, %v320_v63  ;;  %484 = vst [vmem:[#allocation2 + $0x111] sm:$0xff] %v5954_v61  ;;  %v5591_v13 = vld [vmem:[%s6404_s3 + $0x170] sm:$0xff]  }
  0x2d   : > { %4902 = vmatprep.subr.bf16.mxu1 %v5584_v9  ;;  %5095 = vmatpush3.bf16.msra.mxu0 %v5583_v7  ;;  %v539_v42 = vld [vmem:[#allocation2 + $0x90] sm:$0xff]  ;;  %v540_v46 = vld [vmem:[#allocation2 + $0x98] sm:$0xff]  ;;  %v5930_v53 = vpack.c.bf16 %v538_v41, %v537_v40  ;;  %483 = vst [vmem:[#allocation2 + $0x109] sm:$0xff] %v5945_v58  ;;  %v5986_v22 = vadd.f32 %v5764_v19, %v361_v10  ;;  %v2377_v27 = vld [vmem:[#allocation2 + $0x22] sm:$0xff] }
  0x2e   : > { %5096 = vmatprep.subr.bf16.mxu0 %v5585_v24  ;;  %v5940_v57 = vpack.c.bf16 %v540_v46, %v539_v42  ;;  %v321_v0 = vld [vmem:[%s5744_s26 + $0xb8] sm:$0xff]  ;;  %v541_v7 = vld [vmem:[#allocation2 + $0xa8] sm:$0xff]  ;;  %v5979_v17 = vadd.f32 %v5764_v19, %v359_v2  ;;  %v939_v26 = vpack.c.bf16 %v5954_v61, %v5945_v58  ;;  %v364_v40 = vmul.f32 %v5757_v16, %v325_v32  ;;  %v5622_v51 = vld [vmem:[%s6404_s3 + $0x1f0] sm:$0xff]  }
  0x2f   : > { %5065 = vmatmul.mubr.bf16.gmra.mrb[4].mxu0 %v5885_v29  ;;  %v360_v4 = vmul.f32 %v5757_v16, %v321_v0  ;;  %v543_v14 = vld [vmem:[#allocation2 + $0xc0] sm:$0xff]  ;;  %v544_v21 = vld [vmem:[#allocation2 + $0xc8] sm:$0xff]  ;;  %487 = vst [vmem:[#allocation2 + $0x139] sm:$0xff] %v5986_v22  ;;  %v6012_v42 = vpack.c.bf16 %v5871_v23, %v5865_v20  ;;  %489 = vst [vmem:[#allocation2 + $0x151] sm:$0xff] %v402_v48  ;;  %v404_v23 = vadd.f32 %v5764_v19, %v365_v52 }
  0x30   : > { %4903 = vmatpush3.bf16.msra.mxu1 %v5584_v9  ;;  %5068 = vmatprep.mubr.bf16.mxu0 %v5892_v33  ;;  %v5595_v9 = vld [vmem:[%s6404_s3 + $0x68] sm:$0xff]   ;;  %v2376_v15 = vld [vmem:[#allocation2 + $0x1a] sm:$0xff]  ;;  %485 = vst [vmem:[#allocation2 + $0x121] sm:$0xff] %v5979_v17  ;;  %v6014_v43 = vpack.c.bf16 %v544_v21, %v543_v14  ;;  %v2378_v2 = vld [vmem:[#allocation2 + $0x32] sm:$0xff] }
  0x31   : > { %4904 = vmatprep.subr.bf16.mxu1 %v5587_v12  ;;  %5097 = vmatpush3.bf16.msra.mxu0 %v5585_v24  ;;  %v5982_v18 = vadd.f32 %v5764_v19, %v360_v4  ;;  %v5989_v24 = vadd.f32 %v5764_v19, %v362_v11  ;;  %v327_v46 = vld [vmem:[%s5744_s26 + $0xe8] sm:$0xff]  ;;  %v6018_v47 = vpack.c.bf16 %v2377_v27, %v2376_v15  ;;  %v5599_v55 = vld [vmem:[%s6404_s3 + $0x78] sm:$0xff]   ;;  %v547_v6 = vld [vmem:[#allocation2 + $0xf0] sm:$0xff] }
  0x32   : > { %5098 = vmatprep.subr.bf16.mxu0 %v5586_v34  ;;  %v366_v20 = vmul.f32 %v5757_v16, %v327_v46  ;;  %v545_v0 = vld [vmem:[#allocation2 + $0xd8] sm:$0xff]  ;;  %491 = vst [vmem:[#allocation2 + $0x169] sm:$0xff] %v404_v23  ;;  %v2380_v10 = vld [vmem:[#allocation2 + $0x4a] sm:$0xff]  ;;  %v2382_v32 = vld [vmem:[#allocation2 + $0x62] sm:$0xff] }
  0x33   : > { %4873 = vmatmul.mubr.bf16.gmra.mrb[4].mxu1 %v5878_v25  ;;  %486 = vst [vmem:[#allocation2 + $0x129] sm:$0xff] %v5982_v18  ;;  %488 = vst [vmem:[#allocation2 + $0x141] sm:$0xff] %v5989_v24  ;;  %v2379_v5 = vld [vmem:[#allocation2 + $0x3a] sm:$0xff]  ;;  %v2381_v11 = vld [vmem:[#allocation2 + $0x52] sm:$0xff]  ;;  %v6409_v36 = vpack.c.bf16 %v5989_v24, %v5986_v22 }
  0x34   : > { %4876 = vmatprep.mubr.bf16.mxu1 %v5887_v30  ;;  %4905 = vmatpush3.bf16.msra.mxu1 %v5587_v12  ;;  %v542_v12 = vld [vmem:[#allocation2 + $0xb0] sm:$0xff]  ;;  %v405_v4 = vadd.f32 %v5764_v19, %v366_v20  ;;  %v6050_v15 = vpack.c.bf16 %v2379_v5, %v2378_v2  ;;  %v6054_v27 = vpack.c.bf16 %v2381_v11, %v2380_v10  ;;  %v549_v39 = vld [vmem:[#allocation2 + $0x108] sm:$0xff]  ;;  %v2387_v5 = vld [vmem:[#allocation2 + $0x9a] sm:$0xff] }
  0x35   : > { %4906 = vmatprep.subr.bf16.mxu1 %v5590_v37  ;;  %5099 = vmatpush3.bf16.msra.mxu0 %v5586_v34  ;;  %v940_v34 = vpack.c.bf16 %v5982_v18, %v5979_v17  ;;  %v5598_v52 = vld [vmem:[%s6404_s3 + $0x190] sm:$0xff]   ;;  %v2395_v41 = vld [vmem:[#allocation2 + $0xfa] sm:$0xff] }
  0x36   : > { %5100 = vmatprep.subr.bf16.mxu0 %v5588_v49  ;;  %492 = vst [vmem:[#allocation2 + $0x171] sm:$0xff] %v405_v4  ;;  %v2388_v10 = vld [vmem:[#allocation2 + $0xaa] sm:$0xff]  ;;  %v2389_v11 = vld [vmem:[#allocation2 + $0xb2] sm:$0xff]  ;;  %v5626_v58 = vld [vmem:[%s6404_s3 + $0x200] sm:$0xff]  }
  0x37   : > { %5069 = vmatmul.mubr.bf16.gmra.mrb[8].mxu0 %v5938_v56  ;;  %v551_v44 = vld [vmem:[#allocation2 + $0x120] sm:$0xff]  ;;  %v5616_v35 = vld [vmem:[%s6404_s3 + $0x1d8] sm:$0xff]   ;;  %v1267_v50 = vld [vmem:[#allocation2 + $0xa] sm:$0xff] }
  0x38   : > { %4907 = vmatpush3.bf16.msra.mxu1 %v5590_v37  ;;  %5072 = vmatprep.mubr.bf16.mxu0 %v5951_v60  ;;  %v5999_v37 = vpack.c.bf16 %v542_v12, %v541_v7  ;;  %v548_v7 = vld [vmem:[#allocation2 + $0xf8] sm:$0xff]  ;;  %v6041_v12 = vpack.c.bf16 %v405_v4, %v404_v23  ;;  %v5625_v22 = vld [vmem:[%s6404_s3 + $0xe0] sm:$0xff]  }
  0x39   : > { %4908 = vmatprep.subr.bf16.mxu1 %v5593_v54  ;;  %5101 = vmatpush3.bf16.msra.mxu0 %v5588_v49  ;;  %v403_v49 = vadd.f32 %v5764_v19, %v364_v40  ;;  %v6052_v21 = vpack.c.bf16 %v548_v7, %v547_v6  ;;  %v550_v40 = vld [vmem:[#allocation2 + $0x110] sm:$0xff]  ;;  %v329_v7 = vld [vmem:[%s5744_s26 + $0xf8] sm:$0xff] }
  0x3a   : > { %5102 = vmatprep.subr.bf16.mxu0 %v5589_v1  ;;  %v552_v46 = vld [vmem:[#allocation2 + $0x128] sm:$0xff]  ;;  %v554_v2 = vld [vmem:[#allocation2 + $0x140] sm:$0xff]  ;;  %v2386_v4 = vld [vmem:[#allocation2 + $0x92] sm:$0xff] }
  0x3b   : > { %4877 = vmatmul.mubr.bf16.gmra.mrb[8].mxu1 %v5930_v53  ;;  %490 = vst [vmem:[#allocation2 + $0x159] sm:$0xff] %v403_v49  ;;  %v6032_v63 = vpack.c.bf16 %v403_v49, %v402_v48  ;;  %v2384_v48 = vld [vmem:[#allocation2 + $0x7a] sm:$0xff]  ;;  %v2385_v49 = vld [vmem:[#allocation2 + $0x82] sm:$0xff]  ;;  %v6071_v23 = vpack.c.bf16 %v552_v46, %v551_v44  ;;  %v328_v6 = vld [vmem:[%s5744_s26 + $0xf0] sm:$0xff] }
  0x3c   : > { %4880 = vmatprep.mubr.bf16.mxu1 %v5940_v57  ;;  %4909 = vmatpush3.bf16.msra.mxu1 %v5593_v54  ;;  %v5592_v54 = vld [vmem:[%s6404_s3 + $0x178] sm:$0xff]  }
  0x3d   : > { %4910 = vmatprep.subr.bf16.mxu1 %v5595_v9  ;;  %5103 = vmatpush3.bf16.msra.mxu0 %v5589_v1  ;;  %v546_v1 = vld [vmem:[#allocation2 + $0xe0] sm:$0xff]  ;;  %v5623_v61 = vld [vmem:[%s6404_s3 + $0xd8] sm:$0xff]  }
  0x3e   : > { %5104 = vmatprep.subr.bf16.mxu0 %v5591_v13  ;;  %v6043_v14 = vpack.c.bf16 %v546_v1, %v545_v0  ;;  %v5600_v0 = vld [vmem:[%s6404_s3 + $0x198] sm:$0xff]  }
  0x3f   : > { %5073 = vmatmul.mubr.bf16.gmra.mrb[12].mxu0 %v6012_v42  ;;  %v553_v1 = vld [vmem:[#allocation2 + $0x138] sm:$0xff] }
  0x40   : > { %4911 = vmatpush3.bf16.msra.mxu1 %v5595_v9  ;;  %5108 = vmatprep.mubr.bf16.mxu0 %v6018_v47  ;;  %v5594_v9 = vld [vmem:[%s6404_s3 + $0x180] sm:$0xff]   ;;  %v6095_v46 = vpack.c.bf16 %v554_v2, %v553_v1  ;;  %v2391_v2 = vld [vmem:[#allocation2 + $0xca] sm:$0xff] }
  0x41   : > { %4912 = vmatprep.subr.bf16.mxu1 %v5597_v38  ;;  %5105 = vmatpush3.bf16.msra.mxu0 %v5591_v13  ;;  %v6048_v13 = vld [vmem:[%s6404_s3 + $0x80] sm:$0xff]  }
  0x42   : > { %5106 = vmatprep.subr.bf16.mxu0 %v5592_v54  ;;  %v2390_v1 = vld [vmem:[#allocation2 + $0xc2] sm:$0xff] }
  0x43   : > { %4881 = vmatmul.mubr.bf16.gmra.mrb[12].mxu1 %v5999_v37 }
  0x44   : > { %4884 = vmatprep.mubr.bf16.mxu1 %v6014_v43  ;;  %4913 = vmatpush3.bf16.msra.mxu1 %v5597_v38  ;;  %v2383_v38 = vld [vmem:[#allocation2 + $0x6a] sm:$0xff] }
  0x45   : > { %4914 = vmatprep.subr.bf16.mxu1 %v5599_v55  ;;  %5107 = vmatpush3.bf16.msra.mxu0 %v5592_v54  ;;  %v6067_v54 = vpack.c.bf16 %v550_v40, %v549_v39  ;;  %v6069_v20 = vpack.c.bf16 %v2383_v38, %v2382_v32  ;;  %v368_v32 = vmul.f32 %v5757_v16, %v329_v7  ;;  %v556_v38 = vld [vmem:[#allocation2 + $0x158] sm:$0xff]  ;;  %v5602_v39 = vld [vmem:[%s6404_s3 + $0x1a0] sm:$0xff]  }
  0x46   : > { %5140 = vmatprep.subr.bf16.mxu0 %v5594_v9  ;;  %v2393_v7 = vld [vmem:[#allocation2 + $0xe2] sm:$0xff] }
  0x47   : > { %v6093_v44 = vadd.f32 %v5764_v19, %v368_v32 }
  0x48   : > { %4915 = vmatpush3.bf16.msra.mxu1 %v5599_v55  ;;  %5109 = vmatmul.mubr.bf16.vlgmr.msra.gmra.mrb[0].mxu0 %v6050_v15  ;;  %v6073_v55 = vpack.c.bf16 %v2385_v49, %v2384_v48  ;;  %v6097_v48 = vpack.c.bf16 %v2387_v5, %v2386_v4  ;;  %v6103_v49 = vpack.c.bf16 %v2389_v11, %v2388_v10  ;;  %v896_v4 = vld [vmem:[#allocation2 + $0x1] sm:$0xff]  ;;  %v897_v5 = vld [vmem:[#allocation2 + $0x9] sm:$0xff] }
  0x49   : > { %4948 = vmatprep.subr.bf16.mxu1 %v6048_v13  ;;  %5141 = vmatpush3.bf16.msra.mxu0 %v5594_v9  ;;  %v555_v9 = vld [vmem:[#allocation2 + $0x150] sm:$0xff]  ;;  %494 = vst [vmem:[#allocation2 + $0x189] sm:$0xff] %v6093_v44  ;;  %v6117_v11 = vpack.c.bf16 %v2391_v2, %v2390_v1 }
  0x4a   : > { %5112 = vmatprep.mubr.bf16.mxu0 %v6054_v27  ;;  %5142 = vmatprep.subr.bf16.mxu0 %v5596_v31  ;;  %v2397_v1 = vld [vmem:[#allocation2 + $0x112] sm:$0xff] }
  0x4b   : > { %4885 = vmatmul.mubr.bf16.gmra.mrb[16].mxu1 %v6043_v14 }
  0x4c   : > { %4888 = vmatprep.mubr.bf16.mxu1 %v6052_v21 }
  0x4d   : > { %5143 = vmatpush3.bf16.msra.mxu0 %v5596_v31  ;;  %v367_v31 = vmul.f32 %v5757_v16, %v328_v6  ;;  %v6099_v16 = vpack.c.bf16 %v556_v38, %v555_v9  ;;  %v558_v6 = vld [vmem:[#allocation2 + $0x170] sm:$0xff]  ;;  %v5608_v38 = vld [vmem:[%s6404_s3 + $0x1b8] sm:$0xff]  }
  0x4e   : > { %5144 = vmatprep.subr.bf16.mxu0 %v5598_v52  ;;  %v5606_v9 = vld [vmem:[%s6404_s3 + $0x1b0] sm:$0xff]  }
  0x4f   : > { %v6090_v40 = vadd.f32 %v5764_v19, %v367_v31  ;;  %v557_v19 = vld [vmem:[#allocation2 + $0x168] sm:$0xff]  ;;  %v928_v31 = vpack.c.bf16 %v897_v5, %v896_v4 }
  0x50   : > { %5113 = vmatmul.mubr.bf16.gmra.mrb[4].mxu0 %v6069_v20  ;;  %v6115_v10 = vpack.c.bf16 %v558_v6, %v557_v19  ;;  %v2396_v19 = vld [vmem:[#allocation2 + $0x10a] sm:$0xff]  ;;  %v2398_v6 = vld [vmem:[#allocation2 + $0x122] sm:$0xff] }
  0x51   : > { %5116 = vmatprep.mubr.bf16.mxu0 %v6073_v55  ;;  %5145 = vmatpush3.bf16.msra.mxu0 %v5598_v52  ;;  %493 = vst [vmem:[#allocation2 + $0x181] sm:$0xff] %v6090_v40  ;;  %v5604_v52 = vld [vmem:[%s6404_s3 + $0x1a8] sm:$0xff]   ;;  %v6134_v4 = vpack.c.bf16 %v2397_v1, %v2396_v19  ;;  %v2405_v19 = vld [vmem:[#allocation2 + $0x172] sm:$0xff]  ;;  %v5609_v1 = vld [vmem:[%s6404_s3 + $0xa0] sm:$0xff]  }
  0x52   : > { %5146 = vmatprep.subr.bf16.mxu0 %v5600_v0  ;;  %v5603_v5 = vld [vmem:[%s6404_s3 + $0x88] sm:$0xff]  }
  0x53   : > { %4889 = vmatmul.mubr.bf16.gmra.mrb[20].mxu1 %v6067_v54 }
  0x54   : > { %4892 = vmatprep.mubr.bf16.mxu1 %v6071_v23 }
  0x55   : > { %5147 = vmatpush3.bf16.msra.mxu0 %v5600_v0  ;;  %v2392_v0 = vld [vmem:[#allocation2 + $0xda] sm:$0xff] }
  0x56   : > { %5148 = vmatprep.subr.bf16.mxu0 %v5602_v39  ;;  %v6119_v32 = vpack.c.bf16 %v2393_v7, %v2392_v0  ;;  %v2399_v0 = vld [vmem:[#allocation2 + $0x12a] sm:$0xff] }
  0x57   : > { %v5605_v7 = vld [vmem:[%s6404_s3 + $0x90] sm:$0xff]  }
  0x58   : > { %5117 = vmatmul.mubr.bf16.gmra.mrb[8].mxu0 %v6097_v48  ;;  %v2775_v17 = vld [vmem:[#allocation2 + $0x180] sm:$0xff]  ;;  %v2776_v18 = vld [vmem:[#allocation2 + $0x188] sm:$0xff] }
  0x59   : > { %5120 = vmatprep.mubr.bf16.mxu0 %v6103_v49  ;;  %5149 = vmatpush3.bf16.msra.mxu0 %v5602_v39  ;;  %v2394_v39 = vld [vmem:[#allocation2 + $0xf2] sm:$0xff]  ;;  %v6257_v24 = vpack.c.bf16 %v2776_v18, %v2775_v17  ;;  %v1642_v17 = vld [vmem:[#allocation2 + $0x60] sm:$0xff]  ;;  %v1643_v18 = vld [vmem:[#allocation2 + $0x68] sm:$0xff] }
  0x5a   : > { %5150 = vmatprep.subr.bf16.mxu0 %v5604_v52  ;;  %v6132_v2 = vpack.c.bf16 %v2395_v41, %v2394_v39  ;;  %v2400_v41 = vld [vmem:[#allocation2 + $0x13a] sm:$0xff]  ;;  %v2404_v39 = vld [vmem:[#allocation2 + $0x16a] sm:$0xff] }
  0x5b   : > { %4893 = vmatmul.mubr.bf16.gmra.mrb[24].mxu1 %v6095_v46 }
  0x5c   : > { %4896 = vmatprep.mubr.bf16.mxu1 %v6099_v16 }
  0x5d   : > { %5151 = vmatpush3.bf16.msra.mxu0 %v5604_v52  ;;  %v6130_v52 = vld [vmem:[%s6404_s3 + $0x1c0] sm:$0xff]  }
  0x5e   : > { %5152 = vmatprep.subr.bf16.mxu0 %v5606_v9 }
  0x60   : > { %5121 = vmatmul.mubr.bf16.gmra.mrb[12].mxu0 %v6117_v11 }
  0x61   : > { %5124 = vmatprep.mubr.bf16.mxu0 %v6119_v32  ;;  %5153 = vmatpush3.bf16.msra.mxu0 %v5606_v9  ;;  %v2401_v9 = vld [vmem:[#allocation2 + $0x142] sm:$0xff] }
  0x62   : > { %5154 = vmatprep.subr.bf16.mxu0 %v5608_v38 }
  0x63   : > { %4897 = vmatmul.mubr.bf16.gmra.mrb[28].mxu1 %v6115_v10 }
  0x64   : > { %4916 = vmatprep.mubr.bf16.mxu1 %v928_v31  ;;  %v6148_v31 = vpack.c.bf16 %v2399_v0, %v2398_v6  ;;  %v6164_v6 = vpack.c.bf16 %v2405_v19, %v2404_v39  ;;  %v3163_v0 = vpack.c.bf16 %v6093_v44, %v6090_v40  ;;  %v3128_v39 = vld [vmem:[#allocation2 + $0xb1] sm:$0xff]  ;;  %v3129_v19 = vld [vmem:[#allocation2 + $0xc1] sm:$0xff] }
  0x65   : > { %5155 = vmatpush3.bf16.msra.mxu0 %v5608_v38  ;;  %v2403_v38 = vld [vmem:[#allocation2 + $0x15a] sm:$0xff]  ;;  %v5644_v40 = vld [vmem:[%s6404_s3 + $0x130] sm:$0xff]  }
  0x66   : > { %5188 = vmatprep.subr.bf16.mxu0 %v6130_v52  ;;  %v1654_v44 = vld [vmem:[#allocation2 + $0xf0] sm:$0xff] }
  0x68   : > { %5125 = vmatmul.mubr.bf16.gmra.mrb[16].mxu0 %v6132_v2 }
  0x69   : > { %5128 = vmatprep.mubr.bf16.mxu0 %v6134_v4 }
  0x6b   : > { %4917 = vmatmul.mubr.bf16.vlgmr.msra.gmra.mrb[0].mxu1 %v5778_v28  ;;  %v6150_v28 = vpack.c.bf16 %v2401_v9, %v2400_v41  ;;  %v2407_v41 = vld [vmem:[#allocation2 + $0x18a] sm:$0xff] }
  0x6c   : > { %4949 = vmatpush3.bf16.msra.mxu1 %v6048_v13  ;;  %4920 = vmatprep.mubr.bf16.mxu1 %v5826_v62  ;;  %v5607_v13 = vld [vmem:[%s6404_s3 + $0x98] sm:$0xff]  }
  0x6d   : > { %4950 = vmatprep.subr.bf16.mxu1 %v5603_v5  ;;  %v2402_v62 = vld [vmem:[#allocation2 + $0x152] sm:$0xff] }
  0x70   : > { %4951 = vmatpush3.bf16.msra.mxu1 %v5603_v5  ;;  %5129 = vmatmul.mubr.bf16.gmra.mrb[20].mxu0 %v6148_v31  ;;  %v6162_v5 = vpack.c.bf16 %v2403_v38, %v2402_v62 }
  0x71   : > { %4952 = vmatprep.subr.bf16.mxu1 %v5605_v7  ;;  %5132 = vmatprep.mubr.bf16.mxu0 %v6150_v28 }
  0x73   : > { %4921 = vmatmul.mubr.bf16.gmra.mrb[4].mxu1 %v5844_v8  ;;  %v5611_v8 = vld [vmem:[%s6404_s3 + $0xa8] sm:$0xff]  }
  0x74   : > { %4924 = vmatprep.mubr.bf16.mxu1 %v5885_v29  ;;  %4953 = vmatpush3.bf16.msra.mxu1 %v5605_v7  ;;  %v2406_v29 = vld [vmem:[#allocation2 + $0x182] sm:$0xff]  ;;  %v5613_v7 = vld [vmem:[%s6404_s3 + $0xb0] sm:$0xff]  }
  0x75   : > { %4954 = vmatprep.subr.bf16.mxu1 %v5607_v13  ;;  %v2423_v9 = vpack.c.bf16 %v2407_v41, %v2406_v29 }
  0x78   : > { %4955 = vmatpush3.bf16.msra.mxu1 %v5607_v13  ;;  %5133 = vmatmul.mubr.bf16.gmra.mrb[24].mxu0 %v6162_v5  ;;  %v5612_v13 = vld [vmem:[%s6404_s3 + $0x1c8] sm:$0xff]  }
  0x79   : > { %4956 = vmatprep.subr.bf16.mxu1 %v5609_v1  ;;  %5136 = vmatprep.mubr.bf16.mxu0 %v6164_v6 }
  0x7b   : > { %4925 = vmatmul.mubr.bf16.gmra.mrb[8].mxu1 %v5892_v33  ;;  %v5615_v33 = vld [vmem:[%s6404_s3 + $0xb8] sm:$0xff]  }
  0x7c   : > { %4928 = vmatprep.mubr.bf16.mxu1 %v5938_v56  ;;  %4957 = vmatpush3.bf16.msra.mxu1 %v5609_v1  ;;  %v5617_v56 = vld [vmem:[%s6404_s3 + $0xc0] sm:$0xff]   ;;  %v3130_v1 = vld [vmem:[#allocation2 + $0xc9] sm:$0xff] }
  0x7d   : > { %4958 = vmatprep.subr.bf16.mxu1 %v5611_v8  ;;  %v3155_v41 = vpack.c.bf16 %v3130_v1, %v3129_v19  ;;  %v3489_v1 = vld [vmem:[#allocation2 + $0x4a] sm:$0xff] }
  0x80   : > { %4959 = vmatpush3.bf16.msra.mxu1 %v5611_v8  ;;  %5137 = vmatmul.mubr.bf16.gmra.mrb[28].mxu0 %v2423_v9  ;;  %v5633_v8 = vld [vmem:[%s6404_s3 + $0x220] sm:$0xff]   ;;  %v1636_v9 = vld [vmem:[#allocation2 + $0x18] sm:$0xff] }
  0x81   : > { %4960 = vmatprep.subr.bf16.mxu1 %v5613_v7  ;;  %5156 = vmatprep.mubr.bf16.mxu0 %v5836_v3  ;;  %v5614_v3 = vld [vmem:[%s6404_s3 + $0x1d0] sm:$0xff]  }
  0x83   : > { %4929 = vmatmul.mubr.bf16.gmra.mrb[12].mxu1 %v5951_v60  ;;  %v5621_v60 = vld [vmem:[%s6404_s3 + $0xd0] sm:$0xff]  }
  0x84   : > { %4932 = vmatprep.mubr.bf16.mxu1 %v6012_v42  ;;  %4961 = vmatpush3.bf16.msra.mxu1 %v5613_v7  ;;  %v5629_v42 = vld [vmem:[%s6404_s3 + $0xf0] sm:$0xff]   ;;  %v3132_v7 = vld [vmem:[#allocation2 + $0xe1] sm:$0xff] }
  0x85   : > { %4962 = vmatprep.subr.bf16.mxu1 %v5615_v33 }
  0x88   : > { %4963 = vmatpush3.bf16.msra.mxu1 %v5615_v33  ;;  %5157 = vmatmul.mubr.bf16.vlgmr.msra.gmra.mrb[0].mxu0 %v5878_v25  ;;  %v5618_v25 = vld [vmem:[%s6404_s3 + $0x1e0] sm:$0xff]  }
  0x89   : > { %4996 = vmatprep.subr.bf16.mxu1 %v5617_v56  ;;  %5189 = vmatpush3.bf16.msra.mxu0 %v6130_v52  ;;  %v5630_v52 = vld [vmem:[%s6404_s3 + $0x210] sm:$0xff]   ;;  %v1637_v33 = vld [vmem:[#allocation2 + $0x20] sm:$0xff] }
  0x8a   : > { %5160 = vmatprep.mubr.bf16.mxu0 %v5887_v30  ;;  %5190 = vmatprep.subr.bf16.mxu0 %v5612_v13  ;;  %v5620_v30 = vld [vmem:[%s6404_s3 + $0x1e8] sm:$0xff]  }
  0x8b   : > { %4933 = vmatmul.mubr.bf16.gmra.mrb[16].mxu1 %v937_v45  ;;  %v1266_v45 = vld [vmem:[#allocation2 + $0x2] sm:$0xff] }
  0x8c   : > { %4936 = vmatprep.mubr.bf16.mxu1 %v938_v59  ;;  %v5619_v59 = vld [vmem:[%s6404_s3 + $0xc8] sm:$0xff]  }
  0x8d   : > { %5191 = vmatpush3.bf16.msra.mxu0 %v5612_v13  ;;  %v3134_v13 = vld [vmem:[#allocation2 + $0xf9] sm:$0xff] }
  0x8e   : > { %5192 = vmatprep.subr.bf16.mxu0 %v5614_v3 }
  0x90   : > { %5161 = vmatmul.mubr.bf16.gmra.mrb[4].mxu0 %v5930_v53  ;;  %v1298_v53 = vpack.c.bf16 %v1267_v50, %v1266_v45  ;;  %v3135_v45 = vld [vmem:[#allocation2 + $0x109] sm:$0xff]  ;;  %v3136_v50 = vld [vmem:[#allocation2 + $0x111] sm:$0xff] }
  0x91   : > { %5164 = vmatprep.mubr.bf16.mxu0 %v5940_v57  ;;  %5193 = vmatpush3.bf16.msra.mxu0 %v5614_v3  ;;  %v5624_v57 = vld [vmem:[%s6404_s3 + $0x1f8] sm:$0xff]   ;;  %v5635_v3 = vld [vmem:[%s6404_s3 + $0x230] sm:$0xff]  }
  0x92   : > { %5194 = vmatprep.subr.bf16.mxu0 %v5616_v35 }
  0x93   : > { %4937 = vmatmul.mubr.bf16.gmra.mrb[20].mxu1 %v939_v26  ;;  %v5627_v26 = vld [vmem:[%s6404_s3 + $0xe8] sm:$0xff]  }
  0x94   : > { %4940 = vmatprep.mubr.bf16.mxu1 %v940_v34  ;;  %v3117_v34 = vld [vmem:[#allocation2 + $0x31] sm:$0xff] }
  0x95   : > { %5195 = vmatpush3.bf16.msra.mxu0 %v5616_v35 }
  0x96   : > { %5196 = vmatprep.subr.bf16.mxu0 %v5618_v25 }
  0x98   : > { %5165 = vmatmul.mubr.bf16.gmra.mrb[8].mxu0 %v5999_v37  ;;  %v3118_v37 = vld [vmem:[#allocation2 + $0x39] sm:$0xff] }
  0x99   : > { %5168 = vmatprep.mubr.bf16.mxu0 %v6014_v43  ;;  %5197 = vmatpush3.bf16.msra.mxu0 %v5618_v25  ;;  %v5637_v43 = vld [vmem:[#allocation2] sm:$0xff]  ;;  %v1668_v25 = vpack.c.bf16 %v1637_v33, %v1636_v9 }
  0x9a   : > { %5198 = vmatprep.subr.bf16.mxu0 %v5620_v30 }
  0x9b   : > { %4941 = vmatmul.mubr.bf16.gmra.mrb[24].mxu1 %v6409_v36  ;;  %v1639_v36 = vld [vmem:[#allocation2 + $0x38] sm:$0xff] }
  0x9c   : > { %4944 = vmatprep.mubr.bf16.mxu1 %v6032_v63 }
  0x9d   : > { %5199 = vmatpush3.bf16.msra.mxu0 %v5620_v30  ;;  %v1638_v30 = vld [vmem:[#allocation2 + $0x30] sm:$0xff] }
  0x9e   : > { %5200 = vmatprep.subr.bf16.mxu0 %v5622_v51 }
  0xa0   : > { %5169 = vmatmul.mubr.bf16.gmra.mrb[12].mxu0 %v6043_v14  ;;  %v3149_v14 = vpack.c.bf16 %v3118_v37, %v3117_v34  ;;  %v1644_v34 = vld [vmem:[#allocation2 + $0x78] sm:$0xff]  ;;  %v1645_v37 = vld [vmem:[#allocation2 + $0x80] sm:$0xff] }
  0xa1   : > { %5172 = vmatprep.mubr.bf16.mxu0 %v6052_v21  ;;  %5201 = vmatpush3.bf16.msra.mxu0 %v5622_v51  ;;  %v3119_v21 = vld [vmem:[#allocation2 + $0x49] sm:$0xff] }
  0xa2   : > { %5202 = vmatprep.subr.bf16.mxu0 %v5624_v57  ;;  %v1640_v51 = vld [vmem:[#allocation2 + $0x48] sm:$0xff] }
  0xa3   : > { %4945 = vmatmul.mubr.bf16.gmra.mrb[28].mxu1 %v6041_v12 }
  0xa4   : > { %4964 = vmatprep.mubr.bf16.mxu1 %v1298_v53  ;;  %v1641_v53 = vld [vmem:[#allocation2 + $0x50] sm:$0xff] }
  0xa5   : > { %5203 = vmatpush3.bf16.msra.mxu0 %v5624_v57  ;;  %v3137_v57 = vld [vmem:[#allocation2 + $0x121] sm:$0xff] }
  0xa6   : > { %5236 = vmatprep.subr.bf16.mxu0 %v5626_v58 }
  0xa8   : > { %5173 = vmatmul.mubr.bf16.gmra.mrb[16].mxu0 %v6067_v54  ;;  %v3121_v54 = vld [vmem:[#allocation2 + $0x61] sm:$0xff] }
  0xa9   : > { %5176 = vmatprep.mubr.bf16.mxu0 %v6071_v23 }
  0xab   : > { %4965 = vmatmul.mubr.bf16.vlgmr.msra.gmra.mrb[0].mxu1 %v6018_v47  ;;  %v2794_v47 = vpack.c.bf16 %v5637_v43, %v5637_v43  ;;  %v1671_v43 = vpack.c.bf16 %v1643_v18, %v1642_v17  ;;  %v1663_v17 = vld [vmem:[#allocation2 + $0x158] sm:$0xff]  ;;  %v3497_v18 = vld [vmem:[#allocation2 + $0xaa] sm:$0xff] }
  0xac   : > { %4997 = vmatpush3.bf16.msra.mxu1 %v5617_v56  ;;  %4968 = vmatprep.mubr.bf16.mxu1 %v6050_v15  ;;  %v5631_v15 = vld [vmem:[%s6404_s3 + $0xf8] sm:$0xff]  }
  0xad   : > { %4998 = vmatprep.subr.bf16.mxu1 %v5619_v59  ;;  %v3133_v56 = vld [vmem:[#allocation2 + $0xf1] sm:$0xff] }
  0xb0   : > { %4999 = vmatpush3.bf16.msra.mxu1 %v5619_v59  ;;  %5177 = vmatmul.mubr.bf16.gmra.mrb[20].mxu0 %v6095_v46  ;;  %v5628_v46 = vld [vmem:[%s6404_s3 + $0x208] sm:$0xff]   ;;  %v1669_v59 = vpack.c.bf16 %v1639_v36, %v1638_v30  ;;  %v1660_v36 = vld [vmem:[#allocation2 + $0x138] sm:$0xff] }
  0xb1   : > { %5000 = vmatprep.subr.bf16.mxu1 %v5621_v60  ;;  %5180 = vmatprep.mubr.bf16.mxu0 %v6099_v16  ;;  %v3123_v16 = vld [vmem:[#allocation2 + $0x79] sm:$0xff]  ;;  %v3494_v30 = vld [vmem:[#allocation2 + $0x82] sm:$0xff] }
  0xb3   : > { %4969 = vmatmul.mubr.bf16.gmra.mrb[4].mxu1 %v6054_v27  ;;  %v3120_v27 = vld [vmem:[#allocation2 + $0x51] sm:$0xff] }
  0xb4   : > { %4972 = vmatprep.mubr.bf16.mxu1 %v6069_v20  ;;  %5001 = vmatpush3.bf16.msra.mxu1 %v5621_v60  ;;  %v3122_v20 = vld [vmem:[#allocation2 + $0x69] sm:$0xff]  ;;  %v3150_v23 = vpack.c.bf16 %v3120_v27, %v3119_v21  ;;  %v6314_v60 = vpack.c.bf16 %v3136_v50, %v3135_v45  ;;  %v1647_v27 = vld [vmem:[#allocation2 + $0x98] sm:$0xff]  ;;  %v1661_v45 = vld [vmem:[#allocation2 + $0x140] sm:$0xff] }
  0xb5   : > { %5002 = vmatprep.subr.bf16.mxu1 %v5623_v61  ;;  %v1646_v21 = vld [vmem:[#allocation2 + $0x90] sm:$0xff] }
  0xb6   : > { %v3495_v50 = vld [vmem:[#allocation2 + $0x92] sm:$0xff] }
  0xb8   : > { %5003 = vmatpush3.bf16.msra.mxu1 %v5623_v61  ;;  %5181 = vmatmul.mubr.bf16.gmra.mrb[24].mxu0 %v6115_v10  ;;  %v3125_v10 = vld [vmem:[#allocation2 + $0x91] sm:$0xff]  ;;  %v1670_v61 = vpack.c.bf16 %v1641_v53, %v1640_v51  ;;  %v3496_v51 = vld [vmem:[#allocation2 + $0x9a] sm:$0xff] }
  0xb9   : > { %5004 = vmatprep.subr.bf16.mxu1 %v5625_v22  ;;  %5184 = vmatprep.mubr.bf16.mxu0 %v6257_v24 }
  0xbb   : > { %4973 = vmatmul.mubr.bf16.gmra.mrb[8].mxu1 %v6073_v55  ;;  %v3151_v55 = vpack.c.bf16 %v3122_v20, %v3121_v54  ;;  %v1648_v54 = vld [vmem:[#allocation2 + $0xa8] sm:$0xff]  ;;  %v1649_v20 = vld [vmem:[#allocation2 + $0xb0] sm:$0xff] }
  0xbc   : > { %4976 = vmatprep.mubr.bf16.mxu1 %v6097_v48  ;;  %5005 = vmatpush3.bf16.msra.mxu1 %v5625_v22  ;;  %v6280_v48 = vld [vmem:[%s6404_s3 + $0x100] sm:$0xff]  }
  0xbd   : > { %5006 = vmatprep.subr.bf16.mxu1 %v5627_v26  ;;  %v3139_v22 = vld [vmem:[#allocation2 + $0x139] sm:$0xff] }
  0xc0   : > { %5007 = vmatpush3.bf16.msra.mxu1 %v5627_v26  ;;  %5185 = vmatmul.mubr.bf16.gmra.mrb[28].mxu0 %v2794_v47  ;;  %v3140_v26 = vld [vmem:[#allocation2 + $0x141] sm:$0xff] }
  0xc1   : > { %5008 = vmatprep.subr.bf16.mxu1 %v5629_v42  ;;  %5204 = vmatprep.mubr.bf16.mxu0 %v3149_v14  ;;  %v6324_v47 = vpack.c.bf16 %v3140_v26, %v3139_v22  ;;  %v1672_v14 = vpack.c.bf16 %v1645_v37, %v1644_v34  ;;  %v3498_v22 = vld [vmem:[#allocation2 + $0xb2] sm:$0xff]  ;;  %v1664_v26 = vld [vmem:[#allocation2 + $0x168] sm:$0xff] }
  0xc2   : > { %v1665_v34 = vld [vmem:[#allocation2 + $0x170] sm:$0xff]  ;;  %v3499_v37 = vld [vmem:[#allocation2 + $0xc2] sm:$0xff] }
  0xc3   : > { %4977 = vmatmul.mubr.bf16.gmra.mrb[12].mxu1 %v6103_v49  ;;  %v3124_v49 = vld [vmem:[#allocation2 + $0x81] sm:$0xff] }
  0xc4   : > { %4980 = vmatprep.mubr.bf16.mxu1 %v6117_v11  ;;  %5009 = vmatpush3.bf16.msra.mxu1 %v5629_v42  ;;  %v3126_v11 = vld [vmem:[#allocation2 + $0x99] sm:$0xff]  ;;  %v3152_v62 = vpack.c.bf16 %v3124_v49, %v3123_v16  ;;  %v5639_v42 = vld [vmem:[%s6404_s3 + $0x108] sm:$0xff]  }
  0xc5   : > { %5010 = vmatprep.subr.bf16.mxu1 %v5631_v15  ;;  %v3153_v38 = vpack.c.bf16 %v3126_v11, %v3125_v10  ;;  %v1651_v16 = vld [vmem:[#allocation2 + $0xc8] sm:$0xff]  ;;  %v3147_v49 = vld [vmem:[#allocation2 + $0x199] sm:$0xff] }
  0xc6   : > { %v3148_v10 = vld [vmem:[#allocation2 + $0x1a1] sm:$0xff]  ;;  %v1652_v11 = vld [vmem:[#allocation2 + $0xd8] sm:$0xff] }
  0xc8   : > { %5011 = vmatpush3.bf16.msra.mxu1 %v5631_v15  ;;  %5205 = vmatmul.mubr.bf16.vlgmr.msra.gmra.mrb[0].mxu0 %v3150_v23  ;;  %v5640_v15 = vld [vmem:[%s6404_s3 + $0x110] sm:$0xff]   ;;  %v5641_v23 = vld [vmem:[%s6404_s3 + $0x118] sm:$0xff]  }
  0xc9   : > { %5284 = vmatprep.subr.bf16.mxu1 %v6280_v48  ;;  %5237 = vmatpush3.bf16.msra.mxu0 %v5626_v58  ;;  %v3138_v58 = vld [vmem:[#allocation2 + $0x129] sm:$0xff] }
  0xca   : > { %5208 = vmatprep.mubr.bf16.mxu0 %v3151_v55  ;;  %5238 = vmatprep.subr.bf16.mxu0 %v5628_v46  ;;  %v1673_v55 = vpack.c.bf16 %v1647_v27, %v1646_v21  ;;  %v3501_v27 = vld [vmem:[#allocation2 + $0xda] sm:$0xff] }
  0xcb   : > { %4981 = vmatmul.mubr.bf16.gmra.mrb[16].mxu1 %v6119_v32  ;;  %v5632_v32 = vld [vmem:[%s6404_s3 + $0x218] sm:$0xff]  }
  0xcc   : > { %4984 = vmatprep.mubr.bf16.mxu1 %v6132_v2  ;;  %v3127_v2 = vld [vmem:[#allocation2 + $0xa9] sm:$0xff] }
  0xcd   : > { %5239 = vmatpush3.bf16.msra.mxu0 %v5628_v46  ;;  %v3154_v29 = vpack.c.bf16 %v3128_v39, %v3127_v2  ;;  %v1674_v46 = vpack.c.bf16 %v1649_v20, %v1648_v54  ;;  %v3164_v2 = vpack.c.bf16 %v3148_v10, %v3147_v49  ;;  %v3502_v54 = vld [vmem:[#allocation2 + $0xe2] sm:$0xff]  ;;  %v3503_v20 = vld [vmem:[#allocation2 + $0xf2] sm:$0xff]  ;;  %v3508_v49 = vld [vmem:[#allocation2 + $0x12a] sm:$0xff] }
  0xce   : > { %5240 = vmatprep.subr.bf16.mxu0 %v5630_v52 }
  0xd0   : > { %5209 = vmatmul.mubr.bf16.gmra.mrb[4].mxu0 %v3152_v62  ;;  %v3487_v62 = vld [vmem:[#allocation2 + $0x32] sm:$0xff] }
  0xd1   : > { %5212 = vmatprep.mubr.bf16.mxu0 %v3153_v38  ;;  %5241 = vmatpush3.bf16.msra.mxu0 %v5630_v52  ;;  %v1653_v52 = vld [vmem:[#allocation2 + $0xe0] sm:$0xff] }
  0xd2   : > { %5242 = vmatprep.subr.bf16.mxu0 %v5632_v32  ;;  %v3488_v38 = vld [vmem:[#allocation2 + $0x3a] sm:$0xff]  ;;  %v1676_v39 = vpack.c.bf16 %v1653_v52, %v1652_v11 }
  0xd3   : > { %4985 = vmatmul.mubr.bf16.gmra.mrb[20].mxu1 %v6134_v4  ;;  %v5634_v4 = vld [vmem:[%s6404_s3 + $0x228] sm:$0xff]   ;;  %v3519_v19 = vpack.c.bf16 %v3488_v38, %v3487_v62  ;;  %v3509_v52 = vld [vmem:[#allocation2 + $0x13a] sm:$0xff]  ;;  %v3511_v38 = vld [vmem:[#allocation2 + $0x152] sm:$0xff] }
  0xd4   : > { %4988 = vmatprep.mubr.bf16.mxu1 %v6148_v31  ;;  %v3131_v31 = vld [vmem:[#allocation2 + $0xd9] sm:$0xff]  ;;  %v3510_v62 = vld [vmem:[#allocation2 + $0x142] sm:$0xff] }
  0xd5   : > { %5243 = vmatpush3.bf16.msra.mxu0 %v5632_v32  ;;  %v6304_v35 = vpack.c.bf16 %v3132_v7, %v3131_v31  ;;  %v5643_v32 = vld [vmem:[%s6404_s3 + $0x128] sm:$0xff]   ;;  %v5645_v7 = vld [vmem:[%s6404_s3 + $0x138] sm:$0xff]  }
  0xd6   : > { %5244 = vmatprep.subr.bf16.mxu0 %v5633_v8  ;;  %v3492_v31 = vld [vmem:[#allocation2 + $0x6a] sm:$0xff] }
  0xd8   : > { %5213 = vmatmul.mubr.bf16.gmra.mrb[8].mxu0 %v3154_v29  ;;  %v1656_v29 = vld [vmem:[#allocation2 + $0x108] sm:$0xff] }
  0xd9   : > { %5216 = vmatprep.mubr.bf16.mxu0 %v3155_v41  ;;  %5245 = vmatpush3.bf16.msra.mxu0 %v5633_v8  ;;  %v3490_v8 = vld [vmem:[#allocation2 + $0x52] sm:$0xff] }
  0xda   : > { %5246 = vmatprep.subr.bf16.mxu0 %v5634_v4  ;;  %v1657_v41 = vld [vmem:[#allocation2 + $0x110] sm:$0xff]  ;;  %v3520_v33 = vpack.c.bf16 %v3490_v8, %v3489_v1 }
  0xdb   : > { %4989 = vmatmul.mubr.bf16.gmra.mrb[24].mxu1 %v6150_v28  ;;  %v6306_v28 = vpack.c.bf16 %v3134_v13, %v3133_v56  ;;  %v1678_v56 = vpack.c.bf16 %v1657_v41, %v1656_v29  ;;  %v2037_v41 = vld [vmem:[#allocation2 + $0x189] sm:$0xff] }
  0xdc   : > { %4992 = vmatprep.mubr.bf16.mxu1 %v6162_v5  ;;  %v5636_v5 = vld [vmem:[%s6404_s3 + $0x238] sm:$0xff]  }
  0xdd   : > { %5247 = vmatpush3.bf16.msra.mxu0 %v5634_v4  ;;  %v3491_v4 = vld [vmem:[#allocation2 + $0x62] sm:$0xff] }
  0xde   : > { %5248 = vmatprep.subr.bf16.mxu0 %v5635_v3  ;;  %v3521_v13 = vpack.c.bf16 %v3492_v31, %v3491_v4  ;;  %v3518_v4 = vld [vmem:[#allocation2 + $0x1a2] sm:$0xff] }
  0xe0   : > { %5217 = vmatmul.mubr.bf16.gmra.mrb[12].mxu0 %v6304_v35 }
  0xe1   : > { %5220 = vmatprep.mubr.bf16.mxu0 %v6306_v28  ;;  %5249 = vmatpush3.bf16.msra.mxu0 %v5635_v3  ;;  %v1658_v3 = vld [vmem:[#allocation2 + $0x120] sm:$0xff] }
  0xe2   : > { %5250 = vmatprep.subr.bf16.mxu0 %v5636_v5 }
  0xe3   : > { %4993 = vmatmul.mubr.bf16.gmra.mrb[28].mxu1 %v6164_v6  ;;  %v6316_v6 = vpack.c.bf16 %v3138_v58, %v3137_v57  ;;  %v1680_v58 = vpack.c.bf16 %v1661_v45, %v1660_v36 }
  0xe4   : > { %5012 = vmatprep.mubr.bf16.mxu1 %v1668_v25  ;;  %v1659_v25 = vld [vmem:[#allocation2 + $0x128] sm:$0xff] }
  0xe5   : > { %5251 = vmatpush3.bf16.msra.mxu0 %v5636_v5  ;;  %v3493_v5 = vld [vmem:[#allocation2 + $0x7a] sm:$0xff]  ;;  %v1679_v53 = vpack.c.bf16 %v1659_v25, %v1658_v3 }
  0xe6   : > { %v3522_v57 = vpack.c.bf16 %v3494_v30, %v3493_v5 }
  0xe8   : > { %5221 = vmatmul.mubr.bf16.gmra.mrb[16].mxu0 %v6314_v60 }
  0xe9   : > { %5224 = vmatprep.mubr.bf16.mxu0 %v6316_v6 }
  0xeb   : > { %5013 = vmatmul.mubr.bf16.vlgmr.msra.gmra.mrb[0].mxu1 %v1669_v59  ;;  %v3523_v59 = vpack.c.bf16 %v3496_v51, %v3495_v50 }
  0xec   : > { %5292 = vmatpush3.bf16.msra.mxu1 %v6280_v48  ;;  %5016 = vmatprep.mubr.bf16.mxu1 %v1670_v61  ;;  %v5642_v48 = vld [vmem:[%s6404_s3 + $0x120] sm:$0xff]   ;;  %v1662_v61 = vld [vmem:[#allocation2 + $0x150] sm:$0xff] }
  0xed   : > { %5285 = vmatprep.subr.bf16.mxu1 %v5639_v42 }
  0xf0   : > { %5293 = vmatpush3.bf16.msra.mxu1 %v5639_v42  ;;  %5225 = vmatmul.mubr.bf16.gmra.mrb[20].mxu0 %v6324_v47  ;;  %v3500_v42 = vld [vmem:[#allocation2 + $0xca] sm:$0xff] }
  0xf1   : > { %5286 = vmatprep.subr.bf16.mxu1 %v5640_v15  ;;  %5228 = vmatprep.mubr.bf16.mxu0 %v6032_v63  ;;  %v1650_v63 = vld [vmem:[#allocation2 + $0xc0] sm:$0xff]  ;;  %v3525_v21 = vpack.c.bf16 %v3500_v42, %v3499_v37 }
  0xf3   : > { %5017 = vmatmul.mubr.bf16.gmra.mrb[4].mxu1 %v1671_v43  ;;  %v1681_v43 = vpack.c.bf16 %v1663_v17, %v1662_v61 }
  0xf4   : > { %5020 = vmatprep.mubr.bf16.mxu1 %v1672_v14  ;;  %5294 = vmatpush3.bf16.msra.mxu1 %v5640_v15  ;;  %v3524_v14 = vpack.c.bf16 %v3498_v22, %v3497_v18  ;;  %v1682_v15 = vpack.c.bf16 %v1665_v34, %v1664_v26 }
  0xf5   : > { %5287 = vmatprep.subr.bf16.mxu1 %v5641_v23 }
  0xf8   : > { %5295 = vmatpush3.bf16.msra.mxu1 %v5641_v23  ;;  %5229 = vmatmul.mubr.bf16.gmra.mrb[24].mxu0 %v6041_v12  ;;  %v1675_v12 = vpack.c.bf16 %v1651_v16, %v1650_v63  ;;  %v3504_v23 = vld [vmem:[#allocation2 + $0xfa] sm:$0xff]  ;;  %v3506_v63 = vld [vmem:[#allocation2 + $0x112] sm:$0xff]  ;;  %v3507_v16 = vld [vmem:[#allocation2 + $0x122] sm:$0xff] }
  0xf9   : > { %5288 = vmatprep.subr.bf16.mxu1 %v5642_v48  ;;  %5232 = vmatprep.mubr.bf16.mxu0 %v3163_v0  ;;  %v1655_v0 = vld [vmem:[#allocation2 + $0xf8] sm:$0xff]  ;;  %v3529_v11 = vpack.c.bf16 %v3508_v49, %v3507_v16 }
  0xfa   : > { %v1677_v9 = vpack.c.bf16 %v1655_v0, %v1654_v44  ;;  %v3516_v44 = vld [vmem:[#allocation2 + $0x18a] sm:$0xff] }
  0xfb   : > { %5021 = vmatmul.mubr.bf16.gmra.mrb[8].mxu1 %v1673_v55  ;;  %v3526_v55 = vpack.c.bf16 %v3502_v54, %v3501_v27 }
  0xfc   : > { %5024 = vmatprep.mubr.bf16.mxu1 %v1674_v46  ;;  %5296 = vmatpush3.bf16.msra.mxu1 %v5642_v48  ;;  %v3527_v46 = vpack.c.bf16 %v3504_v23, %v3503_v20  ;;  %v3505_v48 = vld [vmem:[#allocation2 + $0x10a] sm:$0xff] }
  0xfd   : > { %5289 = vmatprep.subr.bf16.mxu1 %v5643_v32  ;;  %v3528_v10 = vpack.c.bf16 %v3506_v63, %v3505_v48 }
 0x100   : > { %5297 = vmatpush3.bf16.msra.mxu1 %v5643_v32  ;;  %5233 = vmatmul.mubr.bf16.gmra.mrb[28].mxu0 %v3164_v2  ;;  %v3530_v32 = vpack.c.bf16 %v3510_v62, %v3509_v52  ;;  %v2033_v2 = vld [vmem:[#allocation2 + $0x159] sm:$0xff] }
 0x101   : > { %5290 = vmatprep.subr.bf16.mxu1 %v5644_v40  ;;  %5252 = vmatprep.mubr.bf16.mxu0 %v3519_v19  ;;  %v2034_v19 = vld [vmem:[#allocation2 + $0x169] sm:$0xff] }
 0x103   : > { %5025 = vmatmul.mubr.bf16.gmra.mrb[12].mxu1 %v1675_v12 }
 0x104   : > { %5028 = vmatprep.mubr.bf16.mxu1 %v1676_v39  ;;  %5298 = vmatpush3.bf16.msra.mxu1 %v5644_v40  ;;  %v3513_v39 = vld [vmem:[#allocation2 + $0x16a] sm:$0xff] }
 0x105   : > { %5291 = vmatprep.subr.bf16.mxu1 %v5645_v7  ;;  %v2035_v40 = vld [vmem:[#allocation2 + $0x171] sm:$0xff] }
 0x106   : > { %v2052_v8 = vpack.c.bf16 %v2035_v40, %v2034_v19 }
 0x108   : > { %5299 = vmatpush3.bf16.msra.mxu1 %v5645_v7  ;;  %5253 = vmatmul.mubr.bf16.vlgmr.msra.gmra.mrb[0].mxu0 %v3520_v33 }
 0x109   : > { %5256 = vmatprep.mubr.bf16.mxu0 %v3521_v13 }
 0x10b   : > { %5029 = vmatmul.mubr.bf16.gmra.mrb[16].mxu1 %v1677_v9 }
 0x10c   : > { %5032 = vmatprep.mubr.bf16.mxu1 %v1678_v56 }
 0x110   : > { %5257 = vmatmul.mubr.bf16.gmra.mrb[4].mxu0 %v3522_v57 }
 0x111   : > { %5260 = vmatprep.mubr.bf16.mxu0 %v3523_v59 }
 0x113   : > { %5033 = vmatmul.mubr.bf16.gmra.mrb[20].mxu1 %v1679_v53 }
 0x114   : > { %5036 = vmatprep.mubr.bf16.mxu1 %v1680_v58 }
 0x118   : > { %5261 = vmatmul.mubr.bf16.gmra.mrb[8].mxu0 %v3524_v14 }
 0x119   : > { %5264 = vmatprep.mubr.bf16.mxu0 %v3525_v21 }
 0x11b   : > { %5037 = vmatmul.mubr.bf16.gmra.mrb[24].mxu1 %v1681_v43 }
 0x11c   : > { %5040 = vmatprep.mubr.bf16.mxu1 %v1682_v15 }
 0x120   : > { %5265 = vmatmul.mubr.bf16.gmra.mrb[12].mxu0 %v3526_v55 }
 0x121   : > { %5268 = vmatprep.mubr.bf16.mxu0 %v3527_v46 }
 0x123   : > { %5041 = vmatmul.mubr.bf16.gmra.mrb[28].mxu1 %v6257_v24  ;;  %v3512_v24 = vld [vmem:[#allocation2 + $0x15a] sm:$0xff] }
 0x124   : > { %5076 = vmatprep.mubr.bf16.mxu1 %v6304_v35  ;;  %v3531_v12 = vpack.c.bf16 %v3512_v24, %v3511_v38  ;;  %v2032_v35 = vld [vmem:[#allocation2 + $0x151] sm:$0xff] }
 0x125   : > { %v2051_v0 = vpack.c.bf16 %v2033_v2, %v2032_v35 }
 0x128   : > { %5269 = vmatmul.mubr.bf16.gmra.mrb[16].mxu0 %v3528_v10 }
 0x129   : > { %5272 = vmatprep.mubr.bf16.mxu0 %v3529_v11 }
 0x12b   : > { %5077 = vmatmul.mubr.bf16.vlgmr.msra.gmra.mrb[16].mxu1 %v6306_v28  ;;  %v3514_v28 = vld [vmem:[#allocation2 + $0x172] sm:$0xff] }
 0x12c   : > { %5080 = vmatprep.mubr.bf16.mxu1 %v6314_v60  ;;  %v3515_v60 = vld [vmem:[#allocation2 + $0x182] sm:$0xff]  ;;  %v3532_v1 = vpack.c.bf16 %v3514_v28, %v3513_v39 }
 0x12d   : > { %v3533_v29 = vpack.c.bf16 %v3516_v44, %v3515_v60 }
 0x130   : > { %5273 = vmatmul.mubr.bf16.gmra.mrb[20].mxu0 %v3530_v32 }
 0x131   : > { %5276 = vmatprep.mubr.bf16.mxu0 %v3531_v12 }
 0x133   : > { %5081 = vmatmul.mubr.bf16.gmra.mrb[20].mxu1 %v6316_v6  ;;  %v2036_v6 = vld [vmem:[#allocation2 + $0x181] sm:$0xff] }
 0x134   : > { %5084 = vmatprep.mubr.bf16.mxu1 %v6324_v47  ;;  %v3517_v47 = vld [vmem:[#allocation2 + $0x19a] sm:$0xff]  ;;  %v2053_v31 = vpack.c.bf16 %v2037_v41, %v2036_v6 }
 0x135   : > { %v3534_v7 = vpack.c.bf16 %v3518_v4, %v3517_v47 }
 0x138   : > { %5277 = vmatmul.mubr.bf16.gmra.mrb[24].mxu0 %v3532_v1 }
 0x139   : > { %5280 = vmatprep.mubr.bf16.mxu0 %v3533_v29 }
 0x13b   : > { %5085 = vmatmul.mubr.bf16.gmra.mrb[24].mxu1 %v2051_v0 }
 0x13c   : > { %5088 = vmatprep.mubr.bf16.mxu1 %v2052_v8 }
 0x140   : > { %5281 = vmatmul.mubr.bf16.gmra.mrb[28].mxu0 %v3534_v7 }
 0x143   : > { %5089 = vmatmul.mubr.bf16.gmra.mrb[28].mxu1 %v2053_v31 }
 0x1be   : > { %v5014_v9 = vpop.f32.mrb[0].mxu1 }
 0x1bf   : > { %v1815_v33 = vpop.f32.mrb[1].mxu1 }
 0x1c0   : > { %v5015_v56 = vpop.f32.mrb[2].mxu1 }
 0x1c1   : > { %v1818_v13 = vpop.f32.mrb[3].mxu1 }
 0x1c6   : > { %v5018_v3 = vpop.f32.mrb[4].mxu1 }
 0x1c7   : > { %v1831_v25 = vpop.f32.mrb[5].mxu1 }
 0x1c8   : > { %v5019_v5 = vpop.f32.mrb[6].mxu1 }
 0x1c9   : > { %v1834_v30 = vpop.f32.mrb[7].mxu1 }
 0x1ce   : > { %v5022_v36 = vpop.f32.mrb[8].mxu1 }
 0x1cf   : > { %v1847_v45 = vpop.f32.mrb[9].mxu1 }
 0x1d0   : > { %v5023_v50 = vpop.f32.mrb[10].mxu1 }
 0x1d1   : > { %v1850_v51 = vpop.f32.mrb[11].mxu1 }
 0x1d6   : > { %v6356_v53 = vpop.f32.mrb[12].mxu1 }
 0x1d7   : > { %v6358_v57 = vpop.f32.mrb[13].mxu1 }
 0x1d8   : > { %v6360_v58 = vpop.f32.mrb[14].mxu1 }
 0x1d9   : > { %v6362_v59 = vpop.f32.mrb[15].mxu1 }
 0x1db   : > { %v5254_v61 = vpop.f32.mrb[0].mxu0 }
 0x1dc   : > { %v5300_v17 = vadd.f32 %v5254_v61, %v5014_v9  ;;  %v3666_v18 = vpop.f32.mrb[1].mxu0 }
 0x1dd   : > { %v5301_v22 = vadd.f32 %v3666_v18, %v1815_v33  ;;  %v5255_v26 = vpop.f32.mrb[2].mxu0 }
 0x1de   : > { %v5302_v34 = vadd.f32 %v5255_v26, %v5015_v56  ;;  %v3669_v37 = vpop.f32.mrb[3].mxu0  ;;  %v3929_v54 = vmul.f32 %v5300_v17, %v5300_v17 }
 0x1df   : > { %v5303_v42 = vadd.f32 %v3669_v37, %v1818_v13  ;;  %v3927_v14 = vmul.f32 %v5301_v22, %v5301_v22 }
 0x1e0   : > { %v4549_v43 = vpack.c.bf16 %v5302_v34, %v5300_v17  ;;  %v3930_v63 = vmul.f32 %v5302_v34, %v5302_v34 }
 0x1e1   : > { %v3889_v15 = vadd.f32 %v5303_v42, %v5301_v22  ;;  %v3928_v21 = vmul.f32 %v5303_v42, %v5303_v42  ;;  %v4544_v27 = vpack.c.bf16 %v5303_v42, %v5301_v22 }
 0x1e2   : > { %4621 = vst [vmem:[%s6368_s21 + $0x8] sm:$0xff] %v4549_v43  }
 0x1e3   : > { %v3890_v20 = vadd.f32 %v5300_v17, %v3889_v15  ;;  %v3959_v23 = vadd.f32 %v3928_v21, %v3927_v14  ;;  %4545 = vst [vmem:[%s6368_s21] sm:$0xff] %v4544_v27   ;;  %v5258_v55 = vpop.f32.mrb[4].mxu0 }
 0x1e4   : > { %v5304_v46 = vadd.f32 %v5258_v55, %v5018_v3  ;;  %v3682_v48 = vpop.f32.mrb[5].mxu0 }
 0x1e5   : > { %v3960_v16 = vadd.f32 %v3959_v23, %v3929_v54  ;;  %v5305_v49 = vadd.f32 %v3682_v48, %v1831_v25  ;;  %v3891_v10 = vadd.f32 %v5302_v34, %v3890_v20  ;;  %v5259_v11 = vpop.f32.mrb[6].mxu0 }
 0x1e6   : > { %v5306_v52 = vadd.f32 %v5259_v11, %v5019_v5  ;;  %v3685_v62 = vpop.f32.mrb[7].mxu0  ;;  %v3933_v40 = vmul.f32 %v5304_v46, %v5304_v46 }
 0x1e7   : > { %v3892_v38 = vadd.f32 %v5305_v49, %v3891_v10  ;;  %v3931_v24 = vmul.f32 %v5305_v49, %v5305_v49  ;;  %v3961_v32 = vadd.f32 %v3960_v16, %v3930_v63  ;;  %v5307_v12 = vadd.f32 %v3685_v62, %v1834_v30 }
 0x1e8   : > { %v4559_v35 = vpack.c.bf16 %v5306_v52, %v5304_v46  ;;  %v3934_v29 = vmul.f32 %v5306_v52, %v5306_v52 }
 0x1e9   : > { %v3962_v2 = vadd.f32 %v3961_v32, %v3931_v24  ;;  %v3893_v39 = vadd.f32 %v5307_v12, %v3892_v38  ;;  %v3932_v28 = vmul.f32 %v5307_v12, %v5307_v12  ;;  %v4554_v19 = vpack.c.bf16 %v5307_v12, %v5305_v49 }
 0x1ea   : > { %4623 = vst [vmem:[%s6368_s21 + $0x18] sm:$0xff] %v4559_v35  }
 0x1eb   : > { %v3894_v60 = vadd.f32 %v5304_v46, %v3893_v39  ;;  %v3963_v44 = vadd.f32 %v3962_v2, %v3932_v28  ;;  %4622 = vst [vmem:[%s6368_s21 + $0x10] sm:$0xff] %v4554_v19   ;;  %v5262_v0 = vpop.f32.mrb[8].mxu0 }
 0x1ec   : > { %v5308_v1 = vadd.f32 %v5262_v0, %v5022_v36  ;;  %v3698_v8 = vpop.f32.mrb[9].mxu0 }
 0x1ed   : > { %v3964_v6 = vadd.f32 %v3963_v44, %v3933_v40  ;;  %v5309_v41 = vadd.f32 %v3698_v8, %v1847_v45  ;;  %v3895_v47 = vadd.f32 %v5306_v52, %v3894_v60  ;;  %v5263_v4 = vpop.f32.mrb[10].mxu0 }
 0x1ee   : > { %v5310_v31 = vadd.f32 %v5263_v4, %v5023_v50  ;;  %v3701_v7 = vpop.f32.mrb[11].mxu0  ;;  %v3937_v36 = vmul.f32 %v5308_v1, %v5308_v1 }
 0x1ef   : > { %v3896_v9 = vadd.f32 %v5309_v41, %v3895_v47  ;;  %v3935_v33 = vmul.f32 %v5309_v41, %v5309_v41  ;;  %v3965_v56 = vadd.f32 %v3964_v6, %v3934_v29  ;;  %v5311_v13 = vadd.f32 %v3701_v7, %v1850_v51 }
 0x1f0   : > { %v4569_v3 = vpack.c.bf16 %v5310_v31, %v5308_v1  ;;  %v3938_v50 = vmul.f32 %v5310_v31, %v5310_v31 }
 0x1f1   : > { %v3966_v25 = vadd.f32 %v3965_v56, %v3935_v33  ;;  %v3897_v5 = vadd.f32 %v5311_v13, %v3896_v9  ;;  %v3936_v30 = vmul.f32 %v5311_v13, %v5311_v13  ;;  %v4564_v61 = vpack.c.bf16 %v5311_v13, %v5309_v41 }
 0x1f2   : > { %4625 = vst [vmem:[%s6368_s21 + $0x28] sm:$0xff] %v4569_v3  }
 0x1f3   : > { %v3898_v17 = vadd.f32 %v5308_v1, %v3897_v5  ;;  %v3967_v18 = vadd.f32 %v3966_v25, %v3936_v30  ;;  %4624 = vst [vmem:[%s6368_s21 + $0x20] sm:$0xff] %v4564_v61   ;;  %v5266_v45 = vpop.f32.mrb[12].mxu0 }
 0x1f4   : > { %v5312_v22 = vadd.f32 %v5266_v45, %v6356_v53  ;;  %v3714_v26 = vpop.f32.mrb[13].mxu0 }
 0x1f5   : > { %v3968_v34 = vadd.f32 %v3967_v18, %v3937_v36  ;;  %v5313_v37 = vadd.f32 %v3714_v26, %v6358_v57  ;;  %v3899_v51 = vadd.f32 %v5310_v31, %v3898_v17  ;;  %v5267_v42 = vpop.f32.mrb[14].mxu0 }
 0x1f6   : > { %v5314_v43 = vadd.f32 %v5267_v42, %v6360_v58  ;;  %v3717_v14 = vpop.f32.mrb[15].mxu0  ;;  %v3941_v63 = vmul.f32 %v5312_v22, %v5312_v22 }
 0x1f7   : > { %v3900_v15 = vadd.f32 %v5313_v37, %v3899_v51  ;;  %v3939_v21 = vmul.f32 %v5313_v37, %v5313_v37  ;;  %v3969_v27 = vadd.f32 %v3968_v34, %v3938_v50  ;;  %v5315_v54 = vadd.f32 %v3717_v14, %v6362_v59 }
 0x1f8   : > { %v4579_v20 = vpack.c.bf16 %v5314_v43, %v5312_v22  ;;  %v3942_v62 = vmul.f32 %v5314_v43, %v5314_v43 }
 0x1f9   : > { %v3970_v23 = vadd.f32 %v3969_v27, %v3939_v21  ;;  %v3901_v53 = vadd.f32 %v5315_v54, %v3900_v15  ;;  %v3940_v55 = vmul.f32 %v5315_v54, %v5315_v54  ;;  %v4574_v46 = vpack.c.bf16 %v5315_v54, %v5313_v37 }
 0x1fa   : > { %4627 = vst [vmem:[%s6368_s21 + $0x38] sm:$0xff] %v4579_v20  }
 0x1fb   : > { %v3902_v57 = vadd.f32 %v5312_v22, %v3901_v53  ;;  %v3971_v16 = vadd.f32 %v3970_v23, %v3940_v55  ;;  %4626 = vst [vmem:[%s6368_s21 + $0x30] sm:$0xff] %v4574_v46   ;;  %v5270_v49 = vpop.f32.mrb[16].mxu0 }
 0x1fc   : > { %v3730_v11 = vpop.f32.mrb[17].mxu0 }
 0x1fd   : > { %v3972_v38 = vadd.f32 %v3971_v16, %v3941_v63  ;;  %v3903_v24 = vadd.f32 %v5314_v43, %v3902_v57  ;;  %v5271_v32 = vpop.f32.mrb[18].mxu0 }
 0x1fe   : > { %v5078_v48 = vpop.f32.mrb[16].mxu1  ;;  %v3733_v2 = vpop.f32.mrb[19].mxu0 }
 0x1ff   : > { %v2249_v58 = vpop.f32.mrb[17].mxu1  ;;  %v5316_v10 = vadd.f32 %v5270_v49, %v5078_v48  ;;  %v3973_v19 = vadd.f32 %v3972_v38, %v3942_v62 }
 0x200   : > { %v5079_v52 = vpop.f32.mrb[18].mxu1  ;;  %v5317_v59 = vadd.f32 %v3730_v11, %v2249_v58 }
 0x201   : > { %v2252_v12 = vpop.f32.mrb[19].mxu1  ;;  %v5318_v35 = vadd.f32 %v5271_v32, %v5079_v52  ;;  %v3945_v6 = vmul.f32 %v5316_v10, %v5316_v10 }
 0x202   : > { %v3904_v39 = vadd.f32 %v5317_v59, %v3903_v24  ;;  %v3943_v28 = vmul.f32 %v5317_v59, %v5317_v59  ;;  %v5319_v40 = vadd.f32 %v3733_v2, %v2252_v12 }
 0x203   : > { %v4589_v60 = vpack.c.bf16 %v5318_v35, %v5316_v10  ;;  %v5274_v4 = vpop.f32.mrb[20].mxu0  ;;  %v3946_v56 = vmul.f32 %v5318_v35, %v5318_v35 }
 0x204   : > { %v3974_v44 = vadd.f32 %v3973_v19, %v3943_v28  ;;  %v3905_v0 = vadd.f32 %v5319_v40, %v3904_v39  ;;  %v3944_v1 = vmul.f32 %v5319_v40, %v5319_v40  ;;  %v4584_v8 = vpack.c.bf16 %v5319_v40, %v5317_v59  ;;  %v3746_v9 = vpop.f32.mrb[21].mxu0 }
 0x205   : > { %4629 = vst [vmem:[%s6368_s21 + $0x48] sm:$0xff] %v4589_v60   ;;  %v5275_v5 = vpop.f32.mrb[22].mxu0 }
 0x206   : > { %v5082_v29 = vpop.f32.mrb[20].mxu1  ;;  %v3906_v41 = vadd.f32 %v5316_v10, %v3905_v0  ;;  %v3975_v47 = vadd.f32 %v3974_v44, %v3944_v1  ;;  %4628 = vst [vmem:[%s6368_s21 + $0x40] sm:$0xff] %v4584_v8   ;;  %v3749_v36 = vpop.f32.mrb[23].mxu0 }
 0x207   : > { %v2265_v31 = vpop.f32.mrb[21].mxu1  ;;  %v5320_v7 = vadd.f32 %v5274_v4, %v5082_v29 }
 0x208   : > { %v5083_v33 = vpop.f32.mrb[22].mxu1  ;;  %v3976_v13 = vadd.f32 %v3975_v47, %v3945_v6  ;;  %v5321_v3 = vadd.f32 %v3746_v9, %v2265_v31  ;;  %v3907_v25 = vadd.f32 %v5318_v35, %v3906_v41 }
 0x209   : > { %v2268_v30 = vpop.f32.mrb[23].mxu1  ;;  %v5322_v61 = vadd.f32 %v5275_v5, %v5083_v33  ;;  %v3949_v43 = vmul.f32 %v5320_v7, %v5320_v7 }
 0x20a   : > { %v3908_v17 = vadd.f32 %v5321_v3, %v3907_v25  ;;  %v3947_v18 = vmul.f32 %v5321_v3, %v5321_v3  ;;  %v3977_v45 = vadd.f32 %v3976_v13, %v3946_v56  ;;  %v5323_v22 = vadd.f32 %v3749_v36, %v2268_v30 }
 0x20b   : > { %v4599_v26 = vpack.c.bf16 %v5322_v61, %v5320_v7  ;;  %v5278_v21 = vpop.f32.mrb[24].mxu0  ;;  %v3950_v53 = vmul.f32 %v5322_v61, %v5322_v61 }
 0x20c   : > { %v3978_v50 = vadd.f32 %v3977_v45, %v3947_v18  ;;  %v3909_v34 = vadd.f32 %v5323_v22, %v3908_v17  ;;  %v3948_v37 = vmul.f32 %v5323_v22, %v5323_v22  ;;  %v4594_v51 = vpack.c.bf16 %v5323_v22, %v5321_v3  ;;  %v3762_v20 = vpop.f32.mrb[25].mxu0 }
 0x20d   : > { %4631 = vst [vmem:[%s6368_s21 + $0x58] sm:$0xff] %v4599_v26   ;;  %v5279_v63 = vpop.f32.mrb[26].mxu0 }
 0x20e   : > { %v5086_v42 = vpop.f32.mrb[24].mxu1  ;;  %v3910_v14 = vadd.f32 %v5320_v7, %v3909_v34  ;;  %v3979_v15 = vadd.f32 %v3978_v50, %v3948_v37  ;;  %4630 = vst [vmem:[%s6368_s21 + $0x50] sm:$0xff] %v4594_v51   ;;  %v3765_v49 = vpop.f32.mrb[27].mxu0 }
 0x20f   : > { %v2281_v27 = vpop.f32.mrb[25].mxu1  ;;  %v5324_v54 = vadd.f32 %v5278_v21, %v5086_v42 }
 0x210   : > { %v5087_v23 = vpop.f32.mrb[26].mxu1  ;;  %v3980_v55 = vadd.f32 %v3979_v15, %v3949_v43  ;;  %v5325_v46 = vadd.f32 %v3762_v20, %v2281_v27  ;;  %v3911_v48 = vadd.f32 %v5322_v61, %v3910_v14 }
 0x211   : > { %v2284_v57 = vpop.f32.mrb[27].mxu1  ;;  %v5326_v16 = vadd.f32 %v5279_v63, %v5087_v23  ;;  %v3953_v35 = vmul.f32 %v5324_v54, %v5324_v54 }
 0x212   : > { %v3912_v58 = vadd.f32 %v5325_v46, %v3911_v48  ;;  %v3951_v10 = vmul.f32 %v5325_v46, %v5325_v46  ;;  %v3981_v11 = vadd.f32 %v3980_v55, %v3950_v53  ;;  %v5327_v52 = vadd.f32 %v3765_v49, %v2284_v57 }
 0x213   : > { %v4609_v62 = vpack.c.bf16 %v5326_v16, %v5324_v54  ;;  %v5282_v28 = vpop.f32.mrb[28].mxu0  ;;  %v3954_v0 = vmul.f32 %v5326_v16, %v5326_v16 }
 0x214   : > { %v3982_v38 = vadd.f32 %v3981_v11, %v3951_v10  ;;  %v3913_v59 = vadd.f32 %v5327_v52, %v3912_v58  ;;  %v3952_v24 = vmul.f32 %v5327_v52, %v5327_v52  ;;  %v4604_v32 = vpack.c.bf16 %v5327_v52, %v5325_v46  ;;  %v3778_v60 = vpop.f32.mrb[29].mxu0 }
 0x215   : > { %4633 = vst [vmem:[%s6368_s21 + $0x68] sm:$0xff] %v4609_v62   ;;  %v5283_v6 = vpop.f32.mrb[30].mxu0 }
 0x216   : > { %v5090_v12 = vpop.f32.mrb[28].mxu1  ;;  %v3914_v2 = vadd.f32 %v5324_v54, %v3913_v59  ;;  %v3983_v39 = vadd.f32 %v3982_v38, %v3952_v24  ;;  %4632 = vst [vmem:[%s6368_s21 + $0x60] sm:$0xff] %v4604_v32   ;;  %v3781_v4 = vpop.f32.mrb[31].mxu0 }
 0x217   : > { %v2297_v19 = vpop.f32.mrb[29].mxu1  ;;  %v5328_v40 = vadd.f32 %v5282_v28, %v5090_v12 }
 0x218   : > { %v5091_v44 = vpop.f32.mrb[30].mxu1  ;;  %v3984_v1 = vadd.f32 %v3983_v39, %v3953_v35  ;;  %v5329_v8 = vadd.f32 %v3778_v60, %v2297_v19  ;;  %v3915_v29 = vadd.f32 %v5326_v16, %v3914_v2 }
 0x219   : > { %v2300_v41 = vpop.f32.mrb[31].mxu1  ;;  %v5330_v47 = vadd.f32 %v5283_v6, %v5091_v44  ;;  %v3957_v30 = vmul.f32 %v5328_v40, %v5328_v40 }
 0x21a   : > { %v3916_v31 = vadd.f32 %v5329_v8, %v3915_v29  ;;  %v3955_v7 = vmul.f32 %v5329_v8, %v5329_v8  ;;  %v3985_v9 = vadd.f32 %v3984_v1, %v3954_v0  ;;  %v5331_v33 = vadd.f32 %v3781_v4, %v2300_v41 }
 0x21b   : > { %v4619_v56 = vpack.c.bf16 %v5330_v47, %v5328_v40  ;;  %v3958_v17 = vmul.f32 %v5330_v47, %v5330_v47 }
 0x21c   : > { %v3986_v13 = vadd.f32 %v3985_v9, %v3955_v7  ;;  %v3917_v3 = vadd.f32 %v5331_v33, %v3916_v31  ;;  %v3956_v25 = vmul.f32 %v5331_v33, %v5331_v33  ;;  %v4614_v5 = vpack.c.bf16 %v5331_v33, %v5329_v8 }
 0x21d   : > { %4635 = vst [vmem:[%s6368_s21 + $0x78] sm:$0xff] %v4619_v56  }
 0x21e   : > { %v3918_v61 = vadd.f32 %v5328_v40, %v3917_v3  ;;  %v3987_v36 = vadd.f32 %v3986_v13, %v3956_v25  ;;  %4634 = vst [vmem:[%s6368_s21 + $0x70] sm:$0xff] %v4614_v5  }
 0x220   : > { %v3919_v18 = vadd.f32 %v5330_v47, %v3918_v61  ;;  %v3988_v45 = vadd.f32 %v3987_v36, %v3957_v30 }
 0x222   : > { %v3920_v22 = vrot.slane %v3919_v18, 4  ;;  %v3989_v26 = vadd.f32 %v3988_v45, %v3958_v17 }
 0x224   : > { %v3921_v50 = vadd.f32 %v3920_v22, %v3919_v18  ;;  %v3990_v34 = vrot.slane %v3989_v26, 4 }
 0x226   : > { %v3922_v37 = vrot.slane %v3921_v50, 2  ;;  %v3991_v51 = vadd.f32 %v3990_v34, %v3989_v26 }
 0x228   : > { %v3923_v42 = vadd.f32 %v3922_v37, %v3921_v50  ;;  %v3992_v43 = vrot.slane %v3991_v51, 2 }
 0x22a   : > { %v3924_v14 = vrot.slane %v3923_v42, 1  ;;  %v3993_v15 = vadd.f32 %v3992_v43, %v3991_v51 }
 0x22c   : > { %v3925_v21 = vadd.f32 %v3924_v14, %v3923_v42  ;;  %v3994_v27 = vrot.slane %v3993_v15, 1 }
 0x22e   : > { %3926 = vst [vmem:[%s293_s23] sm:$0x1] %v3925_v21  ;;  %v3995_v54 = vadd.f32 %v3994_v27, %v3993_v15 }
 0x230   : > { %3996 = vst [vmem:[%s296_s28] sm:$0x1] %v3995_v54 }
 0x231 PF: > { %s19_s24 = sadd.s32 1, %s5652_s24  }
 0x232   : > { %p16_p4 = scmp.ge.s32.totalorder %s19_s24, 4  }
 0x234   :  { %18 = sbr.rel (!%p16_p4) target bundleno = 1 (0x1), region = 104 }

// kernel: irblock_forward.6
= control target key start
LH: loop header
LB: loop body
LE: loop exit
PB: predicated region body
PF: predicated region fallthrough
CT: control target
= control target key end

     0   :  { %s5621_s26 = smov 0   ;;  %s6359_s0 = inlined_call_operand.vmem [shape: bf16[2,256,128], index: 0, kind: input, shape index: {}]   ;;  %s6360_s1 = inlined_call_operand.vmem [shape: f32[1,1,128], index: 1, kind: input, shape index: {}]   ;;  %s6361_s2 = inlined_call_operand.vmem [shape: f32[1,1,128], index: 2, kind: input, shape index: {}]   ;;  %s6362_s3 = inlined_call_operand.vmem [shape: bf16[9,128,128], index: 3, kind: input, shape index: {}]   ;;  %s6363_s4 = inlined_call_operand.<no memory space> [shape: f32[1,1], index: 4, kind: input, shape index: {}]   ;;  %s6364_s5 = inlined_call_operand.vmem [shape: f32[2,256,128], index: 5, kind: output, shape index: {0}]   ;;  %s6365_s6 = inlined_call_operand.vmem [shape: f32[2,1,128], index: 6, kind: output, shape index: {1}]   ;;  %s6366_s7 = inlined_call_operand.vmem [shape: f32[2,1,128], index: 7, kind: output, shape index: {2}]  }
   0x1   :  { %13 = sst [smem:[#allocation4]] %s6363_s4 }
   0x2 LB: > { %s4264_s27 = sadd.s32 4294967295, %s5574_s26   ;;  %p4268_p0 = scmp.ge.s32.totalorder %s5574_s26, 1  ;;  %s5574_s26 = sphi %s5621_s26, %s19_s26  }
   0x3   : > { %p243_p1 = scmp.lt.s32.totalorder %s5574_s26, 3 }
   0x5   : > { %p244_p2 = pnand %p4268_p0, %p243_p1 }
   0x6   : > { %v5487_v0 = vld [vmem:[%s6362_s3] sm:$0xff] (!%p244_p2)   ;;  %v5576_v2 = vmov (!%p244_p2), 0.0   ;;  %v5489_v3 = vld [vmem:[%s6362_s3 + $0x8] sm:$0xff] (!%p244_p2)   ;;  %p281_p3 = scmp.lt.s32.totalorder (!%p244_p2), %s4264_s27, 1  ;;  %v5491_v5 = vld [vmem:[%s6362_s3 + $0x10] sm:$0xff] (!%p244_p2)   ;;  %v5577_v7 = vmov (!%p244_p2), 0.0|0.0  }
   0x7   : > { %247 = sbr.rel (%p244_p2) target bundleno = 562 (0x232), region = 40  ;;  %v5488_v1 = vld [vmem:[%s6362_s3 + $0x100] sm:$0xff] (!%p244_p2)   ;;  %538 = vst [vmem:[#allocation2] sm:$0xff] (!%p244_p2), %v5576_v2  ;;  %539 = vst [vmem:[#allocation2 + $0x8] sm:$0xff] (!%p244_p2), %v5576_v2  ;;  %4774 = vmatprep.subr.bf16.mxu1 (!%p244_p2), %v5487_v0  ;;  %v5490_v4 = vld [vmem:[%s6362_s3 + $0x108] sm:$0xff] (!%p244_p2)   ;;  %4790 = vmatprep.mubr.bf16.mxu1 (!%p244_p2), %v5577_v7  ;;  %s440_s12 = sld [smem:[#allocation4]] (!%p244_p2) }
   0x8   : > { %540 = vst [vmem:[#allocation2 + $0x10] sm:$0x3] (!%p244_p2), %v5576_v2  ;;  %541 = vst [vmem:[#allocation2 + $0x18] sm:$0xff] (!%p244_p2), %v5576_v2  ;;  %4966 = vmatprep.subr.bf16.mxu0 (!%p244_p2), %v5488_v1  ;;  %4775 = vmatpush3.bf16.msra.mxu1 (!%p244_p2), %v5487_v0  ;;  %v5492_v6 = vld [vmem:[%s6362_s3 + $0x110] sm:$0xff] (!%p244_p2)   ;;  %v5493_v8 = vld [vmem:[%s6362_s3 + $0x18] sm:$0xff] (!%p244_p2)  }
   0x9   : > { %542 = vst [vmem:[#allocation2 + $0x20] sm:$0xff] (!%p244_p2), %v5576_v2  ;;  %543 = vst [vmem:[#allocation2 + $0x28] sm:$0x3] (!%p244_p2), %v5576_v2  ;;  %4967 = vmatpush3.bf16.msra.mxu0 (!%p244_p2), %v5488_v1  ;;  %4776 = vmatprep.subr.bf16.mxu1 (!%p244_p2), %v5489_v3  ;;  %v5494_v9 = vld [vmem:[%s6362_s3 + $0x118] sm:$0xff] (!%p244_p2)   ;;  %v5495_v10 = vld [vmem:[%s6362_s3 + $0x20] sm:$0xff] (!%p244_p2)  }
   0xa   : > { %544 = vst [vmem:[#allocation2 + $0x30] sm:$0xff] (!%p244_p2), %v5576_v2  ;;  %545 = vst [vmem:[#allocation2 + $0x38] sm:$0xff] (!%p244_p2), %v5576_v2  ;;  %4968 = vmatprep.subr.bf16.mxu0 (!%p244_p2), %v5490_v4  ;;  %v5496_v11 = vld [vmem:[%s6362_s3 + $0x120] sm:$0xff] (!%p244_p2)   ;;  %v5497_v12 = vld [vmem:[%s6362_s3 + $0x28] sm:$0xff] (!%p244_p2)  }
   0xb   : > { %546 = vst [vmem:[#allocation2 + $0x40] sm:$0x3] (!%p244_p2), %v5576_v2  ;;  %547 = vst [vmem:[#allocation2 + $0x48] sm:$0xff] (!%p244_p2), %v5576_v2  ;;  %v5498_v13 = vld [vmem:[%s6362_s3 + $0x128] sm:$0xff] (!%p244_p2)   ;;  %v5681_v15 = vld [vmem:[%s6360_s1] ss:$0 sm:$0xff] (!%p244_p2) }
   0xc   : > { %548 = vst [vmem:[#allocation2 + $0x50] sm:$0xff] (!%p244_p2), %v5576_v2  ;;  %549 = vst [vmem:[#allocation2 + $0x58] sm:$0x3] (!%p244_p2), %v5576_v2  ;;  %4777 = vmatpush3.bf16.msra.mxu1 (!%p244_p2), %v5489_v3  ;;  %v5686_v18 = vld [vmem:[%s6361_s2] ss:$0 sm:$0xff] (!%p244_p2)  ;;  %v5499_v24 = vld [vmem:[%s6362_s3 + $0x30] sm:$0xff] (!%p244_p2)  }
   0xd   : > { %550 = vst [vmem:[#allocation2 + $0x60] sm:$0xff] (!%p244_p2), %v5576_v2  ;;  %551 = vst [vmem:[#allocation2 + $0x68] sm:$0xff] (!%p244_p2), %v5576_v2  ;;  %4969 = vmatpush3.bf16.msra.mxu0 (!%p244_p2), %v5490_v4  ;;  %4778 = vmatprep.subr.bf16.mxu1 (!%p244_p2), %v5491_v5  ;;  %v5500_v26 = vld [vmem:[%s6362_s3 + $0x130] sm:$0xff] (!%p244_p2)   ;;  %v5703_v34 = vstv (!%p244_p2), %s440_s12  ;;  %v5501_v36 = vld [vmem:[%s6362_s3 + $0x38] sm:$0xff] (!%p244_p2)  }
   0xe   : > { %552 = vst [vmem:[#allocation2 + $0x70] sm:$0x3] %v5576_v2  ;;  %553 = vst [vmem:[#allocation2 + $0x78] sm:$0xff] %v5576_v2  ;;  %s6370_s27 = smov (!%p281_p3, %s4264_s27), 1  ;;  %4970 = vmatprep.subr.bf16.mxu0 %v5492_v6  ;;  %v5502_v41 = vld [vmem:[%s6362_s3 + $0x138] sm:$0xff]   ;;  %v5727_v50 = vld [vmem:[%s6362_s3 + $0x40] sm:$0xff]  }
   0xf   : > { %554 = vst [vmem:[#allocation2 + $0x80] sm:$0xff] %v5576_v2  ;;  %555 = vst [vmem:[#allocation2 + $0x88] sm:$0x3] %v5576_v2  ;;  %s4477_s20 = sshll.u32 %s6370_s27, 7  ;;  %v5504_v60 = vld [vmem:[%s6362_s3 + $0x140] sm:$0xff]   ;;  %s293_s28 = scalar_lea.vmem %s6365_s6, %s6370_s27 }
  0x10   : > { %556 = vst [vmem:[#allocation2 + $0x90] sm:$0xff] %v5576_v2  ;;  %557 = vst [vmem:[#allocation2 + $0x98] sm:$0xff] %v5576_v2  ;;  %4779 = vmatpush3.bf16.msra.mxu1 %v5491_v5  ;;  %s5669_s29 = scalar_lea.vmem %s6359_s0, %s4477_s20  ;;  %s296_s8 = scalar_lea.vmem %s6366_s7, %s6370_s27 }
  0x11   : > { %558 = vst [vmem:[#allocation2 + $0xa0] sm:$0x3] %v5576_v2  ;;  %559 = vst [vmem:[#allocation2 + $0xa8] sm:$0xff] %v5576_v2  ;;  %4971 = vmatpush3.bf16.msra.mxu0 %v5492_v6  ;;  %4780 = vmatprep.subr.bf16.mxu1 %v5493_v8  ;;  %v4480_v14 = vld [vmem:[%s5669_s29] sm:$0xff]   ;;  %v4543_v19 = vld [vmem:[%s5669_s29 + $0x8] sm:$0xff]  }
  0x12   : > { %560 = vst [vmem:[#allocation2 + $0xb0] sm:$0xff] %v5576_v2  ;;  %561 = vst [vmem:[#allocation2 + $0xb8] sm:$0x3] %v5576_v2  ;;  %4972 = vmatprep.subr.bf16.mxu0 %v5494_v9  ;;  %v4481_v16 = vunpack.c.l.bf16 %v4480_v14  ;;  %v4482_v17 = vunpack.c.h.bf16 %v4480_v14  ;;  %v4485_v22 = vunpack.c.l.bf16 %v4543_v19  ;;  %v4486_v23 = vunpack.c.h.bf16 %v4543_v19  ;;  %v4544_v25 = vld [vmem:[%s5669_s29 + $0x10] sm:$0xff]   ;;  %v4545_v33 = vld [vmem:[%s5669_s29 + $0x18] sm:$0xff]  }
  0x13   : > { %562 = vst [vmem:[#allocation2 + $0xc0] sm:$0xff] %v5576_v2  ;;  %563 = vst [vmem:[#allocation2 + $0xc8] sm:$0xff] %v5576_v2  ;;  %v4489_v31 = vunpack.c.l.bf16 %v4544_v25  ;;  %v4490_v32 = vunpack.c.h.bf16 %v4544_v25  ;;  %v4493_v40 = vunpack.c.l.bf16 %v4545_v33  ;;  %v4546_v45 = vld [vmem:[%s5669_s29 + $0x20] sm:$0xff]   ;;  %v4494_v55 = vunpack.c.h.bf16 %v4545_v33  ;;  %v4547_v58 = vld [vmem:[%s5669_s29 + $0x28] sm:$0xff]  }
  0x14   : > { %564 = vst [vmem:[#allocation2 + $0xd0] sm:$0x3] %v5576_v2  ;;  %565 = vst [vmem:[#allocation2 + $0xd8] sm:$0xff] %v5576_v2  ;;  %4781 = vmatpush3.bf16.msra.mxu1 %v5493_v8  ;;  %v369_v20 = vmul.f32 %v4481_v16, %v5681_v15  ;;  %v370_v21 = vmul.f32 %v4482_v17, %v5681_v15  ;;  %v371_v29 = vmul.f32 %v4485_v22, %v5681_v15  ;;  %v5505_v6 = vld [vmem:[%s6362_s3 + $0x148] sm:$0xff]   ;;  %v4548_v14 = vld [vmem:[%s5669_s29 + $0x30] sm:$0xff]  }
  0x15   : > { %566 = vst [vmem:[#allocation2 + $0xe0] sm:$0xff] %v5576_v2  ;;  %567 = vst [vmem:[#allocation2 + $0xe8] sm:$0x3] %v5576_v2  ;;  %4973 = vmatpush3.bf16.msra.mxu0 %v5494_v9  ;;  %4782 = vmatprep.subr.bf16.mxu1 %v5495_v10  ;;  %v372_v30 = vmul.f32 %v4486_v23, %v5681_v15  ;;  %v373_v43 = vmul.f32 %v4489_v31, %v5681_v15  ;;  %v4497_v57 = vunpack.c.l.bf16 %v4546_v45 }
  0x16   : > { %568 = vst [vmem:[#allocation2 + $0xf0] sm:$0xff] %v5576_v2  ;;  %569 = vst [vmem:[#allocation2 + $0xf8] sm:$0xff] %v5576_v2  ;;  %4974 = vmatprep.subr.bf16.mxu0 %v5496_v11  ;;  %v408_v27 = vadd.f32 %v5686_v18, %v369_v20  ;;  %v409_v28 = vadd.f32 %v5686_v18, %v370_v21  ;;  %v410_v35 = vadd.f32 %v5686_v18, %v371_v29  ;;  %v5507_v29 = vld [vmem:[%s6362_s3 + $0x150] sm:$0xff]  }
  0x17   : > { %570 = vst [vmem:[#allocation2 + $0x100] sm:$0x3] %v5576_v2  ;;  %571 = vst [vmem:[#allocation2 + $0x108] sm:$0xff] %v5576_v2  ;;  %v411_v39 = vadd.f32 %v5686_v18, %v372_v30  ;;  %v374_v44 = vmul.f32 %v4490_v32, %v5681_v15  ;;  %v412_v52 = vadd.f32 %v5686_v18, %v373_v43  ;;  %v4498_v1 = vunpack.c.h.bf16 %v4546_v45 }
  0x18   : > { %572 = vst [vmem:[#allocation2 + $0x110] sm:$0xff] %v5576_v2  ;;  %573 = vst [vmem:[#allocation2 + $0x118] sm:$0x3] %v5576_v2  ;;  %4783 = vmatpush3.bf16.msra.mxu1 %v5495_v10  ;;  %vm441_vm0 = vcmp.ge.f32.partialorder %v408_v27, 0.0  ;;  %vm442_vm1 = vcmp.ge.f32.partialorder %v409_v28, 0.0  ;;  %v474_v37 = vmul.f32 %v5703_v34, %v408_v27  ;;  %v475_v38 = vmul.f32 %v5703_v34, %v409_v28 }
  0x19   : > { %574 = vst [vmem:[#allocation2 + $0x120] sm:$0xff] %v5576_v2  ;;  %575 = vst [vmem:[#allocation2 + $0x128] sm:$0xff] %v5576_v2  ;;  %4975 = vmatpush3.bf16.msra.mxu0 %v5496_v11  ;;  %4784 = vmatprep.subr.bf16.mxu1 %v5497_v12  ;;  %vm443_vm2 = vcmp.ge.f32.partialorder %v410_v35, 0.0  ;;  %v476_v42 = vmul.f32 %v5703_v34, %v410_v35  ;;  %vm444_vm3 = vcmp.ge.f32.partialorder %v411_v39, 0.0  ;;  %vm445_vm4 = vcmp.ge.f32.partialorder %v412_v52, 0.0 }
  0x1a   : > { %576 = vst [vmem:[#allocation2 + $0x130] sm:$0x3] %v5576_v2  ;;  %577 = vst [vmem:[#allocation2 + $0x138] sm:$0xff] %v5576_v2  ;;  %4976 = vmatprep.subr.bf16.mxu0 %v5498_v13  ;;  %v506_v46 = vsel %vm441_vm0, %v408_v27, %v474_v37  ;;  %v507_v47 = vsel %vm442_vm1, %v409_v28, %v475_v38  ;;  %v477_v48 = vmul.f32 %v5703_v34, %v411_v39  ;;  %v4549_v37 = vld [vmem:[%s5669_s29 + $0x38] sm:$0xff]  }
  0x1b   : > { %578 = vst [vmem:[#allocation2 + $0x140] sm:$0xff] %v5576_v2  ;;  %579 = vst [vmem:[#allocation2 + $0x148] sm:$0x3] %v5576_v2  ;;  %v5722_v49 = vpack.c.bf16 %v507_v47, %v506_v46  ;;  %v508_v51 = vsel %vm443_vm2, %v410_v35, %v476_v42  ;;  %v413_v53 = vadd.f32 %v5686_v18, %v374_v44  ;;  %v4501_v4 = vunpack.c.l.bf16 %v4547_v58  ;;  %v5509_v42 = vld [vmem:[%s6362_s3 + $0x50] sm:$0xff]  }
  0x1c   : > { %580 = vst [vmem:[#allocation2 + $0x150] sm:$0xff] %v5576_v2  ;;  %581 = vst [vmem:[#allocation2 + $0x158] sm:$0xff] %v5576_v2  ;;  %4785 = vmatpush3.bf16.msra.mxu1 %v5497_v12  ;;  %v509_v54 = vsel %vm444_vm3, %v411_v39, %v477_v48  ;;  %v375_v56 = vmul.f32 %v4493_v40, %v5681_v15  ;;  %v478_v61 = vmul.f32 %v5703_v34, %v412_v52 }
  0x1d   : > { %582 = vst [vmem:[#allocation2 + $0x160] sm:$0x3] %v5576_v2  ;;  %583 = vst [vmem:[#allocation2 + $0x168] sm:$0xff] %v5576_v2  ;;  %4977 = vmatpush3.bf16.msra.mxu0 %v5498_v13  ;;  %4786 = vmatprep.subr.bf16.mxu1 %v5499_v24  ;;  %v5734_v59 = vpack.c.bf16 %v509_v54, %v508_v51  ;;  %vm446_vm5 = vcmp.ge.f32.partialorder %v413_v53, 0.0  ;;  %v479_v62 = vmul.f32 %v5703_v34, %v413_v53 }
  0x1e   : > { %584 = vst [vmem:[#allocation2 + $0x170] sm:$0xff] %v5576_v2  ;;  %585 = vst [vmem:[#allocation2 + $0x178] sm:$0x3] %v5576_v2  ;;  %4978 = vmatprep.subr.bf16.mxu0 %v5500_v26  ;;  %4982 = vmatprep.mubr.bf16.mxu0 %v5722_v49  ;;  %v376_v63 = vmul.f32 %v4494_v55, %v5681_v15  ;;  %v414_v0 = vadd.f32 %v5686_v18, %v375_v56  ;;  %v4502_v5 = vunpack.c.h.bf16 %v4547_v58 }
  0x1f   : > { %586 = vst [vmem:[#allocation2 + $0x180] sm:$0xff] %v5576_v2  ;;  %587 = vst [vmem:[#allocation2 + $0x188] sm:$0xff] %v5576_v2  ;;  %v377_v3 = vmul.f32 %v4497_v57, %v5681_v15  ;;  %v511_v7 = vsel %vm446_vm5, %v413_v53, %v479_v62  ;;  %v378_v11 = vmul.f32 %v4498_v1, %v5681_v15  ;;  %v4505_v32 = vunpack.c.l.bf16 %v4548_v14 }
  0x20   : > { %588 = vst [vmem:[#allocation2 + $0x190] sm:$0x3] %v5576_v2  ;;  %589 = vst [vmem:[#allocation2 + $0x198] sm:$0xff] %v5576_v2  ;;  %4787 = vmatpush3.bf16.msra.mxu1 %v5499_v24  ;;  %v415_v8 = vadd.f32 %v5686_v18, %v376_v63  ;;  %vm447_vm6 = vcmp.ge.f32.partialorder %v414_v0, 0.0  ;;  %v480_v9 = vmul.f32 %v5703_v34, %v414_v0  ;;  %v5506_v24 = vld [vmem:[%s6362_s3 + $0x48] sm:$0xff]   ;;  %v4506_v44 = vunpack.c.h.bf16 %v4548_v14 }
  0x21   : > { %590 = vst [vmem:[#allocation2 + $0x1a0] sm:$0xff] %v5576_v2  ;;  %591 = vst [vmem:[#allocation2 + $0x1a8] sm:$0x3] %v5576_v2  ;;  %4979 = vmatpush3.bf16.msra.mxu0 %v5500_v26  ;;  %4788 = vmatprep.subr.bf16.mxu1 %v5501_v36  ;;  %v510_v2 = vsel %vm445_vm4, %v412_v52, %v478_v61  ;;  %v416_v12 = vadd.f32 %v5686_v18, %v377_v3  ;;  %v4550_v52 = vld [vmem:[%s5669_s29 + $0x40] sm:$0xff]  }
  0x22   : > { %593 = vst [vmem:[#allocation2 + $0x19] sm:$0xff] %v506_v46  ;;  %594 = vst [vmem:[#allocation2 + $0x21] sm:$0xff] %v507_v47  ;;  %4980 = vmatprep.subr.bf16.mxu0 %v5502_v41  ;;  %v5750_v10 = vpack.c.bf16 %v511_v7, %v510_v2  ;;  %v379_v13 = vmul.f32 %v4501_v4, %v5681_v15  ;;  %vm448_vm7 = vcmp.ge.f32.partialorder %v415_v8, 0.0  ;;  %v4513_v1 = vunpack.c.l.bf16 %v4550_v52 }
  0x23   : > { %595 = vst [vmem:[#allocation2 + $0x31] sm:$0xff] %v508_v51  ;;  %596 = vst [vmem:[#allocation2 + $0x39] sm:$0xff] %v509_v54  ;;  %v481_v19 = vmul.f32 %v5703_v34, %v415_v8  ;;  %v512_v20 = vsel %vm447_vm6, %v414_v0, %v480_v9  ;;  %v380_v21 = vmul.f32 %v4502_v5, %v5681_v15  ;;  %vm449_vm8 = vcmp.ge.f32.partialorder %v416_v12, 0.0  ;;  %v5508_v54 = vld [vmem:[%s6362_s3 + $0x158] sm:$0xff]   ;;  %v5510_v9 = vld [vmem:[%s6362_s3 + $0x160] sm:$0xff]  }
  0x24   : > { %4789 = vmatpush3.bf16.msra.mxu1 %v5501_v36  ;;  %597 = vst [vmem:[#allocation2 + $0x49] sm:$0xff] %v510_v2  ;;  %598 = vst [vmem:[#allocation2 + $0x51] sm:$0xff] %v511_v7  ;;  %v417_v25 = vadd.f32 %v5686_v18, %v378_v11  ;;  %v482_v26 = vmul.f32 %v5703_v34, %v416_v12  ;;  %v418_v30 = vadd.f32 %v5686_v18, %v379_v13  ;;  %v5512_v0 = vld [vmem:[%s6362_s3 + $0x58] sm:$0xff]   ;;  %v4551_v7 = vld [vmem:[%s5669_s29 + $0x48] sm:$0xff]  }
  0x25   : > { %4981 = vmatpush3.bf16.msra.mxu0 %v5502_v41  ;;  %4822 = vmatprep.subr.bf16.mxu1 %v5727_v50  ;;  %599 = vst [vmem:[#allocation2 + $0x61] sm:$0xff] %v512_v20  ;;  %v513_v28 = vsel %vm448_vm7, %v415_v8, %v481_v19  ;;  %v419_v31 = vadd.f32 %v5686_v18, %v380_v21  ;;  %v4510_v51 = vunpack.c.h.bf16 %v4549_v37 }
  0x26   : > { %5014 = vmatprep.subr.bf16.mxu0 %v5504_v60  ;;  %600 = vst [vmem:[#allocation2 + $0x69] sm:$0xff] %v513_v28  ;;  %v5770_v35 = vpack.c.bf16 %v513_v28, %v512_v20  ;;  %vm450_vm9 = vcmp.ge.f32.partialorder %v417_v25, 0.0  ;;  %v483_v36 = vmul.f32 %v5703_v34, %v417_v25  ;;  %v514_v38 = vsel %vm449_vm8, %v416_v12, %v482_v26 }
  0x27   : > { %vm451_vm10 = vcmp.ge.f32.partialorder %v418_v30, 0.0  ;;  %vm452_vm11 = vcmp.ge.f32.partialorder %v419_v31, 0.0  ;;  %v484_v39 = vmul.f32 %v5703_v34, %v418_v30  ;;  %601 = vst [vmem:[#allocation2 + $0x79] sm:$0xff] %v514_v38  ;;  %v485_v43 = vmul.f32 %v5703_v34, %v419_v31 }
  0x28   : > { %4983 = vmatmul.mubr.bf16.vlgmr.msra.gmra.mrb[0].mxu0 %v5734_v59  ;;  %v515_v41 = vsel %vm450_vm9, %v417_v25, %v483_v36  ;;  %v381_v45 = vmul.f32 %v4505_v32, %v5681_v15  ;;  %v382_v56 = vmul.f32 %v4506_v44, %v5681_v15  ;;  %v384_v61 = vmul.f32 %v4510_v51, %v5681_v15 }
  0x29   : > { %v659_v16 = vld [vmem:[#allocation2 + $0x18] sm:$0xff]  ;;  %v660_v17 = vld [vmem:[#allocation2 + $0x20] sm:$0xff]  ;;  %5015 = vmatpush3.bf16.msra.mxu0 %v5504_v60  ;;  %4986 = vmatprep.mubr.bf16.mxu0 %v5750_v10  ;;  %602 = vst [vmem:[#allocation2 + $0x81] sm:$0xff] %v515_v41  ;;  %v5782_v47 = vpack.c.bf16 %v515_v41, %v514_v38  ;;  %v516_v48 = vsel %vm451_vm10, %v418_v30, %v484_v39  ;;  %v5511_v30 = vld [vmem:[%s6362_s3 + $0x168] sm:$0xff]  }
  0x2a   : > { %v690_v22 = vpack.c.bf16 %v660_v17, %v659_v16  ;;  %v661_v23 = vld [vmem:[#allocation2 + $0x30] sm:$0xff]  ;;  %v662_v27 = vld [vmem:[#allocation2 + $0x38] sm:$0xff]  ;;  %5016 = vmatprep.subr.bf16.mxu0 %v5505_v6  ;;  %v517_v55 = vsel %vm452_vm11, %v419_v31, %v485_v43  ;;  %603 = vst [vmem:[#allocation2 + $0x91] sm:$0xff] %v516_v48  ;;  %v420_v57 = vadd.f32 %v5686_v18, %v381_v45  ;;  %v2507_v39 = vld [vmem:[#allocation2 + $0x22] sm:$0xff] }
  0x2b   : > { %v691_v33 = vpack.c.bf16 %v662_v27, %v661_v23  ;;  %v663_v40 = vld [vmem:[#allocation2 + $0x48] sm:$0xff]  ;;  %v664_v46 = vld [vmem:[#allocation2 + $0x50] sm:$0xff]  ;;  %604 = vst [vmem:[#allocation2 + $0x99] sm:$0xff] %v517_v55  ;;  %v421_v62 = vadd.f32 %v5686_v18, %v382_v56  ;;  %v5803_v3 = vpack.c.bf16 %v517_v55, %v516_v48  ;;  %v423_v5 = vadd.f32 %v5686_v18, %v384_v61  ;;  %v2506_v32 = vld [vmem:[#allocation2 + $0x1a] sm:$0xff] }
  0x2c   : > { %4791 = vmatmul.mubr.bf16.vlgmr.msra.gmra.mrb[0].mxu1 %v690_v22  ;;  %v5786_v53 = vpack.c.bf16 %v664_v46, %v663_v40  ;;  %v665_v58 = vld [vmem:[#allocation2 + $0x60] sm:$0xff]  ;;  %vm453_vm12 = vcmp.ge.f32.partialorder %v420_v57, 0.0  ;;  %v486_v63 = vmul.f32 %v5703_v34, %v420_v57  ;;  %v385_v20 = vmul.f32 %v4513_v1, %v5681_v15  ;;  %v5517_v45 = vld [vmem:[%s6362_s3 + $0x68] sm:$0xff]   ;;  %v5873_v1 = vld [vmem:[%s6362_s3 + $0x178] sm:$0xff]  }
  0x2d   : > { %4823 = vmatpush3.bf16.msra.mxu1 %v5727_v50  ;;  %4794 = vmatprep.mubr.bf16.mxu1 %v691_v33  ;;  %v4509_v50 = vunpack.c.l.bf16 %v4549_v37  ;;  %v666_v2 = vld [vmem:[#allocation2 + $0x68] sm:$0xff]  ;;  %vm454_vm13 = vcmp.ge.f32.partialorder %v421_v62, 0.0  ;;  %v487_v11 = vmul.f32 %v5703_v34, %v421_v62  ;;  %vm456_vm15 = vcmp.ge.f32.partialorder %v423_v5, 0.0  ;;  %v5515_v22 = vld [vmem:[%s6362_s3 + $0x60] sm:$0xff]  }
  0x2e   : > { %4824 = vmatprep.subr.bf16.mxu1 %v5506_v24  ;;  %5017 = vmatpush3.bf16.msra.mxu0 %v5505_v6  ;;  %v4514_v6 = vunpack.c.h.bf16 %v4550_v52  ;;  %v5809_v8 = vpack.c.bf16 %v666_v2, %v665_v58  ;;  %v518_v12 = vsel %vm453_vm12, %v420_v57, %v486_v63  ;;  %v667_v13 = vld [vmem:[#allocation2 + $0x78] sm:$0xff]  ;;  %v489_v16 = vmul.f32 %v5703_v34, %v423_v5 }
  0x2f   : > { %5018 = vmatprep.subr.bf16.mxu0 %v5507_v29  ;;  %v383_v60 = vmul.f32 %v4509_v50, %v5681_v15  ;;  %605 = vst [vmem:[#allocation2 + $0xa9] sm:$0xff] %v518_v12  ;;  %v519_v19 = vsel %vm454_vm13, %v421_v62, %v487_v11  ;;  %v4517_v23 = vunpack.c.l.bf16 %v4551_v7  ;;  %v424_v33 = vadd.f32 %v5686_v18, %v385_v20  ;;  %v2510_v20 = vld [vmem:[#allocation2 + $0x4a] sm:$0xff] }
  0x30   : > { %4987 = vmatmul.mubr.bf16.gmra.mrb[4].mxu0 %v5770_v35  ;;  %v668_v17 = vld [vmem:[#allocation2 + $0x80] sm:$0xff]  ;;  %v386_v21 = vmul.f32 %v4514_v6, %v5681_v15  ;;  %606 = vst [vmem:[#allocation2 + $0xb1] sm:$0xff] %v519_v19  ;;  %v5825_v26 = vpack.c.bf16 %v519_v19, %v518_v12  ;;  %v521_v28 = vsel %vm456_vm15, %v423_v5, %v489_v16  ;;  %v4518_v37 = vunpack.c.h.bf16 %v4551_v7  ;;  %v5519_v7 = vld [vmem:[%s6362_s3 + $0x70] sm:$0xff]  }
  0x31   : > { %4825 = vmatpush3.bf16.msra.mxu1 %v5506_v24  ;;  %4990 = vmatprep.mubr.bf16.mxu0 %v5782_v47  ;;  %v422_v4 = vadd.f32 %v5686_v18, %v383_v60  ;;  %v4552_v24 = vld [vmem:[%s5669_s29 + $0x50] sm:$0xff]   ;;  %608 = vst [vmem:[#allocation2 + $0xc9] sm:$0xff] %v521_v28  ;;  %v387_v40 = vmul.f32 %v4517_v23, %v5681_v15  ;;  %vm457_vm0 = vcmp.ge.f32.partialorder %v424_v33, 0.0  ;;  %v4554_v6 = vld [vmem:[%s5669_s29 + $0x60] sm:$0xff]  }
  0x32   : > { %4826 = vmatprep.subr.bf16.mxu1 %v5509_v42  ;;  %5019 = vmatpush3.bf16.msra.mxu0 %v5507_v29  ;;  %v669_v25 = vld [vmem:[#allocation2 + $0x90] sm:$0xff]  ;;  %v5829_v29 = vpack.c.bf16 %v668_v17, %v667_v13  ;;  %v670_v31 = vld [vmem:[#allocation2 + $0x98] sm:$0xff]  ;;  %v425_v36 = vadd.f32 %v5686_v18, %v386_v21  ;;  %v4521_v41 = vunpack.c.l.bf16 %v4552_v24  ;;  %v490_v43 = vmul.f32 %v5703_v34, %v424_v33 }
  0x33   : > { %5020 = vmatprep.subr.bf16.mxu0 %v5508_v54  ;;  %vm455_vm14 = vcmp.ge.f32.partialorder %v422_v4, 0.0  ;;  %v488_v14 = vmul.f32 %v5703_v34, %v422_v4  ;;  %v5836_v38 = vpack.c.bf16 %v670_v31, %v669_v25  ;;  %v388_v46 = vmul.f32 %v4518_v37, %v5681_v15  ;;  %v2508_v13 = vld [vmem:[#allocation2 + $0x32] sm:$0xff]  ;;  %v5516_v37 = vld [vmem:[%s6362_s3 + $0x180] sm:$0xff]  }
  0x34   : > { %4795 = vmatmul.mubr.bf16.gmra.mrb[4].mxu1 %v5786_v53  ;;  %vm458_vm1 = vcmp.ge.f32.partialorder %v425_v36, 0.0  ;;  %v491_v44 = vmul.f32 %v5703_v34, %v425_v36  ;;  %v426_v48 = vadd.f32 %v5686_v18, %v387_v40  ;;  %v4522_v50 = vunpack.c.h.bf16 %v4552_v24  ;;  %v2511_v21 = vld [vmem:[#allocation2 + $0x52] sm:$0xff] }
  0x35   : > { %4827 = vmatpush3.bf16.msra.mxu1 %v5509_v42  ;;  %4798 = vmatprep.mubr.bf16.mxu1 %v5809_v8  ;;  %v520_v27 = vsel %vm455_vm14, %v422_v4, %v488_v14  ;;  %v4553_v42 = vld [vmem:[%s5669_s29 + $0x58] sm:$0xff]   ;;  %v389_v51 = vmul.f32 %v4521_v41, %v5681_v15  ;;  %v5854_v55 = vpack.c.bf16 %v2507_v39, %v2506_v32 }
  0x36   : > { %4828 = vmatprep.subr.bf16.mxu1 %v5512_v0  ;;  %5021 = vmatpush3.bf16.msra.mxu0 %v5508_v54  ;;  %607 = vst [vmem:[#allocation2 + $0xc1] sm:$0xff] %v520_v27  ;;  %v671_v52 = vld [vmem:[#allocation2 + $0xa8] sm:$0xff]  ;;  %v5513_v54 = vld [vmem:[%s6362_s3 + $0x170] sm:$0xff]   ;;  %v5857_v56 = vsel %vm457_vm0, %v424_v33, %v490_v43  ;;  %v5860_v57 = vsel %vm458_vm1, %v425_v36, %v491_v44  ;;  %v4525_v58 = vunpack.c.l.bf16 %v4553_v42  ;;  %vm459_vm2 = vcmp.ge.f32.partialorder %v426_v48, 0.0  ;;  %v2509_v14 = vld [vmem:[#allocation2 + $0x3a] sm:$0xff] }
  0x37   : > { %5022 = vmatprep.subr.bf16.mxu0 %v5510_v9  ;;  %609 = vst [vmem:[#allocation2 + $0xd9] sm:$0xff] %v5857_v56  ;;  %610 = vst [vmem:[#allocation2 + $0xe1] sm:$0xff] %v5860_v57  ;;  %v427_v60 = vadd.f32 %v5686_v18, %v388_v46  ;;  %v492_v61 = vmul.f32 %v5703_v34, %v426_v48  ;;  %v390_v62 = vmul.f32 %v4522_v50, %v5681_v15  ;;  %v672_v63 = vld [vmem:[#allocation2 + $0xb0] sm:$0xff]  ;;  %v5521_v36 = vld [vmem:[%s6362_s3 + $0x78] sm:$0xff]  }
  0x38   : > { %4991 = vmatmul.mubr.bf16.gmra.mrb[8].mxu0 %v5803_v3  ;;  %v428_v2 = vadd.f32 %v5686_v18, %v389_v51  ;;  %v4526_v4 = vunpack.c.h.bf16 %v4553_v42  ;;  %v391_v5 = vmul.f32 %v4525_v58, %v5681_v15  ;;  %v4530_v33 = vunpack.c.h.bf16 %v4554_v6  ;;  %v4556_v50 = vld [vmem:[%s5669_s29 + $0x70] sm:$0xff]   ;;  %v5518_v58 = vld [vmem:[%s6362_s3 + $0x188] sm:$0xff]  }
  0x39   : > { %4829 = vmatpush3.bf16.msra.mxu1 %v5512_v0  ;;  %4994 = vmatprep.mubr.bf16.mxu0 %v5825_v26  ;;  %v5868_v0 = vpack.c.bf16 %v521_v28, %v520_v27  ;;  %vm460_vm3 = vcmp.ge.f32.partialorder %v427_v60, 0.0  ;;  %v493_v16 = vmul.f32 %v5703_v34, %v427_v60  ;;  %v5885_v17 = vsel %vm459_vm2, %v426_v48, %v492_v61 }
  0x3a   : > { %4830 = vmatprep.subr.bf16.mxu1 %v5515_v22  ;;  %5023 = vmatpush3.bf16.msra.mxu0 %v5510_v9  ;;  %v5881_v9 = vpack.c.bf16 %v672_v63, %v671_v52  ;;  %611 = vst [vmem:[#allocation2 + $0xf1] sm:$0xff] %v5885_v17  ;;  %vm461_vm4 = vcmp.ge.f32.partialorder %v428_v2, 0.0  ;;  %v494_v23 = vmul.f32 %v5703_v34, %v428_v2  ;;  %v4529_v28 = vunpack.c.l.bf16 %v4554_v6 }
  0x3b   : > { %5024 = vmatprep.subr.bf16.mxu0 %v5511_v30  ;;  %v5892_v24 = vsel %vm460_vm3, %v427_v60, %v493_v16  ;;  %v392_v25 = vmul.f32 %v4526_v4, %v5681_v15  ;;  %v430_v27 = vadd.f32 %v5686_v18, %v391_v5  ;;  %v5915_v44 = vpack.c.bf16 %v2509_v14, %v2508_v13  ;;  %v2512_v5 = vld [vmem:[#allocation2 + $0x62] sm:$0xff] }
  0x3c   : > { %4799 = vmatmul.mubr.bf16.gmra.mrb[8].mxu1 %v5829_v29  ;;  %612 = vst [vmem:[#allocation2 + $0xf9] sm:$0xff] %v5892_v24  ;;  %v5900_v32 = vsel %vm461_vm4, %v428_v2, %v494_v23  ;;  %v393_v41 = vmul.f32 %v4529_v28, %v5681_v15  ;;  %v394_v46 = vmul.f32 %v4530_v33, %v5681_v15  ;;  %v5952_v23 = vld [vmem:[%s6362_s3 + $0x80] sm:$0xff]  }
  0x3d   : > { %4802 = vmatprep.mubr.bf16.mxu1 %v5836_v38  ;;  %4831 = vmatpush3.bf16.msra.mxu1 %v5515_v22  ;;  %v673_v11 = vld [vmem:[#allocation2 + $0xc0] sm:$0xff]  ;;  %v674_v12 = vld [vmem:[#allocation2 + $0xc8] sm:$0xff]  ;;  %v429_v22 = vadd.f32 %v5686_v18, %v390_v62  ;;  %613 = vst [vmem:[#allocation2 + $0x109] sm:$0xff] %v5900_v32  ;;  %v431_v39 = vadd.f32 %v5686_v18, %v392_v25  ;;  %vm463_vm6 = vcmp.ge.f32.partialorder %v430_v27, 0.0 }
  0x3e   : > { %4832 = vmatprep.subr.bf16.mxu1 %v5517_v45  ;;  %5025 = vmatpush3.bf16.msra.mxu0 %v5511_v30  ;;  %v5887_v19 = vpack.c.bf16 %v674_v12, %v673_v11  ;;  %v4555_v30 = vld [vmem:[%s5669_s29 + $0x68] sm:$0xff]   ;;  %v496_v40 = vmul.f32 %v5703_v34, %v430_v27  ;;  %v675_v42 = vld [vmem:[#allocation2 + $0xd8] sm:$0xff]  ;;  %v676_v43 = vld [vmem:[#allocation2 + $0xe0] sm:$0xff]  ;;  %v5923_v51 = vpack.c.bf16 %v2511_v21, %v2510_v20  ;;  %v4538_v11 = vunpack.c.h.bf16 %v4556_v50 }
  0x3f   : > { %5026 = vmatprep.subr.bf16.mxu0 %v5513_v54  ;;  %vm462_vm5 = vcmp.ge.f32.partialorder %v429_v22, 0.0  ;;  %v495_v31 = vmul.f32 %v5703_v34, %v429_v22  ;;  %v4533_v48 = vunpack.c.l.bf16 %v4555_v30  ;;  %vm464_vm7 = vcmp.ge.f32.partialorder %v431_v39, 0.0 }
  0x40   : > { %4995 = vmatmul.mubr.bf16.gmra.mrb[12].mxu0 %v5868_v0  ;;  %v497_v52 = vmul.f32 %v5703_v34, %v431_v39  ;;  %v432_v60 = vadd.f32 %v5686_v18, %v393_v41  ;;  %v433_v61 = vadd.f32 %v5686_v18, %v394_v46  ;;  %v4534_v62 = vunpack.c.h.bf16 %v4555_v30  ;;  %v4557_v30 = vld [vmem:[%s5669_s29 + $0x78] sm:$0xff]   ;;  %s4478_s29 = sshll.u32 %s6370_s27, 8 }
  0x41   : > { %4833 = vmatpush3.bf16.msra.mxu1 %v5517_v45  ;;  %5030 = vmatprep.mubr.bf16.mxu0 %v5854_v55  ;;  %v5918_v45 = vsel %vm462_vm5, %v429_v22, %v495_v31  ;;  %v395_v63 = vmul.f32 %v4533_v48, %v5681_v15  ;;  %v5938_v2 = vpack.c.bf16 %v676_v43, %v675_v42  ;;  %v677_v4 = vld [vmem:[#allocation2 + $0xf0] sm:$0xff]  ;;  %v2514_v41 = vld [vmem:[#allocation2 + $0x7a] sm:$0xff]  ;;  %v2515_v42 = vld [vmem:[#allocation2 + $0x82] sm:$0xff]  ;;  %s6309_s23 = scalar_lea.vmem %s6364_s5, %s4478_s29 }
  0x42   : > { %4834 = vmatprep.subr.bf16.mxu1 %v5519_v7  ;;  %5027 = vmatpush3.bf16.msra.mxu0 %v5513_v54  ;;  %614 = vst [vmem:[#allocation2 + $0x111] sm:$0xff] %v5918_v45  ;;  %v5928_v54 = vsel %vm463_vm6, %v430_v27, %v496_v40  ;;  %v5940_v6 = vsel %vm464_vm7, %v431_v39, %v497_v52  ;;  %vm465_vm8 = vcmp.ge.f32.partialorder %v432_v60, 0.0  ;;  %vm466_vm9 = vcmp.ge.f32.partialorder %v433_v61, 0.0  ;;  %v5520_v31 = vld [vmem:[%s6362_s3 + $0x190] sm:$0xff]  }
  0x43   : > { %5028 = vmatprep.subr.bf16.mxu0 %v5873_v1  ;;  %615 = vst [vmem:[#allocation2 + $0x121] sm:$0xff] %v5928_v54  ;;  %616 = vst [vmem:[#allocation2 + $0x129] sm:$0xff] %v5940_v6  ;;  %v498_v12 = vmul.f32 %v5703_v34, %v432_v60  ;;  %v499_v13 = vmul.f32 %v5703_v34, %v433_v61  ;;  %v678_v14 = vld [vmem:[#allocation2 + $0xf8] sm:$0xff]  ;;  %v396_v16 = vmul.f32 %v4534_v62, %v5681_v15 }
  0x44   : > { %4803 = vmatmul.mubr.bf16.gmra.mrb[12].mxu1 %v5881_v9  ;;  %v434_v20 = vadd.f32 %v5686_v18, %v395_v63  ;;  %v398_v22 = vmul.f32 %v4538_v11, %v5681_v15  ;;  %v5955_v25 = vpack.c.bf16 %v678_v14, %v677_v4  ;;  %v5983_v4 = vpack.c.bf16 %v2515_v42, %v2514_v41  ;;  %v5522_v14 = vld [vmem:[%s6362_s3 + $0x198] sm:$0xff]   ;;  %v2518_v42 = vld [vmem:[#allocation2 + $0xaa] sm:$0xff] }
  0x45   : > { %4806 = vmatprep.mubr.bf16.mxu1 %v5887_v19  ;;  %4835 = vmatpush3.bf16.msra.mxu1 %v5519_v7  ;;  %v4537_v7 = vunpack.c.l.bf16 %v4556_v50  ;;  %v5957_v27 = vsel %vm465_vm8, %v432_v60, %v498_v12  ;;  %v5959_v28 = vsel %vm466_vm9, %v433_v61, %v499_v13  ;;  %v435_v33 = vadd.f32 %v5686_v18, %v396_v16 }
  0x46   : > { %4836 = vmatprep.subr.bf16.mxu1 %v5521_v36  ;;  %5029 = vmatpush3.bf16.msra.mxu0 %v5873_v1  ;;  %v2513_v1 = vld [vmem:[#allocation2 + $0x6a] sm:$0xff]  ;;  %617 = vst [vmem:[#allocation2 + $0x139] sm:$0xff] %v5957_v27  ;;  %618 = vst [vmem:[#allocation2 + $0x141] sm:$0xff] %v5959_v28  ;;  %vm467_vm10 = vcmp.ge.f32.partialorder %v434_v20, 0.0  ;;  %v437_v43 = vadd.f32 %v5686_v18, %v398_v22  ;;  %v4541_v60 = vunpack.c.l.bf16 %v4557_v30 }
  0x47   : > { %5062 = vmatprep.subr.bf16.mxu0 %v5516_v37  ;;  %v397_v21 = vmul.f32 %v4537_v7, %v5681_v15  ;;  %v5972_v40 = vpack.c.bf16 %v2513_v1, %v2512_v5  ;;  %vm468_vm11 = vcmp.ge.f32.partialorder %v435_v33, 0.0  ;;  %v501_v50 = vmul.f32 %v5703_v34, %v435_v33 }
  0x48   : > { %vm470_vm13 = vcmp.ge.f32.partialorder %v437_v43, 0.0  ;;  %v503_v62 = vmul.f32 %v5703_v34, %v437_v43  ;;  %v4542_v7 = vunpack.c.h.bf16 %v4557_v30  ;;  %v1068_v22 = vpack.c.bf16 %v5892_v24, %v5885_v17  ;;  %v1397_v17 = vld [vmem:[#allocation2 + $0xa] sm:$0xff]  ;;  %v5548_v24 = vld [vmem:[%s6362_s3 + $0x200] sm:$0xff]  }
  0x49   : > { %4837 = vmatpush3.bf16.msra.mxu1 %v5521_v36  ;;  %5031 = vmatmul.mubr.bf16.vlgmr.msra.gmra.mrb[0].mxu0 %v5915_v44  ;;  %v500_v36 = vmul.f32 %v5703_v34, %v434_v20  ;;  %v436_v39 = vadd.f32 %v5686_v18, %v397_v21  ;;  %v680_v46 = vld [vmem:[#allocation2 + $0x110] sm:$0xff]  ;;  %v5985_v5 = vsel %vm468_vm11, %v435_v33, %v501_v50 }
  0x4a   : > { %5063 = vmatpush3.bf16.msra.mxu0 %v5516_v37  ;;  %5034 = vmatprep.mubr.bf16.mxu0 %v5923_v51  ;;  %v679_v37 = vld [vmem:[#allocation2 + $0x108] sm:$0xff]  ;;  %v681_v48 = vld [vmem:[#allocation2 + $0x120] sm:$0xff]  ;;  %620 = vst [vmem:[#allocation2 + $0x159] sm:$0xff] %v5985_v5  ;;  %v535_v13 = vsel %vm470_vm13, %v437_v43, %v503_v62  ;;  %v400_v16 = vmul.f32 %v4542_v7, %v5681_v15  ;;  %v2516_v21 = vld [vmem:[#allocation2 + $0x92] sm:$0xff] }
  0x4b   : > { %5064 = vmatprep.subr.bf16.mxu0 %v5518_v58  ;;  %v5977_v52 = vsel %vm467_vm10, %v434_v20, %v500_v36  ;;  %4870 = vmatprep.subr.bf16.mxu1 %v5952_v23  ;;  %vm469_vm12 = vcmp.ge.f32.partialorder %v436_v39, 0.0  ;;  %v502_v61 = vmul.f32 %v5703_v34, %v436_v39  ;;  %v682_v63 = vld [vmem:[#allocation2 + $0x128] sm:$0xff]  ;;  %v5987_v11 = vpack.c.bf16 %v680_v46, %v679_v37  ;;  %v2519_v43 = vld [vmem:[#allocation2 + $0xb2] sm:$0xff]  ;;  %v2525_v36 = vld [vmem:[#allocation2 + $0xfa] sm:$0xff] }
  0x4c   : > { %4807 = vmatmul.mubr.bf16.gmra.mrb[16].mxu1 %v5938_v2  ;;  %619 = vst [vmem:[#allocation2 + $0x151] sm:$0xff] %v5977_v52  ;;  %v5993_v1 = vpack.c.bf16 %v682_v63, %v681_v48  ;;  %622 = vst [vmem:[#allocation2 + $0x171] sm:$0xff] %v535_v13  ;;  %v1067_v20 = vpack.c.bf16 %v5860_v57, %v5857_v56  ;;  %v1069_v30 = vpack.c.bf16 %v5918_v45, %v5900_v32  ;;  %v2524_v46 = vld [vmem:[#allocation2 + $0xf2] sm:$0xff]  ;;  %v5541_v32 = vld [vmem:[%s6362_s3 + $0xc8] sm:$0xff]  }
  0x4d   : > { %4810 = vmatprep.mubr.bf16.mxu1 %v5955_v25  ;;  %v534_v12 = vsel %vm469_vm12, %v436_v39, %v502_v61  ;;  %v1070_v33 = vpack.c.bf16 %v5940_v6, %v5928_v54  ;;  %v5524_v39 = vld [vmem:[%s6362_s3 + $0x1a0] sm:$0xff]   ;;  %v439_v41 = vadd.f32 %v5686_v18, %v400_v16  ;;  %v6024_v7 = vpack.c.bf16 %v2519_v43, %v2518_v42  ;;  %v5526_v16 = vld [vmem:[%s6362_s3 + $0x1a8] sm:$0xff]   ;;  %v5544_v56 = vld [vmem:[%s6362_s3 + $0x1f0] sm:$0xff]  }
  0x4e   : > { %5065 = vmatpush3.bf16.msra.mxu0 %v5518_v58  ;;  %621 = vst [vmem:[#allocation2 + $0x169] sm:$0xff] %v534_v12  ;;  %v399_v58 = vmul.f32 %v4541_v60, %v5681_v15  ;;  %v2517_v15 = vld [vmem:[#allocation2 + $0x9a] sm:$0xff]  ;;  %v6017_v48 = vpack.c.bf16 %v535_v13, %v534_v12  ;;  %v6368_v57 = vpack.c.bf16 %v5985_v5, %v5977_v52  ;;  %v5543_v45 = vld [vmem:[%s6362_s3 + $0xd0] sm:$0xff]  }
  0x4f   : > { %5066 = vmatprep.subr.bf16.mxu0 %v5520_v31  ;;  %v684_v50 = vld [vmem:[#allocation2 + $0x140] sm:$0xff]  ;;  %vm472_vm15 = vcmp.ge.f32.partialorder %v439_v41, 0.0  ;;  %v6022_v61 = vpack.c.bf16 %v2517_v15, %v2516_v21  ;;  %v2521_v15 = vld [vmem:[#allocation2 + $0xca] sm:$0xff]  ;;  %v5545_v54 = vld [vmem:[%s6362_s3 + $0xd8] sm:$0xff]  }
  0x50   : > { %v438_v37 = vadd.f32 %v5686_v18, %v399_v58  ;;  %v505_v18 = vmul.f32 %v5703_v34, %v439_v41  ;;  %v2520_v21 = vld [vmem:[#allocation2 + $0xc2] sm:$0xff]  ;;  %v5551_v52 = vld [vmem:[%s6362_s3 + $0xf0] sm:$0xff]  }
  0x51   : > { %5035 = vmatmul.mubr.bf16.gmra.mrb[4].mxu0 %v5972_v40  ;;  %v1026_v43 = vld [vmem:[#allocation2 + $0x1] sm:$0xff] }
  0x52   : > { %5038 = vmatprep.mubr.bf16.mxu0 %v5983_v4  ;;  %5067 = vmatpush3.bf16.msra.mxu0 %v5520_v31  ;;  %v683_v31 = vld [vmem:[#allocation2 + $0x138] sm:$0xff]  ;;  %vm471_vm14 = vcmp.ge.f32.partialorder %v438_v37, 0.0  ;;  %v504_v60 = vmul.f32 %v5703_v34, %v438_v37  ;;  %v6028_v12 = vsel %vm472_vm15, %v439_v41, %v505_v18  ;;  %v2523_v41 = vld [vmem:[#allocation2 + $0xe2] sm:$0xff] }
  0x53   : > { %5068 = vmatprep.subr.bf16.mxu0 %v5522_v14  ;;  %v685_v62 = vld [vmem:[#allocation2 + $0x150] sm:$0xff]  ;;  %v686_v63 = vld [vmem:[#allocation2 + $0x158] sm:$0xff]  ;;  %v6030_v13 = vpack.c.bf16 %v684_v50, %v683_v31  ;;  %624 = vst [vmem:[#allocation2 + $0x189] sm:$0xff] %v6028_v12  ;;  %v6046_v50 = vpack.c.bf16 %v2521_v15, %v2520_v21  ;;  %v6060_v21 = vld [vmem:[%s6362_s3 + $0x1c0] sm:$0xff]  }
  0x54   : > { %4811 = vmatmul.mubr.bf16.gmra.mrb[20].mxu1 %v5987_v11  ;;  %v6026_v58 = vsel %vm471_vm14, %v438_v37, %v504_v60  ;;  %v6037_v34 = vpack.c.bf16 %v686_v63, %v685_v62  ;;  %v5528_v37 = vld [vmem:[%s6362_s3 + $0x1b0] sm:$0xff]  }
  0x55   : > { %4814 = vmatprep.mubr.bf16.mxu1 %v5993_v1  ;;  %623 = vst [vmem:[#allocation2 + $0x181] sm:$0xff] %v6026_v58  ;;  %v687_v42 = vld [vmem:[#allocation2 + $0x168] sm:$0xff]  ;;  %v688_v31 = vld [vmem:[#allocation2 + $0x170] sm:$0xff] }
  0x56   : > { %5069 = vmatpush3.bf16.msra.mxu0 %v5522_v14  ;;  %v2522_v14 = vld [vmem:[#allocation2 + $0xda] sm:$0xff]  ;;  %v1027_v60 = vld [vmem:[#allocation2 + $0x9] sm:$0xff]  ;;  %v6050_v62 = vpack.c.bf16 %v688_v31, %v687_v42  ;;  %v2527_v15 = vld [vmem:[#allocation2 + $0x112] sm:$0xff] }
  0x57   : > { %5070 = vmatprep.subr.bf16.mxu0 %v5524_v39  ;;  %v6048_v18 = vpack.c.bf16 %v2523_v41, %v2522_v14  ;;  %v1058_v63 = vpack.c.bf16 %v1027_v60, %v1026_v43  ;;  %v6063_v14 = vpack.c.bf16 %v2525_v36, %v2524_v46  ;;  %v2528_v42 = vld [vmem:[#allocation2 + $0x122] sm:$0xff]  ;;  %v2529_v43 = vld [vmem:[#allocation2 + $0x12a] sm:$0xff]  ;;  %v2530_v31 = vld [vmem:[#allocation2 + $0x13a] sm:$0xff] }
  0x58   : > { %v2531_v36 = vld [vmem:[#allocation2 + $0x142] sm:$0xff]  ;;  %v6076_v46 = vpack.c.bf16 %v2529_v43, %v2528_v42  ;;  %v5527_v60 = vld [vmem:[%s6362_s3 + $0x90] sm:$0xff]  }
  0x59   : > { %5039 = vmatmul.mubr.bf16.gmra.mrb[8].mxu0 %v6022_v61 }
  0x5a   : > { %5042 = vmatprep.mubr.bf16.mxu0 %v6024_v7  ;;  %5071 = vmatpush3.bf16.msra.mxu0 %v5524_v39  ;;  %v5530_v39 = vld [vmem:[%s6362_s3 + $0x1b8] sm:$0xff]   ;;  %v2537_v43 = vld [vmem:[#allocation2 + $0x18a] sm:$0xff] }
  0x5b   : > { %5072 = vmatprep.subr.bf16.mxu0 %v5526_v16 }
  0x5c   : > { %4815 = vmatmul.mubr.bf16.gmra.mrb[24].mxu1 %v6030_v13 }
  0x5d   : > { %4818 = vmatprep.mubr.bf16.mxu1 %v6037_v34 }
  0x5e   : > { %5073 = vmatpush3.bf16.msra.mxu0 %v5526_v16  ;;  %v2526_v16 = vld [vmem:[#allocation2 + $0x10a] sm:$0xff] }
  0x5f   : > { %5074 = vmatprep.subr.bf16.mxu0 %v5528_v37  ;;  %v6065_v41 = vpack.c.bf16 %v2527_v15, %v2526_v16  ;;  %v2535_v16 = vld [vmem:[#allocation2 + $0x172] sm:$0xff] }
  0x61   : > { %5043 = vmatmul.mubr.bf16.gmra.mrb[12].mxu0 %v6046_v50 }
  0x62   : > { %5046 = vmatprep.mubr.bf16.mxu0 %v6048_v18  ;;  %5075 = vmatpush3.bf16.msra.mxu0 %v5528_v37  ;;  %v5525_v37 = vld [vmem:[%s6362_s3 + $0x88] sm:$0xff]  }
  0x63   : > { %5076 = vmatprep.subr.bf16.mxu0 %v5530_v39 }
  0x64   : > { %4819 = vmatmul.mubr.bf16.gmra.mrb[28].mxu1 %v6050_v62 }
  0x65   : > { %4838 = vmatprep.mubr.bf16.mxu1 %v1058_v63  ;;  %v2534_v63 = vld [vmem:[#allocation2 + $0x16a] sm:$0xff] }
  0x66   : > { %5077 = vmatpush3.bf16.msra.mxu0 %v5530_v39  ;;  %v6081_v39 = vpack.c.bf16 %v2531_v36, %v2530_v31  ;;  %v6095_v42 = vpack.c.bf16 %v2535_v16, %v2534_v63  ;;  %v2877_v31 = vld [vmem:[#allocation2 + $0x30] sm:$0xff]  ;;  %v2878_v36 = vld [vmem:[#allocation2 + $0x38] sm:$0xff]  ;;  %v5534_v63 = vld [vmem:[%s6362_s3 + $0x1c8] sm:$0xff]  }
  0x67   : > { %5110 = vmatprep.subr.bf16.mxu0 %v6060_v21 }
  0x69   : > { %5047 = vmatmul.mubr.bf16.gmra.mrb[16].mxu0 %v6063_v14 }
  0x6a   : > { %5050 = vmatprep.mubr.bf16.mxu0 %v6065_v41 }
  0x6c   : > { %4839 = vmatmul.mubr.bf16.vlgmr.msra.gmra.mrb[0].mxu1 %v5722_v49  ;;  %v5529_v49 = vld [vmem:[%s6362_s3 + $0x98] sm:$0xff]  }
  0x6d   : > { %4871 = vmatpush3.bf16.msra.mxu1 %v5952_v23  ;;  %4842 = vmatprep.mubr.bf16.mxu1 %v5734_v59  ;;  %v2532_v59 = vld [vmem:[#allocation2 + $0x152] sm:$0xff]  ;;  %v2533_v23 = vld [vmem:[#allocation2 + $0x15a] sm:$0xff] }
  0x6e   : > { %4872 = vmatprep.subr.bf16.mxu1 %v5525_v37  ;;  %v6090_v15 = vpack.c.bf16 %v2533_v23, %v2532_v59  ;;  %v5535_v59 = vld [vmem:[%s6362_s3 + $0xb0] sm:$0xff]   ;;  %v6109_v23 = vpack.c.bf16 %v2878_v36, %v2877_v31 }
  0x6f   : > { %v3260_v31 = vld [vmem:[#allocation2 + $0xc9] sm:$0xff] }
  0x71   : > { %4873 = vmatpush3.bf16.msra.mxu1 %v5525_v37  ;;  %5051 = vmatmul.mubr.bf16.gmra.mrb[20].mxu0 %v6076_v46  ;;  %v5531_v37 = vld [vmem:[%s6362_s3 + $0xa0] sm:$0xff]  }
  0x72   : > { %4874 = vmatprep.subr.bf16.mxu1 %v5527_v60  ;;  %5054 = vmatprep.mubr.bf16.mxu0 %v6081_v39 }
  0x74   : > { %4843 = vmatmul.mubr.bf16.gmra.mrb[4].mxu1 %v5750_v10  ;;  %v5533_v10 = vld [vmem:[%s6362_s3 + $0xa8] sm:$0xff]  }
  0x75   : > { %4846 = vmatprep.mubr.bf16.mxu1 %v5770_v35  ;;  %4875 = vmatpush3.bf16.msra.mxu1 %v5527_v60  ;;  %v2536_v35 = vld [vmem:[#allocation2 + $0x182] sm:$0xff]  ;;  %v3293_v60 = vpack.c.bf16 %v6028_v12, %v6026_v58 }
  0x76   : > { %4876 = vmatprep.subr.bf16.mxu1 %v5529_v49 }
  0x79   : > { %4877 = vmatpush3.bf16.msra.mxu1 %v5529_v49  ;;  %5055 = vmatmul.mubr.bf16.gmra.mrb[24].mxu0 %v6090_v15  ;;  %v2553_v49 = vpack.c.bf16 %v2537_v43, %v2536_v35  ;;  %v3258_v35 = vld [vmem:[#allocation2 + $0xb1] sm:$0xff]  ;;  %v3259_v43 = vld [vmem:[#allocation2 + $0xc1] sm:$0xff] }
  0x7a   : > { %4878 = vmatprep.subr.bf16.mxu1 %v5531_v37  ;;  %5058 = vmatprep.mubr.bf16.mxu0 %v6095_v42 }
  0x7c   : > { %4847 = vmatmul.mubr.bf16.gmra.mrb[8].mxu1 %v5782_v47  ;;  %v5537_v47 = vld [vmem:[%s6362_s3 + $0xb8] sm:$0xff]  }
  0x7d   : > { %4850 = vmatprep.mubr.bf16.mxu1 %v5803_v3  ;;  %4879 = vmatpush3.bf16.msra.mxu1 %v5531_v37  ;;  %v5539_v3 = vld [vmem:[%s6362_s3 + $0xc0] sm:$0xff]  }
  0x7e   : > { %4880 = vmatprep.subr.bf16.mxu1 %v5533_v10 }
  0x81   : > { %4881 = vmatpush3.bf16.msra.mxu1 %v5533_v10  ;;  %5059 = vmatmul.mubr.bf16.gmra.mrb[28].mxu0 %v2553_v49  ;;  %v5554_v10 = vld [vmem:[%s6362_s3 + $0x218] sm:$0xff]   ;;  %v3285_v49 = vpack.c.bf16 %v3260_v31, %v3259_v43  ;;  %v3621_v31 = vld [vmem:[#allocation2 + $0x62] sm:$0xff] }
  0x82   : > { %4882 = vmatprep.subr.bf16.mxu1 %v5535_v59  ;;  %5078 = vmatprep.mubr.bf16.mxu0 %v6109_v23  ;;  %v3620_v43 = vld [vmem:[#allocation2 + $0x52] sm:$0xff] }
  0x84   : > { %4851 = vmatmul.mubr.bf16.gmra.mrb[12].mxu1 %v5825_v26  ;;  %v5536_v26 = vld [vmem:[%s6362_s3 + $0x1d0] sm:$0xff]  }
  0x85   : > { %4854 = vmatprep.mubr.bf16.mxu1 %v5868_v0  ;;  %4883 = vmatpush3.bf16.msra.mxu1 %v5535_v59  ;;  %v1396_v0 = vld [vmem:[#allocation2 + $0x2] sm:$0xff] }
  0x86   : > { %4884 = vmatprep.subr.bf16.mxu1 %v5537_v47  ;;  %v5556_v59 = vld [vmem:[%s6362_s3 + $0x228] sm:$0xff]  }
  0x89   : > { %4885 = vmatpush3.bf16.msra.mxu1 %v5537_v47  ;;  %5079 = vmatmul.mubr.bf16.vlgmr.msra.gmra.mrb[0].mxu0 %v5786_v53  ;;  %v5538_v53 = vld [vmem:[%s6362_s3 + $0x1d8] sm:$0xff]   ;;  %v3262_v47 = vld [vmem:[#allocation2 + $0xe1] sm:$0xff] }
  0x8a   : > { %4918 = vmatprep.subr.bf16.mxu1 %v5539_v3  ;;  %5111 = vmatpush3.bf16.msra.mxu0 %v6060_v21  ;;  %v5552_v21 = vld [vmem:[%s6362_s3 + $0x210] sm:$0xff]  }
  0x8b   : > { %5082 = vmatprep.mubr.bf16.mxu0 %v5809_v8  ;;  %5112 = vmatprep.subr.bf16.mxu0 %v5534_v63  ;;  %v5540_v8 = vld [vmem:[%s6362_s3 + $0x1e0] sm:$0xff]  }
  0x8c   : > { %4855 = vmatmul.mubr.bf16.gmra.mrb[16].mxu1 %v1067_v20  ;;  %v3251_v20 = vld [vmem:[#allocation2 + $0x61] sm:$0xff] }
  0x8d   : > { %4858 = vmatprep.mubr.bf16.mxu1 %v1068_v22  ;;  %v3252_v22 = vld [vmem:[#allocation2 + $0x69] sm:$0xff] }
  0x8e   : > { %5113 = vmatpush3.bf16.msra.mxu0 %v5534_v63  ;;  %v3264_v63 = vld [vmem:[#allocation2 + $0xf9] sm:$0xff] }
  0x8f   : > { %5114 = vmatprep.subr.bf16.mxu0 %v5536_v26 }
  0x91   : > { %5083 = vmatmul.mubr.bf16.gmra.mrb[4].mxu0 %v5829_v29  ;;  %v5542_v29 = vld [vmem:[%s6362_s3 + $0x1e8] sm:$0xff]  }
  0x92   : > { %5086 = vmatprep.mubr.bf16.mxu0 %v5836_v38  ;;  %5115 = vmatpush3.bf16.msra.mxu0 %v5536_v26  ;;  %v6367_v38 = vpack.c.bf16 %v5959_v28, %v5957_v27  ;;  %v3248_v27 = vld [vmem:[#allocation2 + $0x39] sm:$0xff] }
  0x93   : > { %5116 = vmatprep.subr.bf16.mxu0 %v5538_v53  ;;  %v5559_v28 = vld [vmem:[#allocation2] sm:$0xff] }
  0x94   : > { %4859 = vmatmul.mubr.bf16.gmra.mrb[20].mxu1 %v1069_v30 }
  0x95   : > { %4862 = vmatprep.mubr.bf16.mxu1 %v1070_v33  ;;  %v3281_v33 = vpack.c.bf16 %v3252_v22, %v3251_v20  ;;  %v1779_v20 = vld [vmem:[#allocation2 + $0xb0] sm:$0xff]  ;;  %v5563_v22 = vld [vmem:[%s6362_s3 + $0x118] sm:$0xff]  }
  0x96   : > { %5117 = vmatpush3.bf16.msra.mxu0 %v5538_v53  ;;  %v1766_v53 = vld [vmem:[#allocation2 + $0x18] sm:$0xff] }
  0x97   : > { %5118 = vmatprep.subr.bf16.mxu0 %v5540_v8 }
  0x99   : > { %5087 = vmatmul.mubr.bf16.gmra.mrb[8].mxu0 %v5881_v9  ;;  %v5546_v9 = vld [vmem:[%s6362_s3 + $0x1f8] sm:$0xff]  }
  0x9a   : > { %5090 = vmatprep.mubr.bf16.mxu0 %v5887_v19  ;;  %5119 = vmatpush3.bf16.msra.mxu0 %v5540_v8  ;;  %v1428_v19 = vpack.c.bf16 %v1397_v17, %v1396_v0  ;;  %v1767_v8 = vld [vmem:[#allocation2 + $0x20] sm:$0xff]  ;;  %v3268_v0 = vld [vmem:[#allocation2 + $0x129] sm:$0xff] }
  0x9b   : > { %5120 = vmatprep.subr.bf16.mxu0 %v5542_v29 }
  0x9c   : > { %4863 = vmatmul.mubr.bf16.gmra.mrb[24].mxu1 %v6367_v38  ;;  %v1798_v38 = vpack.c.bf16 %v1767_v8, %v1766_v53  ;;  %v3623_v8 = vld [vmem:[#allocation2 + $0x7a] sm:$0xff] }
  0x9d   : > { %4866 = vmatprep.mubr.bf16.mxu1 %v6368_v57  ;;  %v3266_v57 = vld [vmem:[#allocation2 + $0x111] sm:$0xff] }
  0x9e   : > { %5121 = vmatpush3.bf16.msra.mxu0 %v5542_v29 }
  0x9f   : > { %5122 = vmatprep.subr.bf16.mxu0 %v5544_v56 }
  0xa1   : > { %5091 = vmatmul.mubr.bf16.gmra.mrb[12].mxu0 %v5938_v2  ;;  %v2906_v2 = vld [vmem:[#allocation2 + $0x188] sm:$0xff] }
  0xa2   : > { %5094 = vmatprep.mubr.bf16.mxu0 %v5955_v25  ;;  %5123 = vmatpush3.bf16.msra.mxu0 %v5544_v56  ;;  %v3247_v25 = vld [vmem:[#allocation2 + $0x31] sm:$0xff]  ;;  %v3265_v56 = vld [vmem:[#allocation2 + $0x109] sm:$0xff] }
  0xa3   : > { %5124 = vmatprep.subr.bf16.mxu0 %v5546_v9  ;;  %v3279_v5 = vpack.c.bf16 %v3248_v27, %v3247_v25  ;;  %v6249_v17 = vpack.c.bf16 %v3266_v57, %v3265_v56  ;;  %v1774_v27 = vld [vmem:[#allocation2 + $0x78] sm:$0xff]  ;;  %v1788_v57 = vld [vmem:[#allocation2 + $0x120] sm:$0xff] }
  0xa4   : > { %4867 = vmatmul.mubr.bf16.gmra.mrb[28].mxu1 %v6017_v48  ;;  %v3626_v56 = vld [vmem:[#allocation2 + $0x9a] sm:$0xff] }
  0xa5   : > { %4886 = vmatprep.mubr.bf16.mxu1 %v1428_v19  ;;  %v1771_v19 = vld [vmem:[#allocation2 + $0x50] sm:$0xff] }
  0xa6   : > { %5125 = vmatpush3.bf16.msra.mxu0 %v5546_v9  ;;  %v1770_v9 = vld [vmem:[#allocation2 + $0x48] sm:$0xff] }
  0xa7   : > { %5158 = vmatprep.subr.bf16.mxu0 %v5548_v24 }
  0xa9   : > { %5095 = vmatmul.mubr.bf16.gmra.mrb[16].mxu0 %v5987_v11  ;;  %v3249_v11 = vld [vmem:[#allocation2 + $0x49] sm:$0xff] }
  0xaa   : > { %5098 = vmatprep.mubr.bf16.mxu0 %v5993_v1  ;;  %v3250_v1 = vld [vmem:[#allocation2 + $0x51] sm:$0xff] }
  0xab   : > { %v3280_v30 = vpack.c.bf16 %v3250_v1, %v3249_v11  ;;  %v1777_v11 = vld [vmem:[#allocation2 + $0x98] sm:$0xff]  ;;  %v1778_v1 = vld [vmem:[#allocation2 + $0xa8] sm:$0xff] }
  0xac   : > { %4887 = vmatmul.mubr.bf16.vlgmr.msra.gmra.mrb[0].mxu1 %v5854_v55  ;;  %v2905_v55 = vld [vmem:[#allocation2 + $0x180] sm:$0xff] }
  0xad   : > { %4919 = vmatpush3.bf16.msra.mxu1 %v5539_v3  ;;  %4890 = vmatprep.mubr.bf16.mxu1 %v5915_v44  ;;  %v5547_v44 = vld [vmem:[%s6362_s3 + $0xe0] sm:$0xff]   ;;  %v6192_v6 = vpack.c.bf16 %v2906_v2, %v2905_v55  ;;  %v3263_v3 = vld [vmem:[#allocation2 + $0xf1] sm:$0xff] }
  0xae   : > { %4920 = vmatprep.subr.bf16.mxu1 %v5541_v32  ;;  %v6241_v29 = vpack.c.bf16 %v3264_v63, %v3263_v3  ;;  %v3272_v55 = vld [vmem:[#allocation2 + $0x159] sm:$0xff] }
  0xaf   : > { %v1772_v2 = vld [vmem:[#allocation2 + $0x60] sm:$0xff]  ;;  %v5567_v3 = vld [vmem:[%s6362_s3 + $0x138] sm:$0xff]  }
  0xb1   : > { %4921 = vmatpush3.bf16.msra.mxu1 %v5541_v32  ;;  %5099 = vmatmul.mubr.bf16.gmra.mrb[20].mxu0 %v6030_v13  ;;  %v6215_v13 = vld [vmem:[%s6362_s3 + $0x100] sm:$0xff]   ;;  %v1800_v32 = vpack.c.bf16 %v1771_v19, %v1770_v9  ;;  %v1790_v9 = vld [vmem:[#allocation2 + $0x138] sm:$0xff] }
  0xb2   : > { %4922 = vmatprep.subr.bf16.mxu1 %v5543_v45  ;;  %5102 = vmatprep.mubr.bf16.mxu0 %v6037_v34  ;;  %v3254_v34 = vld [vmem:[#allocation2 + $0x81] sm:$0xff] }
  0xb3   : > { %v1791_v19 = vld [vmem:[#allocation2 + $0x140] sm:$0xff] }
  0xb4   : > { %4891 = vmatmul.mubr.bf16.gmra.mrb[4].mxu1 %v5923_v51  ;;  %v5549_v51 = vld [vmem:[%s6362_s3 + $0xe8] sm:$0xff]  }
  0xb5   : > { %4894 = vmatprep.mubr.bf16.mxu1 %v5972_v40  ;;  %4923 = vmatpush3.bf16.msra.mxu1 %v5543_v45  ;;  %v2924_v40 = vpack.c.bf16 %v5559_v28, %v5559_v28  ;;  %v3269_v45 = vld [vmem:[#allocation2 + $0x139] sm:$0xff] }
  0xb6   : > { %4924 = vmatprep.subr.bf16.mxu1 %v5545_v54  ;;  %v1775_v28 = vld [vmem:[#allocation2 + $0x80] sm:$0xff] }
  0xb9   : > { %4925 = vmatpush3.bf16.msra.mxu1 %v5545_v54  ;;  %5103 = vmatmul.mubr.bf16.gmra.mrb[24].mxu0 %v6050_v62  ;;  %v3256_v62 = vld [vmem:[#allocation2 + $0x99] sm:$0xff]  ;;  %v3270_v54 = vld [vmem:[#allocation2 + $0x141] sm:$0xff] }
  0xba   : > { %4926 = vmatprep.subr.bf16.mxu1 %v5547_v44  ;;  %5106 = vmatprep.mubr.bf16.mxu0 %v6192_v6  ;;  %v6260_v25 = vpack.c.bf16 %v3270_v54, %v3269_v45  ;;  %v1810_v54 = vpack.c.bf16 %v1791_v19, %v1790_v9 }
  0xbc   : > { %4895 = vmatmul.mubr.bf16.gmra.mrb[8].mxu1 %v5983_v4  ;;  %v5553_v4 = vld [vmem:[%s6362_s3 + $0xf8] sm:$0xff]  }
  0xbd   : > { %4898 = vmatprep.mubr.bf16.mxu1 %v6022_v61  ;;  %4927 = vmatpush3.bf16.msra.mxu1 %v5547_v44  ;;  %v5550_v61 = vld [vmem:[%s6362_s3 + $0x208] sm:$0xff]  }
  0xbe   : > { %4928 = vmatprep.subr.bf16.mxu1 %v5549_v51  ;;  %v1773_v44 = vld [vmem:[#allocation2 + $0x68] sm:$0xff] }
  0xc1   : > { %4929 = vmatpush3.bf16.msra.mxu1 %v5549_v51  ;;  %5107 = vmatmul.mubr.bf16.gmra.mrb[28].mxu0 %v2924_v40  ;;  %v5561_v51 = vld [vmem:[%s6362_s3 + $0x108] sm:$0xff]  }
  0xc2   : > { %4930 = vmatprep.subr.bf16.mxu1 %v5551_v52  ;;  %5126 = vmatprep.mubr.bf16.mxu0 %v3279_v5  ;;  %v5562_v5 = vld [vmem:[%s6362_s3 + $0x110] sm:$0xff]  }
  0xc4   : > { %4899 = vmatmul.mubr.bf16.gmra.mrb[12].mxu1 %v6024_v7  ;;  %v3253_v7 = vld [vmem:[#allocation2 + $0x79] sm:$0xff] }
  0xc5   : > { %4902 = vmatprep.mubr.bf16.mxu1 %v6046_v50  ;;  %4931 = vmatpush3.bf16.msra.mxu1 %v5551_v52  ;;  %v3255_v50 = vld [vmem:[#allocation2 + $0x91] sm:$0xff]  ;;  %v3282_v16 = vpack.c.bf16 %v3254_v34, %v3253_v7  ;;  %v1801_v52 = vpack.c.bf16 %v1773_v44, %v1772_v2  ;;  %v3278_v7 = vld [vmem:[#allocation2 + $0x1a1] sm:$0xff] }
  0xc6   : > { %4932 = vmatprep.subr.bf16.mxu1 %v5553_v4  ;;  %v3283_v37 = vpack.c.bf16 %v3256_v62, %v3255_v50  ;;  %v3617_v34 = vld [vmem:[#allocation2 + $0x32] sm:$0xff]  ;;  %v3618_v50 = vld [vmem:[#allocation2 + $0x3a] sm:$0xff]  ;;  %v3629_v2 = vld [vmem:[#allocation2 + $0xc2] sm:$0xff] }
  0xc7   : > { %v1780_v62 = vld [vmem:[#allocation2 + $0xc0] sm:$0xff]  ;;  %v3630_v44 = vld [vmem:[#allocation2 + $0xca] sm:$0xff] }
  0xc9   : > { %4933 = vmatpush3.bf16.msra.mxu1 %v5553_v4  ;;  %5127 = vmatmul.mubr.bf16.vlgmr.msra.gmra.mrb[0].mxu0 %v3280_v30  ;;  %v1776_v4 = vld [vmem:[#allocation2 + $0x90] sm:$0xff] }
  0xca   : > { %5206 = vmatprep.subr.bf16.mxu1 %v6215_v13  ;;  %5159 = vmatpush3.bf16.msra.mxu0 %v5548_v24  ;;  %v1803_v30 = vpack.c.bf16 %v1777_v11, %v1776_v4 }
  0xcb   : > { %5130 = vmatprep.mubr.bf16.mxu0 %v3281_v33  ;;  %5160 = vmatprep.subr.bf16.mxu0 %v5550_v61  ;;  %v1804_v33 = vpack.c.bf16 %v1779_v20, %v1778_v1  ;;  %v3631_v1 = vld [vmem:[#allocation2 + $0xda] sm:$0xff]  ;;  %v3632_v20 = vld [vmem:[#allocation2 + $0xe2] sm:$0xff] }
  0xcc   : > { %4903 = vmatmul.mubr.bf16.gmra.mrb[16].mxu1 %v6048_v18  ;;  %v3257_v18 = vld [vmem:[#allocation2 + $0xa9] sm:$0xff] }
  0xcd   : > { %4906 = vmatprep.mubr.bf16.mxu1 %v6063_v14  ;;  %v5555_v14 = vld [vmem:[%s6362_s3 + $0x220] sm:$0xff]   ;;  %v3284_v36 = vpack.c.bf16 %v3258_v35, %v3257_v18  ;;  %v3649_v18 = vpack.c.bf16 %v3618_v50, %v3617_v34  ;;  %v3619_v35 = vld [vmem:[#allocation2 + $0x4a] sm:$0xff] }
  0xce   : > { %5161 = vmatpush3.bf16.msra.mxu0 %v5550_v61  ;;  %v5564_v61 = vld [vmem:[%s6362_s3 + $0x120] sm:$0xff]   ;;  %v3638_v50 = vld [vmem:[#allocation2 + $0x12a] sm:$0xff] }
  0xcf   : > { %5162 = vmatprep.subr.bf16.mxu0 %v5552_v21  ;;  %v3637_v34 = vld [vmem:[#allocation2 + $0x122] sm:$0xff] }
  0xd1   : > { %5131 = vmatmul.mubr.bf16.gmra.mrb[4].mxu0 %v3282_v16 }
  0xd2   : > { %5134 = vmatprep.mubr.bf16.mxu0 %v3283_v37  ;;  %5163 = vmatpush3.bf16.msra.mxu0 %v5552_v21  ;;  %v1781_v21 = vld [vmem:[#allocation2 + $0xc8] sm:$0xff]  ;;  %v1783_v37 = vld [vmem:[#allocation2 + $0xe0] sm:$0xff] }
  0xd3   : > { %5164 = vmatprep.subr.bf16.mxu0 %v5554_v10  ;;  %v1805_v58 = vpack.c.bf16 %v1781_v21, %v1780_v62  ;;  %v3659_v21 = vpack.c.bf16 %v3638_v50, %v3637_v34 }
  0xd4   : > { %4907 = vmatmul.mubr.bf16.gmra.mrb[20].mxu1 %v6065_v41  ;;  %v3261_v41 = vld [vmem:[#allocation2 + $0xd9] sm:$0xff] }
  0xd5   : > { %4910 = vmatprep.mubr.bf16.mxu1 %v6076_v46  ;;  %v5557_v46 = vld [vmem:[%s6362_s3 + $0x230] sm:$0xff]   ;;  %v6239_v26 = vpack.c.bf16 %v3262_v47, %v3261_v41  ;;  %v1786_v41 = vld [vmem:[#allocation2 + $0x108] sm:$0xff] }
  0xd6   : > { %5165 = vmatpush3.bf16.msra.mxu0 %v5554_v10  ;;  %v5565_v10 = vld [vmem:[%s6362_s3 + $0x128] sm:$0xff]   ;;  %v1787_v47 = vld [vmem:[#allocation2 + $0x110] sm:$0xff] }
  0xd7   : > { %5166 = vmatprep.subr.bf16.mxu0 %v5555_v14  ;;  %v1808_v53 = vpack.c.bf16 %v1787_v47, %v1786_v41 }
  0xd9   : > { %5135 = vmatmul.mubr.bf16.gmra.mrb[8].mxu0 %v3284_v36  ;;  %v1784_v36 = vld [vmem:[#allocation2 + $0xf0] sm:$0xff] }
  0xda   : > { %5138 = vmatprep.mubr.bf16.mxu0 %v3285_v49  ;;  %5167 = vmatpush3.bf16.msra.mxu0 %v5555_v14  ;;  %v3622_v14 = vld [vmem:[#allocation2 + $0x6a] sm:$0xff]  ;;  %v1785_v49 = vld [vmem:[#allocation2 + $0xf8] sm:$0xff] }
  0xdb   : > { %5168 = vmatprep.subr.bf16.mxu0 %v5556_v59  ;;  %v3651_v63 = vpack.c.bf16 %v3622_v14, %v3621_v31  ;;  %v2165_v31 = vld [vmem:[#allocation2 + $0x171] sm:$0xff] }
  0xdc   : > { %4911 = vmatmul.mubr.bf16.gmra.mrb[24].mxu1 %v6081_v39  ;;  %v5558_v39 = vld [vmem:[%s6362_s3 + $0x238] sm:$0xff]  }
  0xdd   : > { %4914 = vmatprep.mubr.bf16.mxu1 %v6090_v15  ;;  %v3267_v15 = vld [vmem:[#allocation2 + $0x121] sm:$0xff] }
  0xde   : > { %5169 = vmatpush3.bf16.msra.mxu0 %v5556_v59  ;;  %v6251_v24 = vpack.c.bf16 %v3268_v0, %v3267_v15  ;;  %v3650_v59 = vpack.c.bf16 %v3620_v43, %v3619_v35  ;;  %v1789_v15 = vld [vmem:[#allocation2 + $0x128] sm:$0xff] }
  0xdf   : > { %5170 = vmatprep.subr.bf16.mxu0 %v5557_v46  ;;  %v1809_v45 = vpack.c.bf16 %v1789_v15, %v1788_v57  ;;  %v2164_v43 = vld [vmem:[#allocation2 + $0x169] sm:$0xff] }
  0xe0   : > { %v2182_v14 = vpack.c.bf16 %v2165_v31, %v2164_v43 }
  0xe1   : > { %5139 = vmatmul.mubr.bf16.gmra.mrb[12].mxu0 %v6239_v26 }
  0xe2   : > { %5142 = vmatprep.mubr.bf16.mxu0 %v6241_v29  ;;  %5171 = vmatpush3.bf16.msra.mxu0 %v5557_v46  ;;  %v1807_v46 = vpack.c.bf16 %v1785_v49, %v1784_v36  ;;  %v3648_v36 = vld [vmem:[#allocation2 + $0x1a2] sm:$0xff] }
  0xe3   : > { %5172 = vmatprep.subr.bf16.mxu0 %v5558_v39  ;;  %v2166_v49 = vld [vmem:[#allocation2 + $0x181] sm:$0xff] }
  0xe4   : > { %4915 = vmatmul.mubr.bf16.gmra.mrb[28].mxu1 %v6095_v42  ;;  %v3271_v42 = vld [vmem:[#allocation2 + $0x151] sm:$0xff] }
  0xe5   : > { %4934 = vmatprep.mubr.bf16.mxu1 %v1798_v38  ;;  %v6262_v40 = vpack.c.bf16 %v3272_v55, %v3271_v42  ;;  %v3625_v38 = vld [vmem:[#allocation2 + $0x92] sm:$0xff]  ;;  %v3627_v42 = vld [vmem:[#allocation2 + $0xaa] sm:$0xff] }
  0xe6   : > { %5173 = vmatpush3.bf16.msra.mxu0 %v5558_v39  ;;  %v3624_v39 = vld [vmem:[#allocation2 + $0x82] sm:$0xff]  ;;  %v3628_v55 = vld [vmem:[#allocation2 + $0xb2] sm:$0xff] }
  0xe7   : > { %v3652_v0 = vpack.c.bf16 %v3624_v39, %v3623_v8 }
  0xe9   : > { %5143 = vmatmul.mubr.bf16.gmra.mrb[16].mxu0 %v6249_v17 }
  0xea   : > { %5146 = vmatprep.mubr.bf16.mxu0 %v6251_v24 }
  0xec   : > { %4935 = vmatmul.mubr.bf16.vlgmr.msra.gmra.mrb[0].mxu1 %v6109_v23  ;;  %v1802_v23 = vpack.c.bf16 %v1775_v28, %v1774_v27  ;;  %v1793_v27 = vld [vmem:[#allocation2 + $0x158] sm:$0xff]  ;;  %v3654_v28 = vpack.c.bf16 %v3628_v55, %v3627_v42 }
  0xed   : > { %5214 = vmatpush3.bf16.msra.mxu1 %v6215_v13  ;;  %4938 = vmatprep.mubr.bf16.mxu1 %v1800_v32  ;;  %v3277_v13 = vld [vmem:[#allocation2 + $0x199] sm:$0xff]  ;;  %v3653_v32 = vpack.c.bf16 %v3626_v56, %v3625_v38 }
  0xee   : > { %5207 = vmatprep.subr.bf16.mxu1 %v5561_v51  ;;  %v3294_v16 = vpack.c.bf16 %v3278_v7, %v3277_v13  ;;  %v3635_v13 = vld [vmem:[#allocation2 + $0x10a] sm:$0xff]  ;;  %v3636_v7 = vld [vmem:[#allocation2 + $0x112] sm:$0xff] }
  0xef   : > { %v3658_v62 = vpack.c.bf16 %v3636_v7, %v3635_v13 }
  0xf1   : > { %5215 = vmatpush3.bf16.msra.mxu1 %v5561_v51  ;;  %5147 = vmatmul.mubr.bf16.gmra.mrb[20].mxu0 %v6260_v25  ;;  %v1792_v51 = vld [vmem:[#allocation2 + $0x150] sm:$0xff] }
  0xf2   : > { %5208 = vmatprep.subr.bf16.mxu1 %v5562_v5  ;;  %5150 = vmatprep.mubr.bf16.mxu0 %v6262_v40  ;;  %v1811_v4 = vpack.c.bf16 %v1793_v27, %v1792_v51 }
  0xf4   : > { %4939 = vmatmul.mubr.bf16.gmra.mrb[4].mxu1 %v1801_v52  ;;  %v1794_v52 = vld [vmem:[#allocation2 + $0x168] sm:$0xff] }
  0xf5   : > { %4942 = vmatprep.mubr.bf16.mxu1 %v1802_v23  ;;  %5216 = vmatpush3.bf16.msra.mxu1 %v5562_v5  ;;  %v1795_v23 = vld [vmem:[#allocation2 + $0x170] sm:$0xff]  ;;  %v3655_v5 = vpack.c.bf16 %v3630_v44, %v3629_v2 }
  0xf6   : > { %5209 = vmatprep.subr.bf16.mxu1 %v5563_v22  ;;  %v1812_v11 = vpack.c.bf16 %v1795_v23, %v1794_v52 }
  0xf9   : > { %5217 = vmatpush3.bf16.msra.mxu1 %v5563_v22  ;;  %5151 = vmatmul.mubr.bf16.gmra.mrb[24].mxu0 %v6017_v48  ;;  %v1782_v48 = vld [vmem:[#allocation2 + $0xd8] sm:$0xff] }
  0xfa   : > { %5210 = vmatprep.subr.bf16.mxu1 %v5564_v61  ;;  %5154 = vmatprep.mubr.bf16.mxu0 %v3293_v60  ;;  %v1806_v12 = vpack.c.bf16 %v1783_v37, %v1782_v48  ;;  %v5566_v60 = vld [vmem:[%s6362_s3 + $0x130] sm:$0xff]   ;;  %v3640_v48 = vld [vmem:[#allocation2 + $0x142] sm:$0xff] }
  0xfb   : > { %v3633_v22 = vld [vmem:[#allocation2 + $0xf2] sm:$0xff] }
  0xfc   : > { %4943 = vmatmul.mubr.bf16.gmra.mrb[8].mxu1 %v1803_v30  ;;  %v3634_v30 = vld [vmem:[#allocation2 + $0xfa] sm:$0xff]  ;;  %v3641_v37 = vld [vmem:[#allocation2 + $0x152] sm:$0xff] }
  0xfd   : > { %4946 = vmatprep.mubr.bf16.mxu1 %v1804_v33  ;;  %5218 = vmatpush3.bf16.msra.mxu1 %v5564_v61  ;;  %v3656_v33 = vpack.c.bf16 %v3632_v20, %v3631_v1  ;;  %v3657_v61 = vpack.c.bf16 %v3634_v30, %v3633_v22 }
  0xfe   : > { %5211 = vmatprep.subr.bf16.mxu1 %v5565_v10 }
 0x101   : > { %5219 = vmatpush3.bf16.msra.mxu1 %v5565_v10  ;;  %5155 = vmatmul.mubr.bf16.gmra.mrb[28].mxu0 %v3294_v16  ;;  %v3639_v16 = vld [vmem:[#allocation2 + $0x13a] sm:$0xff] }
 0x102   : > { %5212 = vmatprep.subr.bf16.mxu1 %v5566_v60  ;;  %5174 = vmatprep.mubr.bf16.mxu0 %v3649_v18  ;;  %v3642_v10 = vld [vmem:[#allocation2 + $0x15a] sm:$0xff]  ;;  %v3660_v18 = vpack.c.bf16 %v3640_v48, %v3639_v16 }
 0x104   : > { %4947 = vmatmul.mubr.bf16.gmra.mrb[12].mxu1 %v1805_v58  ;;  %v3661_v58 = vpack.c.bf16 %v3642_v10, %v3641_v37 }
 0x105   : > { %4950 = vmatprep.mubr.bf16.mxu1 %v1806_v12  ;;  %5220 = vmatpush3.bf16.msra.mxu1 %v5566_v60  ;;  %v3644_v12 = vld [vmem:[#allocation2 + $0x172] sm:$0xff]  ;;  %v3646_v60 = vld [vmem:[#allocation2 + $0x18a] sm:$0xff] }
 0x106   : > { %5213 = vmatprep.subr.bf16.mxu1 %v5567_v3 }
 0x109   : > { %5221 = vmatpush3.bf16.msra.mxu1 %v5567_v3  ;;  %5175 = vmatmul.mubr.bf16.vlgmr.msra.gmra.mrb[0].mxu0 %v3650_v59  ;;  %v2167_v59 = vld [vmem:[#allocation2 + $0x189] sm:$0xff] }
 0x10a   : > { %5178 = vmatprep.mubr.bf16.mxu0 %v3651_v63 }
 0x10c   : > { %4951 = vmatmul.mubr.bf16.gmra.mrb[16].mxu1 %v1807_v46 }
 0x10d   : > { %4954 = vmatprep.mubr.bf16.mxu1 %v1808_v53 }
 0x111   : > { %5179 = vmatmul.mubr.bf16.gmra.mrb[4].mxu0 %v3652_v0 }
 0x112   : > { %5182 = vmatprep.mubr.bf16.mxu0 %v3653_v32 }
 0x114   : > { %4955 = vmatmul.mubr.bf16.gmra.mrb[20].mxu1 %v1809_v45 }
 0x115   : > { %4958 = vmatprep.mubr.bf16.mxu1 %v1810_v54 }
 0x119   : > { %5183 = vmatmul.mubr.bf16.gmra.mrb[8].mxu0 %v3654_v28 }
 0x11a   : > { %5186 = vmatprep.mubr.bf16.mxu0 %v3655_v5 }
 0x11c   : > { %4959 = vmatmul.mubr.bf16.gmra.mrb[24].mxu1 %v1811_v4 }
 0x11d   : > { %4962 = vmatprep.mubr.bf16.mxu1 %v1812_v11 }
 0x121   : > { %5187 = vmatmul.mubr.bf16.gmra.mrb[12].mxu0 %v3656_v33 }
 0x122   : > { %5190 = vmatprep.mubr.bf16.mxu0 %v3657_v61 }
 0x124   : > { %4963 = vmatmul.mubr.bf16.gmra.mrb[28].mxu1 %v6192_v6  ;;  %v3643_v6 = vld [vmem:[#allocation2 + $0x16a] sm:$0xff] }
 0x125   : > { %4998 = vmatprep.mubr.bf16.mxu1 %v6239_v26  ;;  %v3645_v26 = vld [vmem:[#allocation2 + $0x182] sm:$0xff]  ;;  %v3662_v35 = vpack.c.bf16 %v3644_v12, %v3643_v6 }
 0x129   : > { %5191 = vmatmul.mubr.bf16.gmra.mrb[16].mxu0 %v3658_v62 }
 0x12a   : > { %5194 = vmatprep.mubr.bf16.mxu0 %v3659_v21 }
 0x12c   : > { %4999 = vmatmul.mubr.bf16.vlgmr.msra.gmra.mrb[16].mxu1 %v6241_v29  ;;  %v3663_v29 = vpack.c.bf16 %v3646_v60, %v3645_v26 }
 0x12d   : > { %5002 = vmatprep.mubr.bf16.mxu1 %v6249_v17  ;;  %v3647_v17 = vld [vmem:[#allocation2 + $0x19a] sm:$0xff] }
 0x12e   : > { %v3664_v41 = vpack.c.bf16 %v3648_v36, %v3647_v17 }
 0x131   : > { %5195 = vmatmul.mubr.bf16.gmra.mrb[20].mxu0 %v3660_v18 }
 0x132   : > { %5198 = vmatprep.mubr.bf16.mxu0 %v3661_v58 }
 0x134   : > { %5003 = vmatmul.mubr.bf16.gmra.mrb[20].mxu1 %v6251_v24  ;;  %v2183_v24 = vpack.c.bf16 %v2167_v59, %v2166_v49 }
 0x135   : > { %5006 = vmatprep.mubr.bf16.mxu1 %v6260_v25 }
 0x139   : > { %5199 = vmatmul.mubr.bf16.gmra.mrb[24].mxu0 %v3662_v35 }
 0x13a   : > { %5202 = vmatprep.mubr.bf16.mxu0 %v3663_v29 }
 0x13c   : > { %5007 = vmatmul.mubr.bf16.gmra.mrb[24].mxu1 %v6262_v40 }
 0x13d   : > { %5010 = vmatprep.mubr.bf16.mxu1 %v2182_v14 }
 0x141   : > { %5203 = vmatmul.mubr.bf16.gmra.mrb[28].mxu0 %v3664_v41 }
 0x144   : > { %5011 = vmatmul.mubr.bf16.gmra.mrb[28].mxu1 %v2183_v24 }
 0x1bf   : > { %v4936_v25 = vpop.f32.mrb[0].mxu1 }
 0x1c0   : > { %v1945_v47 = vpop.f32.mrb[1].mxu1 }
 0x1c1   : > { %v4937_v3 = vpop.f32.mrb[2].mxu1 }
 0x1c2   : > { %v1948_v63 = vpop.f32.mrb[3].mxu1 }
 0x1c7   : > { %v4940_v46 = vpop.f32.mrb[4].mxu1 }
 0x1c8   : > { %v1961_v53 = vpop.f32.mrb[5].mxu1 }
 0x1c9   : > { %v4941_v8 = vpop.f32.mrb[6].mxu1 }
 0x1ca   : > { %v1964_v39 = vpop.f32.mrb[7].mxu1 }
 0x1cf   : > { %v4944_v38 = vpop.f32.mrb[8].mxu1 }
 0x1d0   : > { %v1977_v56 = vpop.f32.mrb[9].mxu1 }
 0x1d1   : > { %v4945_v57 = vpop.f32.mrb[10].mxu1 }
 0x1d2   : > { %v6295_v40 = vpop.f32.mrb[11].mxu1 }
 0x1d7   : > { %v6297_v15 = vpop.f32.mrb[12].mxu1 }
 0x1d8   : > { %v6299_v0 = vpop.f32.mrb[13].mxu1 }
 0x1d9   : > { %v6301_v9 = vpop.f32.mrb[14].mxu1 }
 0x1da   : > { %v6304_v19 = vpop.f32.mrb[15].mxu1 }
 0x1dc   : > { %v5176_v32 = vpop.f32.mrb[0].mxu0 }
 0x1dd   : > { %v5222_v45 = vadd.f32 %v5176_v32, %v4936_v25  ;;  %v3796_v54 = vpop.f32.mrb[1].mxu0 }
 0x1de   : > { %v5223_v42 = vadd.f32 %v3796_v54, %v1945_v47  ;;  %v5177_v55 = vpop.f32.mrb[2].mxu0 }
 0x1df   : > { %4129 = vst [vmem:[%s6309_s23 + $0x10] sm:$0xff] %v5222_v45  ;;  %v5224_v2 = vadd.f32 %v5177_v55, %v4937_v3  ;;  %v3799_v44 = vpop.f32.mrb[3].mxu0  ;;  %v4059_v23 = vmul.f32 %v5222_v45, %v5222_v45 }
 0x1e0   : > { %4127 = vst [vmem:[%s6309_s23] sm:$0xff] %v5223_v42  ;;  %v5225_v51 = vadd.f32 %v3799_v44, %v1948_v63  ;;  %v4057_v27 = vmul.f32 %v5223_v42, %v5223_v42 }
 0x1e1   : > { %4130 = vst [vmem:[%s6309_s23 + $0x18] sm:$0xff] %v5224_v2  ;;  %v4060_v22 = vmul.f32 %v5224_v2, %v5224_v2 }
 0x1e2   : > { %v4019_v28 = vadd.f32 %v5225_v51, %v5223_v42  ;;  %v4058_v52 = vmul.f32 %v5225_v51, %v5225_v51  ;;  %4128 = vst [vmem:[%s6309_s23 + $0x8] sm:$0xff] %v5225_v51 }
 0x1e4   : > { %v4020_v5 = vadd.f32 %v5222_v45, %v4019_v28  ;;  %v4089_v4 = vadd.f32 %v4058_v52, %v4057_v27  ;;  %v5180_v11 = vpop.f32.mrb[4].mxu0 }
 0x1e5   : > { %v5226_v1 = vadd.f32 %v5180_v11, %v4940_v46  ;;  %v3812_v20 = vpop.f32.mrb[5].mxu0 }
 0x1e6   : > { %v4090_v30 = vadd.f32 %v4089_v4, %v4059_v23  ;;  %v5227_v33 = vadd.f32 %v3812_v20, %v1961_v53  ;;  %v4021_v61 = vadd.f32 %v5224_v2, %v4020_v5  ;;  %v5181_v13 = vpop.f32.mrb[6].mxu0 }
 0x1e7   : > { %4133 = vst [vmem:[%s6309_s23 + $0x30] sm:$0xff] %v5226_v1  ;;  %v5228_v7 = vadd.f32 %v5181_v13, %v4941_v8  ;;  %v3815_v34 = vpop.f32.mrb[7].mxu0  ;;  %v4063_v18 = vmul.f32 %v5226_v1, %v5226_v1 }
 0x1e8   : > { %v4022_v50 = vadd.f32 %v5227_v33, %v4021_v61  ;;  %v4061_v62 = vmul.f32 %v5227_v33, %v5227_v33  ;;  %v4091_v21 = vadd.f32 %v4090_v30, %v4060_v22  ;;  %4131 = vst [vmem:[%s6309_s23 + $0x20] sm:$0xff] %v5227_v33  ;;  %v5229_v16 = vadd.f32 %v3815_v34, %v1964_v39 }
 0x1e9   : > { %4134 = vst [vmem:[%s6309_s23 + $0x38] sm:$0xff] %v5228_v7  ;;  %v4064_v35 = vmul.f32 %v5228_v7, %v5228_v7 }
 0x1ea   : > { %v4092_v48 = vadd.f32 %v4091_v21, %v4061_v62  ;;  %v4023_v37 = vadd.f32 %v5229_v16, %v4022_v50  ;;  %v4062_v10 = vmul.f32 %v5229_v16, %v5229_v16  ;;  %4132 = vst [vmem:[%s6309_s23 + $0x28] sm:$0xff] %v5229_v16 }
 0x1ec   : > { %v4024_v58 = vadd.f32 %v5226_v1, %v4023_v37  ;;  %v4093_v6 = vadd.f32 %v4092_v48, %v4062_v10  ;;  %v5184_v12 = vpop.f32.mrb[8].mxu0 }
 0x1ed   : > { %v5230_v26 = vadd.f32 %v5184_v12, %v4944_v38  ;;  %v3828_v60 = vpop.f32.mrb[9].mxu0 }
 0x1ee   : > { %v4094_v43 = vadd.f32 %v4093_v6, %v4063_v18  ;;  %v5231_v31 = vadd.f32 %v3828_v60, %v1977_v56  ;;  %v4025_v29 = vadd.f32 %v5228_v7, %v4024_v58  ;;  %v5185_v14 = vpop.f32.mrb[10].mxu0 }
 0x1ef   : > { %4137 = vst [vmem:[%s6309_s23 + $0x50] sm:$0xff] %v5230_v26  ;;  %v5232_v17 = vadd.f32 %v5185_v14, %v4945_v57  ;;  %v3831_v36 = vpop.f32.mrb[11].mxu0  ;;  %v4067_v63 = vmul.f32 %v5230_v26, %v5230_v26 }
 0x1f0   : > { %v4026_v49 = vadd.f32 %v5231_v31, %v4025_v29  ;;  %v4065_v59 = vmul.f32 %v5231_v31, %v5231_v31  ;;  %v4095_v41 = vadd.f32 %v4094_v43, %v4064_v35  ;;  %4135 = vst [vmem:[%s6309_s23 + $0x40] sm:$0xff] %v5231_v31  ;;  %v5233_v24 = vadd.f32 %v3831_v36, %v6295_v40 }
 0x1f1   : > { %4138 = vst [vmem:[%s6309_s23 + $0x58] sm:$0xff] %v5232_v17  ;;  %v4068_v56 = vmul.f32 %v5232_v17, %v5232_v17 }
 0x1f2   : > { %v4096_v25 = vadd.f32 %v4095_v41, %v4065_v59  ;;  %v4027_v47 = vadd.f32 %v5233_v24, %v4026_v49  ;;  %v4066_v3 = vmul.f32 %v5233_v24, %v5233_v24  ;;  %4136 = vst [vmem:[%s6309_s23 + $0x48] sm:$0xff] %v5233_v24 }
 0x1f4   : > { %v4028_v46 = vadd.f32 %v5230_v26, %v4027_v47  ;;  %v4097_v53 = vadd.f32 %v4096_v25, %v4066_v3  ;;  %v5188_v8 = vpop.f32.mrb[12].mxu0 }
 0x1f5   : > { %v5234_v39 = vadd.f32 %v5188_v8, %v6297_v15  ;;  %v3844_v38 = vpop.f32.mrb[13].mxu0 }
 0x1f6   : > { %v4098_v57 = vadd.f32 %v4097_v53, %v4067_v63  ;;  %v5235_v40 = vadd.f32 %v3844_v38, %v6299_v0  ;;  %v4029_v32 = vadd.f32 %v5232_v17, %v4028_v46  ;;  %v5189_v45 = vpop.f32.mrb[14].mxu0 }
 0x1f7   : > { %4141 = vst [vmem:[%s6309_s23 + $0x70] sm:$0xff] %v5234_v39  ;;  %v5236_v54 = vadd.f32 %v5189_v45, %v6301_v9  ;;  %v3847_v42 = vpop.f32.mrb[15].mxu0  ;;  %v4071_v52 = vmul.f32 %v5234_v39, %v5234_v39 }
 0x1f8   : > { %v4030_v55 = vadd.f32 %v5235_v40, %v4029_v32  ;;  %v4069_v2 = vmul.f32 %v5235_v40, %v5235_v40  ;;  %v4099_v44 = vadd.f32 %v4098_v57, %v4068_v56  ;;  %4139 = vst [vmem:[%s6309_s23 + $0x60] sm:$0xff] %v5235_v40  ;;  %v5237_v51 = vadd.f32 %v3847_v42, %v6304_v19 }
 0x1f9   : > { %4142 = vst [vmem:[%s6309_s23 + $0x78] sm:$0xff] %v5236_v54  ;;  %v4072_v11 = vmul.f32 %v5236_v54, %v5236_v54 }
 0x1fa   : > { %v4100_v15 = vadd.f32 %v4099_v44, %v4069_v2  ;;  %v4031_v27 = vadd.f32 %v5237_v51, %v4030_v55  ;;  %v4070_v28 = vmul.f32 %v5237_v51, %v5237_v51  ;;  %4140 = vst [vmem:[%s6309_s23 + $0x68] sm:$0xff] %v5237_v51 }
 0x1fc   : > { %v4032_v0 = vadd.f32 %v5234_v39, %v4031_v27  ;;  %v4101_v23 = vadd.f32 %v4100_v15, %v4070_v28  ;;  %v5192_v5 = vpop.f32.mrb[16].mxu0 }
 0x1fd   : > { %v3860_v4 = vpop.f32.mrb[17].mxu0 }
 0x1fe   : > { %v4102_v9 = vadd.f32 %v4101_v23, %v4071_v52  ;;  %v4033_v20 = vadd.f32 %v5236_v54, %v4032_v0  ;;  %v5193_v22 = vpop.f32.mrb[18].mxu0 }
 0x1ff   : > { %v5000_v1 = vpop.f32.mrb[16].mxu1  ;;  %v3863_v33 = vpop.f32.mrb[19].mxu0 }
 0x200   : > { %v5238_v30 = vadd.f32 %v5192_v5, %v5000_v1  ;;  %v2379_v19 = vpop.f32.mrb[17].mxu1  ;;  %v4103_v13 = vadd.f32 %v4102_v9, %v4072_v11 }
 0x201   : > { %v5239_v61 = vadd.f32 %v3860_v4, %v2379_v19  ;;  %v5001_v7 = vpop.f32.mrb[18].mxu1 }
 0x202   : > { %4145 = vst [vmem:[%s6309_s23 + $0x90] sm:$0xff] %v5238_v30  ;;  %v5240_v34 = vadd.f32 %v5193_v22, %v5001_v7  ;;  %v2382_v50 = vpop.f32.mrb[19].mxu1  ;;  %v4075_v6 = vmul.f32 %v5238_v30, %v5238_v30 }
 0x203   : > { %v4034_v62 = vadd.f32 %v5239_v61, %v4033_v20  ;;  %v4073_v21 = vmul.f32 %v5239_v61, %v5239_v61  ;;  %4143 = vst [vmem:[%s6309_s23 + $0x80] sm:$0xff] %v5239_v61  ;;  %v5241_v16 = vadd.f32 %v3863_v33, %v2382_v50 }
 0x204   : > { %4146 = vst [vmem:[%s6309_s23 + $0x98] sm:$0xff] %v5240_v34  ;;  %v5196_v18 = vpop.f32.mrb[20].mxu0  ;;  %v4076_v14 = vmul.f32 %v5240_v34, %v5240_v34 }
 0x205   : > { %v4104_v48 = vadd.f32 %v4103_v13, %v4073_v21  ;;  %v4035_v37 = vadd.f32 %v5241_v16, %v4034_v62  ;;  %v4074_v10 = vmul.f32 %v5241_v16, %v5241_v16  ;;  %4144 = vst [vmem:[%s6309_s23 + $0x88] sm:$0xff] %v5241_v16  ;;  %v3876_v58 = vpop.f32.mrb[21].mxu0 }
 0x206   : > { %v5197_v35 = vpop.f32.mrb[22].mxu0 }
 0x207   : > { %v4036_v12 = vadd.f32 %v5238_v30, %v4035_v37  ;;  %v4105_v26 = vadd.f32 %v4104_v48, %v4074_v10  ;;  %v5004_v60 = vpop.f32.mrb[20].mxu1  ;;  %v3879_v29 = vpop.f32.mrb[23].mxu0 }
 0x208   : > { %v5242_v43 = vadd.f32 %v5196_v18, %v5004_v60  ;;  %v2395_v31 = vpop.f32.mrb[21].mxu1 }
 0x209   : > { %v4106_v17 = vadd.f32 %v4105_v26, %v4075_v6  ;;  %v5243_v36 = vadd.f32 %v3876_v58, %v2395_v31  ;;  %v4037_v49 = vadd.f32 %v5240_v34, %v4036_v12  ;;  %v5005_v59 = vpop.f32.mrb[22].mxu1 }
 0x20a   : > { %4149 = vst [vmem:[%s6309_s23 + $0xb0] sm:$0xff] %v5242_v43  ;;  %v5244_v41 = vadd.f32 %v5197_v35, %v5005_v59  ;;  %v2398_v24 = vpop.f32.mrb[23].mxu1  ;;  %v4079_v56 = vmul.f32 %v5242_v43, %v5242_v43 }
 0x20b   : > { %v4038_v25 = vadd.f32 %v5243_v36, %v4037_v49  ;;  %v4077_v47 = vmul.f32 %v5243_v36, %v5243_v36  ;;  %v4107_v3 = vadd.f32 %v4106_v17, %v4076_v14  ;;  %4147 = vst [vmem:[%s6309_s23 + $0xa0] sm:$0xff] %v5243_v36  ;;  %v5245_v63 = vadd.f32 %v3879_v29, %v2398_v24 }
 0x20c   : > { %4150 = vst [vmem:[%s6309_s23 + $0xb8] sm:$0xff] %v5244_v41  ;;  %v5200_v39 = vpop.f32.mrb[24].mxu0  ;;  %v4080_v2 = vmul.f32 %v5244_v41, %v5244_v41 }
 0x20d   : > { %v4108_v46 = vadd.f32 %v4107_v3, %v4077_v47  ;;  %v4039_v53 = vadd.f32 %v5245_v63, %v4038_v25  ;;  %v4078_v8 = vmul.f32 %v5245_v63, %v5245_v63  ;;  %4148 = vst [vmem:[%s6309_s23 + $0xa8] sm:$0xff] %v5245_v63  ;;  %v3892_v38 = vpop.f32.mrb[25].mxu0 }
 0x20e   : > { %v5201_v45 = vpop.f32.mrb[26].mxu0 }
 0x20f   : > { %v4040_v57 = vadd.f32 %v5242_v43, %v4039_v53  ;;  %v4109_v40 = vadd.f32 %v4108_v46, %v4078_v8  ;;  %v5008_v32 = vpop.f32.mrb[24].mxu1  ;;  %v3895_v55 = vpop.f32.mrb[27].mxu0 }
 0x210   : > { %v5246_v54 = vadd.f32 %v5200_v39, %v5008_v32  ;;  %v2411_v42 = vpop.f32.mrb[25].mxu1 }
 0x211   : > { %v4110_v44 = vadd.f32 %v4109_v40, %v4079_v56  ;;  %v5247_v51 = vadd.f32 %v3892_v38, %v2411_v42  ;;  %v4041_v15 = vadd.f32 %v5244_v41, %v4040_v57  ;;  %v5009_v27 = vpop.f32.mrb[26].mxu1 }
 0x212   : > { %4153 = vst [vmem:[%s6309_s23 + $0xd0] sm:$0xff] %v5246_v54  ;;  %v5248_v28 = vadd.f32 %v5201_v45, %v5009_v27  ;;  %v2414_v52 = vpop.f32.mrb[27].mxu1  ;;  %v4083_v30 = vmul.f32 %v5246_v54, %v5246_v54 }
 0x213   : > { %v4042_v0 = vadd.f32 %v5247_v51, %v4041_v15  ;;  %v4081_v23 = vmul.f32 %v5247_v51, %v5247_v51  ;;  %v4111_v5 = vadd.f32 %v4110_v44, %v4080_v2  ;;  %4151 = vst [vmem:[%s6309_s23 + $0xc0] sm:$0xff] %v5247_v51  ;;  %v5249_v4 = vadd.f32 %v3895_v55, %v2414_v52 }
 0x214   : > { %4154 = vst [vmem:[%s6309_s23 + $0xd8] sm:$0xff] %v5248_v28  ;;  %v5204_v20 = vpop.f32.mrb[28].mxu0  ;;  %v4084_v62 = vmul.f32 %v5248_v28, %v5248_v28 }
 0x215   : > { %v4112_v11 = vadd.f32 %v4111_v5, %v4081_v23  ;;  %v4043_v9 = vadd.f32 %v5249_v4, %v4042_v0  ;;  %v4082_v1 = vmul.f32 %v5249_v4, %v5249_v4  ;;  %4152 = vst [vmem:[%s6309_s23 + $0xc8] sm:$0xff] %v5249_v4  ;;  %v3908_v22 = vpop.f32.mrb[29].mxu0 }
 0x216   : > { %v5205_v13 = vpop.f32.mrb[30].mxu0 }
 0x217   : > { %v4044_v19 = vadd.f32 %v5246_v54, %v4043_v9  ;;  %v4113_v33 = vadd.f32 %v4112_v11, %v4082_v1  ;;  %v5012_v61 = vpop.f32.mrb[28].mxu1  ;;  %v3911_v50 = vpop.f32.mrb[31].mxu0 }
 0x218   : > { %v5250_v7 = vadd.f32 %v5204_v20, %v5012_v61  ;;  %v2427_v34 = vpop.f32.mrb[29].mxu1 }
 0x219   : > { %v4114_v21 = vadd.f32 %v4113_v33, %v4083_v30  ;;  %v5251_v16 = vadd.f32 %v3908_v22, %v2427_v34  ;;  %v4045_v48 = vadd.f32 %v5248_v28, %v4044_v19  ;;  %v5013_v37 = vpop.f32.mrb[30].mxu1 }
 0x21a   : > { %4157 = vst [vmem:[%s6309_s23 + $0xf0] sm:$0xff] %v5250_v7  ;;  %v5252_v10 = vadd.f32 %v5205_v13, %v5013_v37  ;;  %v2430_v18 = vpop.f32.mrb[31].mxu1  ;;  %v4087_v31 = vmul.f32 %v5250_v7, %v5250_v7 }
 0x21b   : > { %v4046_v58 = vadd.f32 %v5251_v16, %v4045_v48  ;;  %v4085_v6 = vmul.f32 %v5251_v16, %v5251_v16  ;;  %v4115_v12 = vadd.f32 %v4114_v21, %v4084_v62  ;;  %4155 = vst [vmem:[%s6309_s23 + $0xe0] sm:$0xff] %v5251_v16  ;;  %v5253_v26 = vadd.f32 %v3911_v50, %v2430_v18 }
 0x21c   : > { %4158 = vst [vmem:[%s6309_s23 + $0xf8] sm:$0xff] %v5252_v10  ;;  %v4088_v17 = vmul.f32 %v5252_v10, %v5252_v10 }
 0x21d   : > { %v4116_v60 = vadd.f32 %v4115_v12, %v4085_v6  ;;  %v4047_v35 = vadd.f32 %v5253_v26, %v4046_v58  ;;  %v4086_v43 = vmul.f32 %v5253_v26, %v5253_v26  ;;  %4156 = vst [vmem:[%s6309_s23 + $0xe8] sm:$0xff] %v5253_v26 }
 0x21f   : > { %v4048_v29 = vadd.f32 %v5250_v7, %v4047_v35  ;;  %v4117_v14 = vadd.f32 %v4116_v60, %v4086_v43 }
 0x221   : > { %v4049_v36 = vadd.f32 %v5252_v10, %v4048_v29  ;;  %v4118_v49 = vadd.f32 %v4117_v14, %v4087_v31 }
 0x223   : > { %v4050_v59 = vrot.slane %v4049_v36, 4  ;;  %v4119_v41 = vadd.f32 %v4118_v49, %v4088_v17 }
 0x225   : > { %v4051_v24 = vadd.f32 %v4050_v59, %v4049_v36  ;;  %v4120_v25 = vrot.slane %v4119_v41, 4 }
 0x227   : > { %v4052_v47 = vrot.slane %v4051_v24, 2  ;;  %v4121_v3 = vadd.f32 %v4120_v25, %v4119_v41 }
 0x229   : > { %v4053_v63 = vadd.f32 %v4052_v47, %v4051_v24  ;;  %v4122_v46 = vrot.slane %v4121_v3, 2 }
 0x22b   : > { %v4054_v53 = vrot.slane %v4053_v63, 1  ;;  %v4123_v8 = vadd.f32 %v4122_v46, %v4121_v3 }
 0x22d   : > { %v4055_v39 = vadd.f32 %v4054_v53, %v4053_v63  ;;  %v4124_v38 = vrot.slane %v4123_v8, 1 }
 0x22f   : > { %4056 = vst [vmem:[%s293_s28] sm:$0x1] %v4055_v39  ;;  %v4125_v56 = vadd.f32 %v4124_v38, %v4123_v8 }
 0x231   : > { %4126 = vst [vmem:[%s296_s8] sm:$0x1] %v4125_v56 }
 0x232 PF: > { %s19_s26 = sadd.s32 1, %s5574_s26  }
 0x233   : > { %p16_p4 = scmp.ge.s32.totalorder %s19_s26, 4  }
 0x235   :  { %18 = sbr.rel (!%p16_p4) target bundleno = 2 (0x2), region = 104 }

</bundles_post_ra>
